<compile_context>
chip_gen: v7x
topology: tpu7x:2x2x1
jax: 0.10.0
libtpu: 0.0.40
codegen_flags: <defaults>
</compile_context>

<pallas_src>
import functools

import numpy as np
import jax
import jax.numpy as jnp
from jax import lax
from jax.experimental import pallas as pl
from jax.experimental.pallas import tpu as pltpu


def _round_up(n, k):
    return ((n + k - 1) // k) * k


# ----------------------------------------------------------------------------
# TripletFeatures index set (FWM type)
# ----------------------------------------------------------------------------
def fwm_index_set(M, rho):
    """FWM triplet indices (m, n).

    TODO(synk): TripletFeatures source was not provided; this uses the
    standard FWM rule: m != 0, n != 0 (SPM/XPM handled by C00 / xpm convs),
    |m*n| <= rho*L/2, and all three taps inside the length-M window.
    """
    L = M - 1
    half = L // 2
    idx = []
    for m in range(-half, half + 1):
        for n in range(-half, half + 1):
            if m == 0 or n == 0:
                continue
            if abs(m * n) > rho * L / 2:
                continue
            if abs(m + n) > half:
                continue
            idx.append((m, n))
    return idx


# ----------------------------------------------------------------------------
# Host-side packing of one EqAMPBC step's weights into two matmul operands.
#
# Column order of W_big is tap-major:  col = m*8 + ch, with channels
#   ch 0..3 : Er0, Ei0, Er1, Ei1              (scaled field)
#   ch 4..5 : |E0|^2, |E1|^2                  (power per mode)
#   ch 6..7 : Re(E0 conj(E1)), Im(E0 conj(E1))
#
# Row sections (Hp = hdim rounded up to 8 so in-kernel slices stay vreg
# aligned; padded rows are zero and contribute nothing):
#   sections 0..3  : E_{k+n}   gather, planes (r0, i0, r1, i1)  [Hp rows each]
#   sections 4..7  : E_{k+m+n} gather
#   sections 8..11 : E_{k+m}   gather
#   last 8 rows    : centre taps (r0,i0,r1,i1), phi0, phi1, yr, yi0
#     phi_i rows fold  C00 * Ptot(center) + 2*zcv(xpm_conv1, 2*p_i + p_j)
#     y rows are the zcv(xpm_conv2, .) filters used by the IXIXPM term.
# ----------------------------------------------------------------------------
def pack_step_weights(params, index, M):
    wfr, wfi, w1z, w2z, c00 = [np.asarray(p, np.float32) for p in params]
    w1v = w1z.reshape(-1)                      # centre tap already zeroed
    w2v = w2z.reshape(-1)
    c00v = float(c00.reshape(-1)[0])
    hdim = len(index)
    Hp = max(8, _round_up(hdim, 8))
    k0 = M // 2

    W = np.zeros((12 * Hp + 8, 8 * M), np.float32)
    if hdim:
        m_arr = np.array([m for m, _ in index], np.int64)
        n_arr = np.array([n for _, n in index], np.int64)
        offs = (k0 + n_arr, k0 + m_arr + n_arr, k0 + m_arr)   # roles n, m+n, m
        for role in range(3):
            for plane in range(4):
                s = role * 4 + plane
                for h in range(hdim):
                    W[s * Hp + h, offs[role][h] * 8 + plane] = 1.0

    base = 12 * Hp
    for plane in range(4):                                    # centre taps
        W[base + plane, k0 * 8 + plane] = 1.0
    a = 4.0 * w1v.copy(); a[k0] += c00v        # phi_i = a.pw_i + b.pw_j
    b = 2.0 * w1v.copy(); b[k0] += c00v
    for m in range(M):
        W[base + 4, m * 8 + 4] = a[m]; W[base + 4, m * 8 + 5] = b[m]   # phi0
        W[base + 5, m * 8 + 4] = b[m]; W[base + 5, m * 8 + 5] = a[m]   # phi1
        W[base + 6, m * 8 + 6] = w2v[m]                                # yr
        W[base + 7, m * 8 + 7] = w2v[m]                                # yi0

    # FWM feature contraction: rows (Re0, Im0, Re1, Im1) against [Tr0;Ti0;Tr1;Ti1]
    Wf = np.zeros((4, 4 * Hp), np.float32)
    Wf[0, 0:hdim] = wfr[0]; Wf[0, Hp:Hp + hdim] = -wfi[0]
    Wf[1, 0:hdim] = wfi[0]; Wf[1, Hp:Hp + hdim] = wfr[0]
    Wf[2, 2 * Hp:2 * Hp + hdim] = wfr[1]; Wf[2, 3 * Hp:3 * Hp + hdim] = -wfi[1]
    Wf[3, 2 * Hp:2 * Hp + hdim] = wfi[1]; Wf[3, 3 * Hp:3 * Hp + hdim] = wfr[1]
    return jnp.asarray(W), jnp.asarray(Wf)


# ----------------------------------------------------------------------------
# Pallas kernel: one tile of `tw` windows for one batch element.
# ----------------------------------------------------------------------------
def _ampbc_kernel(M, Hp, sp_ref, seq0_ref, seq1_ref, wbig_ref, wfwm_ref, out_ref):
    tw = out_ref.shape[-1]
    hi = lax.Precision.HIGHEST

    sp = sp_ref[pl.program_id(0)]              # sqrt(P) of this batch element
    inv_sp = 1.0 / sp                          # single scalar divide per tile

    # contiguous chunk covering this tile's windows + halo (lane-dense, 2 DMAs)
    chunk = jnp.concatenate([seq0_ref[...], seq1_ref[...]], axis=-1) * sp
    chunk = chunk[:, :tw + 128]                # halo needs only M-1 <= 128 cols
    er0, ei0 = chunk[0:1], chunk[1:2]
    er1, ei1 = chunk[2:3], chunk[3:4]
    pw0 = er0 * er0 + ei0 * ei0
    pw1 = er1 * er1 + ei1 * ei1
    x2r = er0 * er1 + ei0 * ei1                # Re(E0 conj(E1))
    x2i = ei0 * er1 - er0 * ei1                # Im(E0 conj(E1))
    ch = jnp.concatenate([chunk, pw0, pw1, x2r, x2i], axis=0)   # [8, tw+128]

    # in-kernel "unfold": tap-major plane  T[m*8 + c, w] = ch[c, w + m]
    T = jnp.concatenate([ch[:, m:m + tw] for m in range(M)], axis=0)  # [8M, tw]

    # one MXU matmul performs every gather / FIR filter of the step
    G = jnp.dot(wbig_ref[...], T,
                preferred_element_type=jnp.float32, precision=hi)

    sec = lambda s: G[s * Hp:(s + 1) * Hp, :]
    gn = (sec(0), sec(1), sec(2), sec(3))      # E_{k+n}    (r0, i0, r1, i1)
    gmn = (sec(4), sec(5), sec(6), sec(7))     # E_{k+m+n}
    gm = (sec(8), sec(9), sec(10), sec(11))    # E_{k+m}
    misc = G[12 * Hp:12 * Hp + 8, :]
    cr0, ci0, cr1, ci1 = misc[0:1], misc[1:2], misc[2:3], misc[3:4]
    phi0, phi1, yr, yi = misc[4:5], misc[5:6], misc[6:7], misc[7:8]

    # shared triplet term:  sum_i E_{k+n,i} * conj(E_{k+m+n,i})   [Hp, tw]
    ssum_r = gn[0] * gmn[0] + gn[1] * gmn[1] + gn[2] * gmn[2] + gn[3] * gmn[3]
    ssum_i = gn[1] * gmn[0] - gn[0] * gmn[1] + gn[3] * gmn[2] - gn[2] * gmn[3]

    tr0 = ssum_r * gm[0] - ssum_i * gm[1]
    ti0 = ssum_r * gm[1] + ssum_i * gm[0]
    tr1 = ssum_r * gm[2] - ssum_i * gm[3]
    ti1 = ssum_r * gm[3] + ssum_i * gm[2]

    # FWM feature contraction on the MXU (K = 4*Hp, typically 128)
    TT = jnp.concatenate([tr0, ti0, tr1, ti1], axis=0)
    ifwm = jnp.dot(wfwm_ref[...], TT,
                   preferred_element_type=jnp.float32, precision=hi)  # [4, tw]

    # centre sample rotated by exp(1j * phi)
    c0c, s0c = jnp.cos(phi0), jnp.sin(phi0)
    c1c, s1c = jnp.cos(phi1), jnp.sin(phi1)
    rot_r0 = cr0 * c0c - ci0 * s0c
    rot_i0 = cr0 * s0c + ci0 * c0c
    rot_r1 = cr1 * c1c - ci1 * s1c
    rot_i1 = cr1 * s1c + ci1 * c1c

    # IXIXPM: 1j * E_j(centre) * y_i  with  y_0 = yr + 1j*yi, y_1 = yr - 1j*yi
    ixp_r0 = -(cr1 * yi + ci1 * yr)
    ixp_i0 = cr1 * yr - ci1 * yi
    ixp_r1 = cr0 * yi - ci0 * yr
    ixp_i1 = cr0 * yr + ci0 * yi

    out_ref[...] = jnp.concatenate(
        [ifwm[0:1] + rot_r0 + ixp_r0,
         ifwm[1:2] + rot_i0 + ixp_i0,
         ifwm[2:3] + rot_r1 + ixp_r1,
         ifwm[3:4] + rot_i1 + ixp_i1], axis=0) * inv_sp


# ----------------------------------------------------------------------------
# One EqAMPBCstep (discard=True)
# ----------------------------------------------------------------------------
def eq_ampbc_step_pallas(x, sqrtP, wbig, wfwm, M, *, tw=512):
    batch, L, nmodes = x.shape
    assert nmodes == 2
    nwin = L - M + 1
    assert nwin >= 1 and M - 1 <= 128

    Hp = wfwm.shape[-1] // 4
    tw = max(128, (tw // 128) * 128)
    tw = min(tw, _round_up(nwin, 128))         # don't over-pad tiny inputs
    n_tiles = -(-nwin // tw)
    nwp = n_tiles * tw
    Lp = (n_tiles + 1) * tw                    # +1 block: halo for the last tile

    # raw sequence as 4 real planes, windows built inside the kernel
    seq = jnp.stack([jnp.real(x[..., 0]), jnp.imag(x[..., 0]),
                     jnp.real(x[..., 1]), jnp.imag(x[..., 1])],
                    axis=1).astype(jnp.float32)            # [batch, 4, L]
    seq = jnp.pad(seq, ((0, 0), (0, 0), (0, Lp - L)))

    kern = functools.partial(_ampbc_kernel, M, Hp)
    seq_spec0 = pl.BlockSpec((None, 4, tw), lambda b, i, sp: (b, 0, i))
    seq_spec1 = pl.BlockSpec((None, 4, tw), lambda b, i, sp: (b, 0, i + 1))
    wb_spec = pl.BlockSpec(wbig.shape, lambda b, i, sp: (0, 0))
    wf_spec = pl.BlockSpec(wfwm.shape, lambda b, i, sp: (0, 0))
    out_spec = pl.BlockSpec((None, 4, tw), lambda b, i, sp: (b, 0, i))

    out = pl.pallas_call(
        kern,
        grid_spec=pltpu.PrefetchScalarGridSpec(
            num_scalar_prefetch=1,             # sqrt(P) per batch element (SMEM)
            grid=(batch, n_tiles),
            in_specs=[seq_spec0, seq_spec1, wb_spec, wf_spec],
            out_specs=out_spec),
        out_shape=jax.ShapeDtypeStruct((batch, 4, nwp), jnp.float32),
        compiler_params=pltpu.CompilerParams(
            dimension_semantics=("parallel", "parallel")),
    )(sqrtP.astype(jnp.float32), seq, seq, wbig, wfwm)

    out = out[:, :, :nwin]
    y = jnp.stack([out[:, 0] + 1j * out[:, 1],
                   out[:, 2] + 1j * out[:, 3]], axis=-1)
    return y.astype(jnp.complex64)


def multi_step_ampbc(x, task_info, packed_steps, M, *, tw=512):
    nmodes = x.shape[-1]
    # TODO(synk): get_power source not provided; using pkufiber's convention
    # P = 10^(P_dBm/10) / Nmodes (task_info[:, 0] is launch power in dBm).
    P = 10.0 ** (task_info[:, 0] / 10.0) / nmodes
    sqrtP = jnp.sqrt(P).astype(jnp.float32)
    for wbig, wfwm in packed_steps:
        x = eq_ampbc_step_pallas(x, sqrtP, wbig, wfwm, M, tw=tw)
    return x


# ----------------------------------------------------------------------------
# Deterministic parameter initialisation (shapes from the torch __init__)
# ----------------------------------------------------------------------------
def init_params(key, M, hdim, scale=0.02):
    kc, kfr, kfi, k1, k2 = jax.random.split(key, 5)
    c00 = scale * jax.random.normal(kc, ())                 # nn.Parameter ()
    wfr = scale * jax.random.normal(kfr, (2, hdim))         # ComplexLinear.real
    wfi = scale * jax.random.normal(kfi, (2, hdim))         # ComplexLinear.imag
    w1 = scale * jax.random.normal(k1, (M,))                # xpm_conv1.weight
    w2 = scale * jax.random.normal(k2, (M,))                # xpm_conv2.weight
    k0 = M // 2
    # zcv_filter == conv minus its center tap -> zero the center tap up front
    w1z = w1.at[k0].set(0.0)[None, :].astype(jnp.float32)   # [1, M]
    w2z = w2.at[k0].set(0.0)[None, :].astype(jnp.float32)
    return (wfr.astype(jnp.float32), wfi.astype(jnp.float32),
            w1z, w2z, jnp.reshape(c00, (1, 1)).astype(jnp.float32))


# ----------------------------------------------------------------------------
# Pure-JAX reference (same math, independent gather path) for validation
# ----------------------------------------------------------------------------
def reference_step(x, sqrtP, params, index, M):
    batch, L, _ = x.shape
    nwin = L - M + 1
    k0 = M // 2
    idx = jnp.arange(nwin)[:, None] + jnp.arange(M)[None, :]
    E = x[:, idx, :] * sqrtP[:, None, None, None]           # [b, nw, M, 2]
    wfr, wfi, w1z, w2z, c00 = params
    wf = (wfr + 1j * wfi).astype(jnp.complex64)             # [2, hdim]
    w1 = w1z[0]
    w2 = w2z[0]
    m = jnp.array([mm for mm, _ in index])
    n = jnp.array([nn for _, nn in index])
    hi = jax.lax.Precision.HIGHEST

    En = E[:, :, k0 + n, :]
    Emn = E[:, :, k0 + m + n, :]
    Em = E[:, :, k0 + m, :]
    Ssum = jnp.sum(En * jnp.conj(Emn), axis=-1, keepdims=True)
    T = Ssum * Em                                           # [b, nw, hdim, 2]
    ifwm = jnp.einsum('bwhi,ih->bwi', T, wf, precision=hi)

    pw = jnp.abs(E) ** 2
    ps = 2.0 * pw + jnp.roll(pw, 1, axis=-1)
    phi = (c00[0, 0] * jnp.sum(pw[:, :, k0, :], axis=-1, keepdims=True)
           + 2.0 * jnp.einsum('bwmi,m->bwi', ps, w1, precision=hi))

    x2 = E * jnp.roll(jnp.conj(E), 1, axis=-1)
    y = (jnp.einsum('bwmi,m->bwi', x2.real, w2, precision=hi)
         + 1j * jnp.einsum('bwmi,m->bwi', x2.imag, w2, precision=hi))
    ixp = 1j * jnp.roll(E[:, :, k0, :], 1, axis=-1) * y

    out = ifwm + ixp + E[:, :, k0, :] * jnp.exp(1j * phi)
    out = out / sqrtP[:, None, None]
    return out.astype(jnp.complex64)


def reference_multi_step(x, task_info, step_params, index, M):
    nmodes = x.shape[-1]
    P = 10.0 ** (task_info[:, 0] / 10.0) / nmodes
    sqrtP = jnp.sqrt(P).astype(jnp.float32)
    for params in step_params:
        x = reference_step(x, sqrtP, params, index, M)
    return x


# ----------------------------------------------------------------------------
if __name__ == "__main__":
    M, rho, steps = 9, 1.0, 2
    batch, L, Nmodes = 2, 160, 2          # L chosen so the multi-tile/halo path runs

    index = fwm_index_set(M, rho)
    hdim = len(index)

    key = jax.random.PRNGKey(0)
    kx, kt, kp = jax.random.split(key, 3)
    xri = jax.random.normal(kx, (batch, L, Nmodes, 2), jnp.float32)
    x = (xri[..., 0] + 1j * xri[..., 1]).astype(jnp.complex64)
    # task_info = [P(dBm), Fi, Fs, Nch]
    task_info = jnp.stack(
        [jax.random.uniform(kt, (batch,), minval=-1.0, maxval=2.0),
         jnp.zeros((batch,)), jnp.zeros((batch,)), jnp.full((batch,), 1.0)],
        axis=1).astype(jnp.float32)

    step_params = [init_params(jax.random.fold_in(kp, s), M, hdim)
                   for s in range(steps)]
    packed = [pack_step_weights(p, index, M) for p in step_params]

    # tw=128 here only so the smoke test exercises >1 window tile per batch
    # (production default is tw=512; it is clamped automatically for tiny L).
    out = multi_step_ampbc(x, task_info, packed, M, tw=128)
    out = jax.block_until_ready(out)
    assert out.shape == (batch, L - (M - 1) * steps, Nmodes), out.shape

    ref = jax.block_until_ready(
        reference_multi_step(x, task_info, step_params, index, M))
    np.testing.assert_allclose(np.asarray(out), np.asarray(ref),
                               rtol=1e-2, atol=1e-3)

    print("KERNEL_OK")
</pallas_src>

<mosaic_0001>
module attributes {stable_mosaic.version = 11 : i64} {
  func.func @_ampbc_kernel(%arg0: i32, %arg1: i32, %arg2: memref<2xf32, #tpu.memory_space<smem>>, %arg3: memref<1x4x128xf32, #tpu.memory_space<vmem>>, %arg4: memref<1x4x128xf32, #tpu.memory_space<vmem>>, %arg5: memref<392x72xf32, #tpu.memory_space<vmem>>, %arg6: memref<4x128xf32, #tpu.memory_space<vmem>>, %arg7: memref<1x4x128xf32, #tpu.memory_space<vmem>>) attributes {dimension_semantics = [#tpu.dimension_semantics<parallel>, #tpu.dimension_semantics<parallel>], iteration_bounds = array<i64: 2, 2>, scalar_prefetch = 1 : i64, scratch_operands = 0 : i64, tpu.core_type = #tpu.core_type<tc>, window_params = [{transform_indices = @transform_0, window_bounds = array<i64: 1, 4, 128>}, {transform_indices = @transform_1, window_bounds = array<i64: 1, 4, 128>}, {pipeline_mode = #tpu.pipeline_mode<synchronous>, transform_indices = @transform_2, window_bounds = array<i64: 392, 72>}, {pipeline_mode = #tpu.pipeline_mode<synchronous>, transform_indices = @transform_3, window_bounds = array<i64: 4, 128>}, {transform_indices = @transform_4, window_bounds = array<i64: 1, 4, 128>}]} {
    %0 = arith.index_cast %arg0 : i32 to index
    %1 = memref.load %arg2[%0] : memref<2xf32, #tpu.memory_space<smem>>
    %cst = arith.constant 1.000000e+00 : f32
    %2 = arith.divf %cst, %1 : f32
    %c0 = arith.constant 0 : index
    %c0_0 = arith.constant 0 : index
    %c0_1 = arith.constant 0 : index
    %3 = vector.load %arg3[%c0, %c0_0, %c0_1] : memref<1x4x128xf32, #tpu.memory_space<vmem>>, vector<1x4x128xf32>
    %4 = vector.shape_cast %3 : vector<1x4x128xf32> to vector<4x128xf32>
    %c0_2 = arith.constant 0 : index
    %c0_3 = arith.constant 0 : index
    %c0_4 = arith.constant 0 : index
    %5 = vector.load %arg4[%c0_2, %c0_3, %c0_4] : memref<1x4x128xf32, #tpu.memory_space<vmem>>, vector<1x4x128xf32>
    %6 = vector.shape_cast %5 : vector<1x4x128xf32> to vector<4x128xf32>
    %7 = tpu.concatenate %4, %6 in 1 : vector<4x128xf32>, vector<4x128xf32> -> vector<4x256xf32>
    %8 = vector.broadcast %1 : f32 to vector<4x256xf32>
    %9 = arith.mulf %7, %8 : vector<4x256xf32>
    %10 = vector.extract_strided_slice %9 {offsets = [0, 0], sizes = [1, 256], strides = [1, 1]} : vector<4x256xf32> to vector<1x256xf32>
    %11 = vector.extract_strided_slice %9 {offsets = [1, 0], sizes = [1, 256], strides = [1, 1]} : vector<4x256xf32> to vector<1x256xf32>
    %12 = vector.extract_strided_slice %9 {offsets = [2, 0], sizes = [1, 256], strides = [1, 1]} : vector<4x256xf32> to vector<1x256xf32>
    %13 = vector.extract_strided_slice %9 {offsets = [3, 0], sizes = [1, 256], strides = [1, 1]} : vector<4x256xf32> to vector<1x256xf32>
    %14 = arith.mulf %10, %10 : vector<1x256xf32>
    %15 = arith.mulf %11, %11 : vector<1x256xf32>
    %16 = arith.addf %14, %15 : vector<1x256xf32>
    %17 = arith.mulf %12, %12 : vector<1x256xf32>
    %18 = arith.mulf %13, %13 : vector<1x256xf32>
    %19 = arith.addf %17, %18 : vector<1x256xf32>
    %20 = arith.mulf %10, %12 : vector<1x256xf32>
    %21 = arith.mulf %11, %13 : vector<1x256xf32>
    %22 = arith.addf %20, %21 : vector<1x256xf32>
    %23 = arith.mulf %11, %12 : vector<1x256xf32>
    %24 = arith.mulf %10, %13 : vector<1x256xf32>
    %25 = arith.subf %23, %24 : vector<1x256xf32>
    %26 = tpu.concatenate %9, %16, %19, %22, %25 in 0 : vector<4x256xf32>, vector<1x256xf32>, vector<1x256xf32>, vector<1x256xf32>, vector<1x256xf32> -> vector<8x256xf32>
    %27 = vector.extract_strided_slice %26 {offsets = [0, 0], sizes = [8, 128], strides = [1, 1]} : vector<8x256xf32> to vector<8x128xf32>
    %28 = vector.extract_strided_slice %26 {offsets = [0, 1], sizes = [8, 128], strides = [1, 1]} : vector<8x256xf32> to vector<8x128xf32>
    %29 = vector.extract_strided_slice %26 {offsets = [0, 2], sizes = [8, 128], strides = [1, 1]} : vector<8x256xf32> to vector<8x128xf32>
    %30 = vector.extract_strided_slice %26 {offsets = [0, 3], sizes = [8, 128], strides = [1, 1]} : vector<8x256xf32> to vector<8x128xf32>
    %31 = vector.extract_strided_slice %26 {offsets = [0, 4], sizes = [8, 128], strides = [1, 1]} : vector<8x256xf32> to vector<8x128xf32>
    %32 = vector.extract_strided_slice %26 {offsets = [0, 5], sizes = [8, 128], strides = [1, 1]} : vector<8x256xf32> to vector<8x128xf32>
    %33 = vector.extract_strided_slice %26 {offsets = [0, 6], sizes = [8, 128], strides = [1, 1]} : vector<8x256xf32> to vector<8x128xf32>
    %34 = vector.extract_strided_slice %26 {offsets = [0, 7], sizes = [8, 128], strides = [1, 1]} : vector<8x256xf32> to vector<8x128xf32>
    %35 = vector.extract_strided_slice %26 {offsets = [0, 8], sizes = [8, 128], strides = [1, 1]} : vector<8x256xf32> to vector<8x128xf32>
    %36 = tpu.concatenate %27, %28, %29, %30, %31, %32, %33, %34, %35 in 0 : vector<8x128xf32>, vector<8x128xf32>, vector<8x128xf32>, vector<8x128xf32>, vector<8x128xf32>, vector<8x128xf32>, vector<8x128xf32>, vector<8x128xf32>, vector<8x128xf32> -> vector<72x128xf32>
    %c0_5 = arith.constant 0 : index
    %c0_6 = arith.constant 0 : index
    %37 = vector.load %arg5[%c0_5, %c0_6] : memref<392x72xf32, #tpu.memory_space<vmem>>, vector<392x72xf32>
    %cst_7 = arith.constant dense<0.000000e+00> : vector<392x128xf32>
    %38 = tpu.matmul %37, %36, %cst_7 {dimension_numbers = #tpu.dot_dimension_numbers<[1], [0], [0], [1], [0, 0, 1, 1], [], []>, precision = #tpu.contract_precision<fp32>} : vector<392x72xf32>, vector<72x128xf32>, vector<392x128xf32> -> vector<392x128xf32>
    %39 = vector.extract_strided_slice %38 {offsets = [0, 0], sizes = [32, 128], strides = [1, 1]} : vector<392x128xf32> to vector<32x128xf32>
    %40 = vector.extract_strided_slice %38 {offsets = [32, 0], sizes = [32, 128], strides = [1, 1]} : vector<392x128xf32> to vector<32x128xf32>
    %41 = vector.extract_strided_slice %38 {offsets = [64, 0], sizes = [32, 128], strides = [1, 1]} : vector<392x128xf32> to vector<32x128xf32>
    %42 = vector.extract_strided_slice %38 {offsets = [96, 0], sizes = [32, 128], strides = [1, 1]} : vector<392x128xf32> to vector<32x128xf32>
    %43 = vector.extract_strided_slice %38 {offsets = [128, 0], sizes = [32, 128], strides = [1, 1]} : vector<392x128xf32> to vector<32x128xf32>
    %44 = vector.extract_strided_slice %38 {offsets = [160, 0], sizes = [32, 128], strides = [1, 1]} : vector<392x128xf32> to vector<32x128xf32>
    %45 = vector.extract_strided_slice %38 {offsets = [192, 0], sizes = [32, 128], strides = [1, 1]} : vector<392x128xf32> to vector<32x128xf32>
    %46 = vector.extract_strided_slice %38 {offsets = [224, 0], sizes = [32, 128], strides = [1, 1]} : vector<392x128xf32> to vector<32x128xf32>
    %47 = vector.extract_strided_slice %38 {offsets = [256, 0], sizes = [32, 128], strides = [1, 1]} : vector<392x128xf32> to vector<32x128xf32>
    %48 = vector.extract_strided_slice %38 {offsets = [288, 0], sizes = [32, 128], strides = [1, 1]} : vector<392x128xf32> to vector<32x128xf32>
    %49 = vector.extract_strided_slice %38 {offsets = [320, 0], sizes = [32, 128], strides = [1, 1]} : vector<392x128xf32> to vector<32x128xf32>
    %50 = vector.extract_strided_slice %38 {offsets = [352, 0], sizes = [32, 128], strides = [1, 1]} : vector<392x128xf32> to vector<32x128xf32>
    %51 = vector.extract_strided_slice %38 {offsets = [384, 0], sizes = [8, 128], strides = [1, 1]} : vector<392x128xf32> to vector<8x128xf32>
    %52 = vector.extract_strided_slice %51 {offsets = [0, 0], sizes = [1, 128], strides = [1, 1]} : vector<8x128xf32> to vector<1x128xf32>
    %53 = vector.extract_strided_slice %51 {offsets = [1, 0], sizes = [1, 128], strides = [1, 1]} : vector<8x128xf32> to vector<1x128xf32>
    %54 = vector.extract_strided_slice %51 {offsets = [2, 0], sizes = [1, 128], strides = [1, 1]} : vector<8x128xf32> to vector<1x128xf32>
    %55 = vector.extract_strided_slice %51 {offsets = [3, 0], sizes = [1, 128], strides = [1, 1]} : vector<8x128xf32> to vector<1x128xf32>
    %56 = vector.extract_strided_slice %51 {offsets = [4, 0], sizes = [1, 128], strides = [1, 1]} : vector<8x128xf32> to vector<1x128xf32>
    %57 = vector.extract_strided_slice %51 {offsets = [5, 0], sizes = [1, 128], strides = [1, 1]} : vector<8x128xf32> to vector<1x128xf32>
    %58 = vector.extract_strided_slice %51 {offsets = [6, 0], sizes = [1, 128], strides = [1, 1]} : vector<8x128xf32> to vector<1x128xf32>
    %59 = vector.extract_strided_slice %51 {offsets = [7, 0], sizes = [1, 128], strides = [1, 1]} : vector<8x128xf32> to vector<1x128xf32>
    %60 = arith.mulf %39, %43 : vector<32x128xf32>
    %61 = arith.mulf %40, %44 : vector<32x128xf32>
    %62 = arith.addf %60, %61 : vector<32x128xf32>
    %63 = arith.mulf %41, %45 : vector<32x128xf32>
    %64 = arith.addf %62, %63 : vector<32x128xf32>
    %65 = arith.mulf %42, %46 : vector<32x128xf32>
    %66 = arith.addf %64, %65 : vector<32x128xf32>
    %67 = arith.mulf %40, %43 : vector<32x128xf32>
    %68 = arith.mulf %39, %44 : vector<32x128xf32>
    %69 = arith.subf %67, %68 : vector<32x128xf32>
    %70 = arith.mulf %42, %45 : vector<32x128xf32>
    %71 = arith.addf %69, %70 : vector<32x128xf32>
    %72 = arith.mulf %41, %46 : vector<32x128xf32>
    %73 = arith.subf %71, %72 : vector<32x128xf32>
    %74 = arith.mulf %66, %47 : vector<32x128xf32>
    %75 = arith.mulf %73, %48 : vector<32x128xf32>
    %76 = arith.subf %74, %75 : vector<32x128xf32>
    %77 = arith.mulf %66, %48 : vector<32x128xf32>
    %78 = arith.mulf %73, %47 : vector<32x128xf32>
    %79 = arith.addf %77, %78 : vector<32x128xf32>
    %80 = arith.mulf %66, %49 : vector<32x128xf32>
    %81 = arith.mulf %73, %50 : vector<32x128xf32>
    %82 = arith.subf %80, %81 : vector<32x128xf32>
    %83 = arith.mulf %66, %50 : vector<32x128xf32>
    %84 = arith.mulf %73, %49 : vector<32x128xf32>
    %85 = arith.addf %83, %84 : vector<32x128xf32>
    %86 = tpu.concatenate %76, %79, %82, %85 in 0 : vector<32x128xf32>, vector<32x128xf32>, vector<32x128xf32>, vector<32x128xf32> -> vector<128x128xf32>
    %c0_8 = arith.constant 0 : index
    %c0_9 = arith.constant 0 : index
    %87 = vector.load %arg6[%c0_8, %c0_9] : memref<4x128xf32, #tpu.memory_space<vmem>>, vector<4x128xf32>
    %cst_10 = arith.constant dense<0.000000e+00> : vector<4x128xf32>
    %88 = tpu.matmul %87, %86, %cst_10 {dimension_numbers = #tpu.dot_dimension_numbers<[1], [0], [0], [1], [0, 0, 1, 1], [], []>, precision = #tpu.contract_precision<fp32>} : vector<4x128xf32>, vector<128x128xf32>, vector<4x128xf32> -> vector<4x128xf32>
    %89 = math.cos %56 : vector<1x128xf32>
    %90 = math.sin %56 : vector<1x128xf32>
    %91 = math.cos %57 : vector<1x128xf32>
    %92 = math.sin %57 : vector<1x128xf32>
    %93 = arith.mulf %52, %89 : vector<1x128xf32>
    %94 = arith.mulf %53, %90 : vector<1x128xf32>
    %95 = arith.subf %93, %94 : vector<1x128xf32>
    %96 = arith.mulf %52, %90 : vector<1x128xf32>
    %97 = arith.mulf %53, %89 : vector<1x128xf32>
    %98 = arith.addf %96, %97 : vector<1x128xf32>
    %99 = arith.mulf %54, %91 : vector<1x128xf32>
    %100 = arith.mulf %55, %92 : vector<1x128xf32>
    %101 = arith.subf %99, %100 : vector<1x128xf32>
    %102 = arith.mulf %54, %92 : vector<1x128xf32>
    %103 = arith.mulf %55, %91 : vector<1x128xf32>
    %104 = arith.addf %102, %103 : vector<1x128xf32>
    %105 = arith.mulf %54, %59 : vector<1x128xf32>
    %106 = arith.mulf %55, %58 : vector<1x128xf32>
    %107 = arith.addf %105, %106 : vector<1x128xf32>
    %cst_11 = arith.constant 0.000000e+00 : f32
    %108 = vector.broadcast %cst_11 : f32 to vector<1x128xf32>
    %109 = arith.subf %108, %107 : vector<1x128xf32>
    %110 = arith.mulf %54, %58 : vector<1x128xf32>
    %111 = arith.mulf %55, %59 : vector<1x128xf32>
    %112 = arith.subf %110, %111 : vector<1x128xf32>
    %113 = arith.mulf %52, %59 : vector<1x128xf32>
    %114 = arith.mulf %53, %58 : vector<1x128xf32>
    %115 = arith.subf %113, %114 : vector<1x128xf32>
    %116 = arith.mulf %52, %58 : vector<1x128xf32>
    %117 = arith.mulf %53, %59 : vector<1x128xf32>
    %118 = arith.addf %116, %117 : vector<1x128xf32>
    %119 = vector.extract_strided_slice %88 {offsets = [0, 0], sizes = [1, 128], strides = [1, 1]} : vector<4x128xf32> to vector<1x128xf32>
    %120 = arith.addf %119, %95 : vector<1x128xf32>
    %121 = arith.addf %120, %109 : vector<1x128xf32>
    %122 = vector.extract_strided_slice %88 {offsets = [1, 0], sizes = [1, 128], strides = [1, 1]} : vector<4x128xf32> to vector<1x128xf32>
    %123 = arith.addf %122, %98 : vector<1x128xf32>
    %124 = arith.addf %123, %112 : vector<1x128xf32>
    %125 = vector.extract_strided_slice %88 {offsets = [2, 0], sizes = [1, 128], strides = [1, 1]} : vector<4x128xf32> to vector<1x128xf32>
    %126 = arith.addf %125, %101 : vector<1x128xf32>
    %127 = arith.addf %126, %115 : vector<1x128xf32>
    %128 = vector.extract_strided_slice %88 {offsets = [3, 0], sizes = [1, 128], strides = [1, 1]} : vector<4x128xf32> to vector<1x128xf32>
    %129 = arith.addf %128, %104 : vector<1x128xf32>
    %130 = arith.addf %129, %118 : vector<1x128xf32>
    %131 = tpu.concatenate %121, %124, %127, %130 in 0 : vector<1x128xf32>, vector<1x128xf32>, vector<1x128xf32>, vector<1x128xf32> -> vector<4x128xf32>
    %132 = vector.broadcast %2 : f32 to vector<4x128xf32>
    %133 = arith.mulf %131, %132 : vector<4x128xf32>
    %c0_12 = arith.constant 0 : index
    %c0_13 = arith.constant 0 : index
    %c0_14 = arith.constant 0 : index
    %134 = vector.load %arg7[%c0_12, %c0_13, %c0_14] : memref<1x4x128xf32, #tpu.memory_space<vmem>>, vector<1x4x128xf32>
    %135 = vector.shape_cast %134 : vector<1x4x128xf32> to vector<4x128xf32>
    %136 = vector.shape_cast %133 : vector<4x128xf32> to vector<1x4x128xf32>
    tpu.vector_store %arg7[%c0_12, %c0_13, %c0_14], %136 {strides = array<i32>} : memref<1x4x128xf32, #tpu.memory_space<vmem>>, vector<1x4x128xf32>,
    return
  }
  func.func @transform_0(%arg0: i32, %arg1: i32, %arg2: memref<2xf32, #tpu.memory_space<smem>>) -> (i32, i32, i32) {
    %c0_i32 = arith.constant 0 : i32
    %c0_i32_0 = arith.constant 0 : i32
    return %arg0, %c0_i32, %arg1 : i32, i32, i32
  }
  func.func @transform_1(%arg0: i32, %arg1: i32, %arg2: memref<2xf32, #tpu.memory_space<smem>>) -> (i32, i32, i32) {
    %c1_i32 = arith.constant 1 : i32
    %0 = arith.addi %arg1, %c1_i32 : i32
    %c0_i32 = arith.constant 0 : i32
    %c0_i32_0 = arith.constant 0 : i32
    return %arg0, %c0_i32, %0 : i32, i32, i32
  }
  func.func @transform_2(%arg0: i32, %arg1: i32, %arg2: memref<2xf32, #tpu.memory_space<smem>>) -> (i32, i32) {
    %c0_i32 = arith.constant 0 : i32
    %c0_i32_0 = arith.constant 0 : i32
    %c0_i32_1 = arith.constant 0 : i32
    return %c0_i32, %c0_i32_0 : i32, i32
  }
  func.func @transform_3(%arg0: i32, %arg1: i32, %arg2: memref<2xf32, #tpu.memory_space<smem>>) -> (i32, i32) {
    %c0_i32 = arith.constant 0 : i32
    %c0_i32_0 = arith.constant 0 : i32
    %c0_i32_1 = arith.constant 0 : i32
    return %c0_i32, %c0_i32_0 : i32, i32
  }
  func.func @transform_4(%arg0: i32, %arg1: i32, %arg2: memref<2xf32, #tpu.memory_space<smem>>) -> (i32, i32, i32) {
    %c0_i32 = arith.constant 0 : i32
    %c0_i32_0 = arith.constant 0 : i32
    return %arg0, %c0_i32, %arg1 : i32, i32, i32
  }
}

</mosaic_0001>

<bundles_post_ra>
// kernel: tpu_custom_call.1
= control target key start
LH: loop header
LB: loop body
LE: loop exit
PB: predicated region body
PF: predicated region fallthrough
CT: control target
= control target key end

     0   :  { %s9403_s0 = inlined_call_operand.vmem [shape: f32[2], index: 0, kind: input, shape index: {}]   ;;  %s9404_s1 = inlined_call_operand.vmem [shape: f32[2,4,384], index: 1, kind: input, shape index: {}]   ;;  %s9405_s2 = inlined_call_operand.vmem [shape: f32[2,4,384], index: 2, kind: input, shape index: {}]   ;;  %s9406_s3 = inlined_call_operand.vmem [shape: f32[392,72], index: 3, kind: input, shape index: {}]   ;;  %s9407_s4 = inlined_call_operand.vmem [shape: f32[4,128], index: 4, kind: input, shape index: {}]   ;;  %s9408_s5 = inlined_call_operand.hbm [shape: f32[2,4,256], index: 5, kind: output, shape index: {}]  }
   0x1   :  { %s10_s20 = sshll.u32 %s9403_s0, 4  ;;  %s11_s20 = int_to_ptr.vmem [resolvable:$true] %s10_s20 }
   0x2   :  { %s6843_s21 = scalar_lea.vmem %s11_s20, 16  ;;  %p6848_p1 = scmp.lt.s32.totalorder %s11_s20, %s11_s20 }
   0x3   :  { %p6844_p0 = scmp.ne.s32.totalorder %s11_s20, %s6843_s21  ;;  %p6849_p2 = scmp.lt.s32.totalorder %s6843_s21, %s6843_s21 }
   0x5   :  { %p6850_p3 = por %p6849_p2, %p6848_p1 }
   0x7   :  { %p6851_p4 = pnand %p6850_p3, %p6844_p0 }
   0x9   :  { %6854 = shalt.err (!%p6851_p4)  }
   0xa   :  { %s6953_s22 = smov [#allocation3]  }
   0xb   :  { %13 = dma.vmem_to_smem %s11_s20, 16, %s6953_s22, [#allocation2] }
   0xc   :  { %6915 = dma.done.wait [#allocation2], 16 }
   0xd   :  { %6916 = vsyncadd [#allocation2], 4294967280 }
   0xe   :  { %15 = sfence }
   0xf   :  { %16 = vsyncpa [#allocation5], 0 }
  0x10   :  { %18 = vsyncpa [#allocation5 + $0x1], 0  ;;  %s7005_s23 = smov 0   ;;  %s7007_s24 = smov 0  }
  0x11   :  { %s7009_s0 = smov 0   ;;  %s7011_s25 = smov 0  }
  0x12   :  { %s7013_s26 = smov 0   ;;  %s7015_s27 = smov 0  }
  0x13   :  { %s7017_s28 = smov 0   ;;  %s7019_s29 = smov 0  }
  0x14 LB: > { %s4393_s30 = sadd.s32 4294967295, %s6951_s29   ;;  %s4394_s6 = sadd.s32 4294967294, %s6951_s29   ;;  %s6951_s29 = sphi %s7019_s29, %s24_s29   ;;  %s6947_s28 = sphi %s7017_s28, %s9701_s28   ;;  %s6943_s27 = sphi %s7015_s27, %s9700_s27   ;;  %s6939_s26 = sphi %s7013_s26, %s9699_s26   ;;  %s6935_s25 = sphi %s7011_s25, %s9698_s25   ;;  %s6931_s0 = sphi %s7009_s0, %s9697_s0   ;;  %s6927_s24 = sphi %s7007_s24, %s9696_s24   ;;  %s6923_s23 = sphi %s7005_s23, %s9695_s23  }
  0x15   : > { %s33_s7 = sadd.s32 1, %s6943_s27  ;;  %s36_s8 = sadd.s32 1, %s6947_s28 }
  0x16   : > { %p34_p5 = scmp.ge.s32.totalorder %s33_s7, 2  ;;  %p155_p6 = scmp.ne.s32.totalorder %s6931_s0, %s6927_s24 }
  0x17   : > { %p156_p7 = scmp.eq.s32.totalorder %s4393_s30, 3  ;;  %p161_p10 = scmp.ne.s32.totalorder %s6927_s24, %s6923_s23 }
  0x18   : > { %s9703_s7 = smov (%p34_p5, %s33_s7), 0  ;;  %s9705_s8 = smov (!%p34_p5, %s36_s8), %s6947_s28 }
  0x19   : > { %s141_s9 = ssub.s32 %s6943_s27, %s9703_s7  ;;  %p7056_p8 = por %p156_p7, %p155_p6 }
  0x1a   : > { %p38_p9 = scmp.ge.s32.totalorder %s9705_s8, 2  ;;  %p162_p11 = scmp.eq.s32.totalorder %s4394_s6, 3 }
  0x1b   : > { %p4397_p12 = scmp.ge.s32.totalorder %s6951_s29, 1  ;;  %p210_p0 = scmp.lt.s32.totalorder %s6951_s29, 5 }
  0x1c   : > { %s9707_s8 = smov (%p38_p9, %s9705_s8), 0  ;;  %p7065_p13 = por %p162_p11, %p161_p10 }
  0x1d   : > { %s140_s12 = ssub.s32 %s6947_s28, %s9707_s8  ;;  %s145_s13 = sadd.s32 1, %s6931_s0 }
  0x1e   : > { %s142_s14 = sor.u32 %s141_s9, %s140_s12  ;;  %p211_p1 = pnand %p4397_p12, %p210_p0 }
  0x1f   : > { %p143_p2 = scmp.eq.s32.totalorder %s142_s14, 0 }
  0x20   : > { %214 = sbr.rel (%p211_p1) target bundleno = 1506 (0x5e2), region = 36 }
  0x21   : > { %s7074_s15 = scalar_select %p143_p2, %s6931_s0, %s145_s13  }
  0x27   : > { %p248_p3 = scmp.lt.s32.totalorder %s6939_s26, 1  ;;  %p250_p4 = scmp.lt.s32.totalorder %s6935_s25, 2  ;;  %vm343_vm0 = vcmask 1043456   ;;  %vm346_vm1 = vcmask 1044480   ;;  %vm349_vm2 = vcmask 1045504   ;;  %vm352_vm3 = vcmask 1046528  }
  0x28   : > { %s266_s16 = sld [smem:[#allocation3 + %s6939_s26]]  ;;  %s256_s20 = sadd.s32 1, %s6935_s25  ;;  %v9423_v40 = vmov 0.0|0.0   ;;  %vm6961_vm4 = vmmov 0   ;;  %v9538_v48 = vmov 0.0   ;;  %vm368_vm5 = vcmask 1031168  }
  0x29   : > { %s249_s17 = scalar_select %p248_p3, %s6939_s26, 1  ;;  %6064 = vmatprep.subr.bf16.mxu1 %v9423_v40  ;;  %6088 = vmatprep.subr.bf16.mxu0 %v9423_v40  ;;  %vm361_vm6 = vcmask 1039360   ;;  %vm375_vm7 = vcmask 1022976   ;;  %vm462_vm8 = vcmask 588800   ;;  %vm382_vm9 = vcmask 1014784  }
  0x2a   : > { %s251_s18 = scalar_select %p250_p4, %s6935_s25, 2  ;;  %4882 = vmatprep.mubr.msk.f32.mxu1 %vm6961_vm4, %v9538_v48  ;;  %5212 = vmatprep.mubr.msk.f32.mxu0 %vm6961_vm4, %v9538_v48  ;;  %vm389_vm10 = vcmask 1006592   ;;  %vm396_vm11 = vcmask 998400   ;;  %vm403_vm12 = vcmask 990208   ;;  %vm410_vm13 = vcmask 982016  }
  0x2b   : > { %s6741_s19 = smul.u32 3, %s249_s17  ;;  %p259_p5 = scmp.lt.s32.totalorder %s256_s20, 2 }
  0x2c   : > { %s6960_s30 = smov 122   ;;  %s6963_s6 = smov 121  }
  0x2d   : > { %s253_s21 = sadd.s32 %s6741_s19, %s251_s18  ;;  %s9709_s20 = smov (!%p259_p5, %s256_s20), 2 }
  0x2e   : > { %s4399_s22 = sshll.u32 %s253_s21, 2  ;;  %v7082_v0 = vstv %s266_s16  ;;  %s262_s12 = sadd.s32 %s6741_s19, %s9709_s20 }
  0x2f   : > { %9542 = vst [vmem:[#allocation8_spill] sm:$0xff] %v7082_v0  ;;  %s255_s9 = scalar_lea.vmem %s9404_s1, %s4399_s22  ;;  %s4400_s13 = sshll.u32 %s262_s12, 2 }
  0x30   : > { %v270_v1 = vld [vmem:[%s255_s9] sm:$0xf]  ;;  %s264_s18 = scalar_lea.vmem %s9405_s2, %s4400_s13  ;;  %s6955_s16 = smov 126  }
  0x31   : > { %v273_v2 = vmul.f32 %v270_v1, %v7082_v0  ;;  %v271_v11 = vld [vmem:[%s264_s18] sm:$0xf]  ;;  %s6956_s19 = smov 127   ;;  %s6957_s20 = smov 125  }
  0x32   : > { %v274_v12 = vmul.f32 %v271_v11, %v7082_v0  ;;  %s6958_s21 = smov 124   ;;  %s6959_s22 = smov 123   ;;  %v413_v1 = vld [vmem:[%s9406_s3] sm:$0xff]  ;;  %v414_v11 = vld [vmem:[%s9406_s3 + $0x8] sm:$0xff] }
  0x33   : > { %v275_v3 = vmul.f32 %v273_v2, %v273_v2  ;;  %v287_v4 = vrot.slane %v273_v2, 2  ;;  %v301_v5 = vrot.slane %v273_v2, 1  ;;  %v307_v6 = vrot.slane %v273_v2, 3  ;;  %s6964_s9 = smov 120  }
  0x34   : > { %v276_v16 = vmul.f32 %v274_v12, %v274_v12  ;;  %v288_v17 = vrot.slane %v274_v12, 2  ;;  %v302_v18 = vrot.slane %v274_v12, 1  ;;  %v308_v19 = vrot.slane %v274_v12, 3 }
  0x35   : > { %v279_v7 = vrot.slane %v275_v3, 1  ;;  %v291_v8 = vmul.f32 %v287_v4, %v273_v2  ;;  %v305_v9 = vmul.f32 %v301_v5, %v273_v2  ;;  %v311_v10 = vmul.f32 %v307_v6, %v273_v2 }
  0x36   : > { %v280_v24 = vrot.slane %v276_v16, 1  ;;  %v292_v25 = vmul.f32 %v288_v17, %v274_v12  ;;  %v306_v26 = vmul.f32 %v302_v18, %v274_v12  ;;  %v312_v27 = vmul.f32 %v308_v19, %v274_v12 }
  0x37   : > { %v283_v13 = vadd.f32 %v279_v7, %v275_v3  ;;  %v295_v14 = vrot.slane %v291_v8, 1  ;;  %v315_v15 = vrot.slane %v311_v10, 7  ;;  %v467_v19 = vsel %vm462_vm8, %v414_v11, 0 }
  0x38   : > { %v284_v32 = vadd.f32 %v280_v24, %v276_v16  ;;  %v296_v33 = vrot.slane %v292_v25, 1  ;;  %v316_v34 = vrot.slane %v312_v27, 7 }
  0x39   : > { %v299_v20 = vadd.f32 %v295_v14, %v291_v8  ;;  %v319_v21 = vsub.f32 %v305_v9, %v315_v15  ;;  %v323_v22 = vrot.slane %v283_v13, 4  ;;  %v327_v23 = vrot.slane %v283_v13, 5 }
  0x3a   : > { %v300_v37 = vadd.f32 %v296_v33, %v292_v25  ;;  %v320_v38 = vsub.f32 %v306_v26, %v316_v34  ;;  %v324_v39 = vrot.slane %v284_v32, 4  ;;  %v328_v41 = vrot.slane %v284_v32, 5 }
  0x3b   : > { %v333_v28 = vrot.slane %v299_v20, 2  ;;  %v339_v29 = vrot.slane %v319_v21, 2  ;;  %v344_v30 = vsel %vm343_vm0, %v273_v2, %v323_v22  ;;  %v464_v9 = vsel %vm462_vm8, %v413_v1, 0  ;;  %v415_v22 = vld [vmem:[%s9406_s3 + $0x10] sm:$0xff] }
  0x3c   : > { %v347_v31 = vsel %vm346_vm1, %v344_v30, %v327_v23  ;;  %v334_v42 = vrot.slane %v300_v37, 2  ;;  %v340_v43 = vrot.slane %v320_v38, 2  ;;  %v345_v44 = vsel %vm343_vm0, %v274_v12, %v324_v39 }
  0x3d   : > { %v350_v35 = vsel %vm349_vm2, %v347_v31, %v333_v28  ;;  %v348_v45 = vsel %vm346_vm1, %v345_v44, %v328_v41  ;;  %v7141_v16 = vand.u32 4294901760, %v464_v9  ;;  %v7160_v26 = vand.u32 4294901760, %v467_v19  ;;  %v417_v41 = vld [vmem:[%s9406_s3 + $0x20] sm:$0xff] }
  0x3e   : > { %v353_v36 = vsel %vm352_vm3, %v350_v35, %v339_v29  ;;  %v351_v46 = vsel %vm349_vm2, %v348_v45, %v334_v42  ;;  %v470_v32 = vsel %vm462_vm8, %v415_v22, 0  ;;  %v416_v35 = vld [vmem:[%s9406_s3 + $0x18] sm:$0xff] }
  0x3f   : > { %364 = vrot.lane.b32.xlu1 %v353_v36, %s6955_s16  ;;  %357 = vrot.lane.b32.xlu0 %v353_v36, %s6956_s19  ;;  %v354_v47 = vsel %vm352_vm3, %v351_v46, %v340_v43  ;;  %v611_v51 = vand.u32 4294901760, %v353_v36  ;;  %v7158_v25 = vsub.f32 %v464_v9, %v7141_v16  ;;  %v7185_v43 = vsub.f32 %v467_v19, %v7160_v26 }
  0x40   : > { %v7187_v44 = vand.u32 4294901760, %v470_v32 }
  0x41   : > { %v7106_v58 = vsub.f32 %v353_v36, %v611_v51  ;;  %v9425_v42 = vand.u32 4294901760, %v7158_v25 }
  0x43   : > { %366 = vrot.lane.b32.xlu1 %v354_v47, %s6955_s16  ;;  %359 = vrot.lane.b32.xlu0 %v354_v47, %s6956_s19  ;;  %v9428_v27 = vand.u32 4294901760, %v7106_v58 }
  0x47   : > { %373 = vrot.lane.b32.xlu1 %v354_v47, %s6957_s20  ;;  %371 = vrot.lane.b32.xlu0 %v353_v36, %s6957_s20  ;;  %s6971_s20 = smov [#allocation4]  }
  0x4b   : > { %380 = vrot.lane.b32.xlu1 %v354_v47, %s6958_s21  ;;  %378 = vrot.lane.b32.xlu0 %v353_v36, %s6958_s21  ;;  %s6859_s21 = sshll.u32 %s6971_s20, 4  ;;  %s6860_s21 = int_to_ptr.vmem [resolvable:$false] %s6859_s21 }
  0x4f   : > { %387 = vrot.lane.b32.xlu1 %v354_v47, %s6959_s22  ;;  %385 = vrot.lane.b32.xlu0 %v353_v36, %s6959_s22  ;;  %s245_s22 = sand.u32 1, %s6927_s24  }
  0x50   : > { %s4282_s16 = scalar_lea.sflag [#allocation5], %s245_s22 }
  0x53   : > { %394 = vrot.lane.b32.xlu1 %v354_v47, %s6960_s30  ;;  %392 = vrot.lane.b32.xlu0 %v353_v36, %s6960_s30  ;;  %s9340_s30 = sshll.u32 %s245_s22, 2 }
  0x54   : > { %s247_s13 = scalar_lea.vmem [#allocation4], %s9340_s30  ;;  %s6861_s30 = scalar_lea.vmem %s6860_s21, 128 }
  0x55   : > { %s4297_s14 = sshll.u32 %s247_s13, 4  ;;  %s9350_s14 = int_to_ptr.vmem [resolvable:$true] %s4297_s14 }
  0x56   : > { %s6855_s19 = scalar_lea.vmem %s9350_s14, 64  ;;  %p6862_p10 = scmp.lt.s32.totalorder %s9350_s14, %s6860_s21 }
  0x57   : > { %401 = vrot.lane.b32.xlu1 %v354_v47, %s6963_s6  ;;  %399 = vrot.lane.b32.xlu0 %v353_v36, %s6963_s6  ;;  %s4410_s6 = sshll.u32 %s6939_s26, 1  ;;  %p6856_p6 = scmp.ne.s32.totalorder %s9350_s14, %s6855_s19 }
  0x58   : > { %s4293_s12 = sadd.s32 %s6935_s25, %s4410_s6  ;;  %p6863_p11 = scmp.lt.s32.totalorder %s6861_s30, %s6855_s19 }
  0x59   : > { %s4411_s26 = sshll.u32 %s4293_s12, 6  ;;  %p6857_p7 = pnand %p6856_p6, %p7056_p8 }
  0x5a   : > { %s9348_s25 = scalar_lea.hbm %s9408_s5, %s4411_s26  ;;  %p6864_p12 = por %p6863_p11, %p6862_p10 }
  0x5b   : > { %408 = vrot.lane.b32.xlu1 %v354_v47, %s6964_s9  ;;  %406 = vrot.lane.b32.xlu0 %v353_v36, %s6964_s9  ;;  %v1178_v47 = vsub.f32 %v7106_v58, %v9428_v27  ;;  %p6858_p9 = pneg %p6857_p7 }
  0x5d   : > { %v1179_v9 = vand.u32 4294901760, %v1178_v47  ;;  %p6865_p0 = pnand %p6864_p12, %p6858_p9 }
  0xb1   : > { %v365_v49 = vpop.permute.xlu1 %364  ;;  %v358_v50 = vpop.permute.xlu0 %357 }
  0xb5   : > { %v367_v52 = vpop.permute.xlu1 %366  ;;  %v360_v53 = vpop.permute.xlu0 %359 }
  0xb6   : > { %v369_v54 = vsel %vm368_vm5, %v365_v49, %v367_v52  ;;  %v362_v55 = vsel %vm361_vm6, %v358_v50, %v360_v53  ;;  %v473_v49 = vsel %vm462_vm8, %v416_v35, 0  ;;  %v476_v53 = vsel %vm462_vm8, %v417_v41, 0  ;;  %v419_v41 = vld [vmem:[%s9406_s3 + $0x30] sm:$0xff] }
  0xb7   : > { %v617_v56 = vand.u32 4294901760, %v369_v54  ;;  %v614_v57 = vand.u32 4294901760, %v362_v55 }
  0xb9   : > { %v7108_v59 = vsub.f32 %v362_v55, %v614_v57  ;;  %v374_v60 = vpop.permute.xlu1 %373  ;;  %v372_v61 = vpop.permute.xlu0 %371  ;;  %v7110_v62 = vpack.c.bf16 %v614_v57, %v611_v51  ;;  %v7115_v2 = vsub.f32 %v369_v54, %v617_v56  ;;  %v687_v57 = vsub.f32 %v7158_v25, %v9425_v42 }
  0xba   : > { %v376_v63 = vsel %vm375_vm7, %v372_v61, %v374_v60  ;;  %v9421_v60 = vand.u32 4294901760, %v7185_v43  ;;  %v7214_v61 = vsub.f32 %v470_v32, %v7187_v44 }
  0xbb   : > { %9543 = vst [vmem:[#allocation9_spill] sm:$0xff] %v7110_v62  ;;  %v620_v3 = vand.u32 4294901760, %v376_v63  ;;  %6066 = vmatpush3.bf16.msra.mxu1 %v7110_v62  ;;  %v7120_v4 = vpack.c.bf16 %v7108_v59, %v7106_v58  ;;  %v1191_v12 = vand.u32 4294901760, %v7115_v2  ;;  %v9426_v33 = vand.u32 4294901760, %v7108_v59 }
  0xbc   : > { %6067 = vmatprep.subr.bf16.mxu1 %v9423_v40 }
  0xbd   : > { %v7123_v5 = vsub.f32 %v376_v63, %v620_v3  ;;  %v381_v6 = vpop.permute.xlu1 %380  ;;  %v379_v7 = vpop.permute.xlu0 %378  ;;  %6090 = vmatpush3.bf16.msra.mxu0 %v7120_v4  ;;  %v7126_v8 = vpack.c.bf16 %v620_v3, %v617_v56  ;;  %v1185_v51 = vsub.f32 %v7108_v59, %v9426_v33  ;;  %v418_v56 = vld [vmem:[%s9406_s3 + $0x28] sm:$0xff]  ;;  %v7216_v63 = vand.u32 4294901760, %v473_v49  ;;  %v432_v33 = vld [vmem:[%s9406_s3 + $0x98] sm:$0xff] }
  0xbe   : > { %v383_v10 = vsel %vm382_vm9, %v379_v7, %v381_v6  ;;  %6091 = vmatprep.subr.bf16.mxu0 %v9423_v40  ;;  %v1192_v32 = vsub.f32 %v7115_v2, %v1191_v12  ;;  %v521_v27 = vsel %vm462_vm8, %v432_v33, 0 }
  0xbf   : > { %9544 = vst [vmem:[#allocation10_spill] sm:$0xff] %v7126_v8  ;;  %v1198_v13 = vand.u32 4294901760, %v7123_v5  ;;  %v623_v14 = vand.u32 4294901760, %v383_v10  ;;  %6069 = vmatpush3.bf16.msra.mxu1 %v7126_v8  ;;  %v7138_v15 = vpack.c.bf16 %v7123_v5, %v7115_v2  ;;  %v1186_v11 = vand.u32 4294901760, %v1185_v51 }
  0xc0   : > { %6070 = vmatprep.subr.bf16.mxu1 %v9423_v40 }
  0xc1   : > { %v388_v17 = vpop.permute.xlu1 %387  ;;  %v386_v18 = vpop.permute.xlu0 %385  ;;  %v7148_v20 = vpack.c.bf16 %v1198_v13, %v1191_v12  ;;  %6093 = vmatpush3.bf16.msra.mxu0 %v7138_v15  ;;  %v7154_v23 = vsub.f32 %v383_v10, %v623_v14  ;;  %v7220_v10 = vand.u32 4294901760, %v476_v53  ;;  %v6077_v12 = vpack.c.bf16 %v1186_v11, %v1179_v9 }
  0xc2   : > { %v390_v21 = vsel %vm389_vm10, %v386_v18, %v388_v17  ;;  %6094 = vmatprep.subr.bf16.mxu0 %v9423_v40  ;;  %v479_v18 = vsel %vm462_vm8, %v418_v56, 0 }
  0xc3   : > { %v626_v24 = vand.u32 4294901760, %v390_v21  ;;  %v1205_v36 = vand.u32 4294901760, %v7154_v23  ;;  %v7249_v35 = vsub.f32 %v476_v53, %v7220_v10 }
  0xc5   : > { %v7163_v28 = vsub.f32 %v390_v21, %v626_v24  ;;  %v395_v29 = vpop.permute.xlu1 %394  ;;  %v393_v30 = vpop.permute.xlu0 %392  ;;  %v7165_v31 = vpack.c.bf16 %v626_v24, %v623_v14  ;;  %v1199_v14 = vsub.f32 %v7123_v5, %v1198_v13  ;;  %v697_v5 = vsub.f32 %v7185_v43, %v9421_v60 }
  0xc6   : > { %v397_v34 = vsel %vm396_vm11, %v393_v30, %v395_v29  ;;  %v688_v29 = vand.u32 4294901760, %v687_v57  ;;  %v9420_v13 = vand.u32 4294901760, %v7214_v61  ;;  %v7239_v30 = vsub.f32 %v473_v49, %v7216_v63 }
  0xc7   : > { %9545 = vst [vmem:[#allocation11_spill] sm:$0xff] %v7165_v31  ;;  %v1212_v37 = vand.u32 4294901760, %v7163_v28  ;;  %v629_v38 = vand.u32 4294901760, %v397_v34  ;;  %6072 = vmatpush3.bf16.msra.mxu1 %v7165_v31  ;;  %v7177_v39 = vpack.c.bf16 %v7163_v28, %v7154_v23  ;;  %v698_v47 = vand.u32 4294901760, %v697_v5 }
  0xc8   : > { %6073 = vmatprep.subr.bf16.mxu1 %v9423_v40  ;;  %v707_v49 = vsub.f32 %v7214_v61, %v9420_v13  ;;  %v9418_v51 = vand.u32 4294901760, %v7239_v30  ;;  %v9417_v53 = vand.u32 4294901760, %v7249_v35 }
  0xc9   : > { %v402_v45 = vpop.permute.xlu1 %401  ;;  %v400_v46 = vpop.permute.xlu0 %399  ;;  %6096 = vmatpush3.bf16.msra.mxu0 %v7177_v39  ;;  %v7196_v50 = vpack.c.bf16 %v1212_v37, %v1205_v36  ;;  %v7204_v54 = vsub.f32 %v397_v34, %v629_v38 }
  0xca   : > { %v404_v52 = vsel %vm403_vm12, %v400_v46, %v402_v45  ;;  %6097 = vmatprep.subr.bf16.mxu0 %v9423_v40  ;;  %v1200_v45 = vand.u32 4294901760, %v1199_v14  ;;  %v1213_v46 = vsub.f32 %v7163_v28, %v1212_v37  ;;  %v1206_v28 = vsub.f32 %v7154_v23, %v1205_v36 }
  0xcb   : > { %v632_v55 = vand.u32 4294901760, %v404_v52  ;;  %v1219_v19 = vand.u32 4294901760, %v7204_v54  ;;  %v482_v37 = vsel %vm462_vm8, %v419_v41, 0 }
  0xcc   : > { %v1214_v56 = vand.u32 4294901760, %v1213_v46  ;;  %v7287_v9 = vand.u32 4294901760, %v482_v37 }
  0xcd   : > { %v1225_v1 = vsub.f32 %v404_v52, %v632_v55  ;;  %v409_v3 = vpop.permute.xlu1 %408  ;;  %v407_v6 = vpop.permute.xlu0 %406  ;;  %v7218_v7 = vpack.c.bf16 %v632_v55, %v629_v38  ;;  %v7251_v38 = vand.u32 4294901760, %v479_v18  ;;  %v1193_v52 = vand.u32 4294901760, %v1192_v32  ;;  %v420_v55 = vld [vmem:[%s9406_s3 + $0x38] sm:$0xff] }
  0xce   : > { %v411_v17 = vsel %vm410_vm13, %v407_v6, %v409_v3  ;;  %v708_v3 = vand.u32 4294901760, %v707_v49  ;;  %v717_v6 = vsub.f32 %v7239_v30, %v9418_v51  ;;  %v1220_v11 = vsub.f32 %v7204_v54, %v1219_v19 }
  0xcf   : > { %9546 = vst [vmem:[#allocation12_spill] sm:$0xff] %v7218_v7  ;;  %v1226_v21 = vand.u32 4294901760, %v1225_v1  ;;  %v7227_v22 = vand.u32 4294901760, %v411_v17  ;;  %6075 = vmatpush3.bf16.msra.mxu1 %v7218_v7  ;;  %v7231_v24 = vpack.c.bf16 %v1225_v1, %v7204_v54  ;;  %v6080_v23 = vpack.c.bf16 %v1200_v45, %v1193_v52 }
  0xd0   : > { %4880 = vmatprep.subr.mxu1 %v9538_v48  ;;  %v7281_v36 = vsub.f32 %v479_v18, %v7251_v38  ;;  %v485_v14 = vsel %vm462_vm8, %v420_v55, 0  ;;  %v421_v18 = vld [vmem:[%s9406_s3 + $0x40] sm:$0xff]  ;;  %v718_v5 = vand.u32 4294901760, %v717_v6  ;;  %v7308_v32 = vsub.f32 %v482_v37, %v7287_v9 }
  0xd1   : > { %9547 = vst [vmem:[#allocation13_spill] sm:$0xff] %v7227_v22  ;;  %6099 = vmatpush3.bf16.msra.mxu0 %v7231_v24  ;;  %v7245_v34 = vpack.c.bf16 %v1226_v21, %v1219_v19  ;;  %v7258_v2 = vsub.f32 %v411_v17, %v7227_v22  ;;  %v1227_v57 = vsub.f32 %v1225_v1, %v1226_v21  ;;  %v1207_v1 = vand.u32 4294901760, %v1206_v28 }
  0xd2   : > { %5210 = vmatprep.subr.mxu0 %v9538_v48  ;;  %v727_v17 = vsub.f32 %v7249_v35, %v9417_v53  ;;  %v7310_v41 = vand.u32 4294901760, %v485_v14  ;;  %v1221_v45 = vand.u32 4294901760, %v1220_v11  ;;  %v488_v46 = vsel %vm462_vm8, %v421_v18, 0 }
  0xd3   : > { %4881 = vmatpush3.msra.mxu1 %v7227_v22  ;;  %v1228_v21 = vand.u32 4294901760, %v1227_v57  ;;  %v6083_v54 = vpack.c.bf16 %v1214_v56, %v1207_v1  ;;  %v9415_v19 = vand.u32 4294901760, %v7258_v2  ;;  %v9412_v37 = vand.u32 4294901760, %v7308_v32 }
  0xd4   : > { %4883 = vmatmul.mubr.f32.vlgmr.msra.gmra.mrb[0].mxu1 %v688_v29  ;;  %6076 = vmatprep.subr.bf16.mxu1 %v9423_v40  ;;  %v9414_v29 = vand.u32 4294901760, %v7281_v36  ;;  %v728_v49 = vand.u32 4294901760, %v727_v17  ;;  %v7332_v55 = vsub.f32 %v485_v14, %v7310_v41  ;;  %v7334_v56 = vand.u32 4294901760, %v488_v46 }
  0xd5   : > { %6078 = vmatpush3.bf16.msra.mxu1 %v6077_v12  ;;  %5211 = vmatpush3.msra.mxu0 %v7258_v2  ;;  %v422_v12 = vld [vmem:[%s9406_s3 + $0x48] sm:$0xff]  ;;  %v1234_v52 = vsub.f32 %v7258_v2, %v9415_v19  ;;  %v747_v11 = vsub.f32 %v7308_v32, %v9412_v37 }
  0xd6   : > { %5213 = vmatmul.mubr.f32.vlgmr.msra.gmra.mrb[0].mxu0 %v7158_v25  ;;  %6100 = vmatprep.subr.bf16.mxu0 %v9423_v40  ;;  %v737_v28 = vsub.f32 %v7281_v36, %v9414_v29  ;;  %9548 = vst [vmem:[#allocation14_spill] sm:$0xff] %v7334_v56  ;;  %v491_v57 = vsel %vm462_vm8, %v422_v12, 0  ;;  %v9410_v14 = vand.u32 4294901760, %v7332_v55  ;;  %v7355_v17 = vsub.f32 %v488_v46, %v7334_v56 }
  0xd7   : > { %4885 = vmatprep.mubr.msk.f32.mxu1 %vm6961_vm4, %v9538_v48  ;;  %6102 = vmatpush3.bf16.msra.mxu0 %v7110_v62  ;;  %v7347_v1 = vand.u32 4294901760, %v491_v57 }
  0xd8   : > { %4886 = vmatmul.mubr.f32.gmra.mrb[2].mxu1 %v698_v47  ;;  %6079 = vmatprep.subr.bf16.mxu1 %v9423_v40  ;;  %v6086_v47 = vpack.c.bf16 %v1228_v21, %v1221_v45  ;;  %v738_v6 = vand.u32 4294901760, %v737_v28  ;;  %v424_v21 = vld [vmem:[%s9406_s3 + $0x58] sm:$0xff]  ;;  %v748_v45 = vand.u32 4294901760, %v747_v11  ;;  %v757_v46 = vsub.f32 %v7332_v55, %v9410_v14  ;;  %v426_v11 = vld [vmem:[%s9406_s3 + $0x68] sm:$0xff]  ;;  %v427_v14 = vld [vmem:[%s9406_s3 + $0x70] sm:$0xff] }
  0xd9   : > { %6081 = vmatpush3.bf16.msra.mxu1 %v6080_v23  ;;  %5215 = vmatprep.mubr.msk.f32.mxu0 %vm6961_vm4, %v9538_v48  ;;  %v423_v23 = vld [vmem:[%s9406_s3 + $0x50] sm:$0xff]  ;;  %9549 = vst [vmem:[#allocation15_spill] sm:$0xff] %v7347_v1  ;;  %v9409_v12 = vand.u32 4294901760, %v7355_v17  ;;  %v506_v37 = vsel %vm462_vm8, %v427_v14, 0 }
  0xda   : > { %5216 = vmatmul.mubr.f32.gmra.mrb[2].mxu0 %v7185_v43  ;;  %6103 = vmatprep.subr.bf16.mxu0 %v9423_v40  ;;  %v494_v18 = vsel %vm462_vm8, %v423_v23, 0 }
  0xdb   : > { %4888 = vmatprep.mubr.msk.f32.mxu1 %vm6961_vm4, %v9538_v48  ;;  %6105 = vmatpush3.bf16.msra.mxu0 %v7126_v8  ;;  %v767_v23 = vsub.f32 %v7355_v17, %v9409_v12  ;;  %v503_v12 = vsel %vm462_vm8, %v426_v11, 0 }
  0xdc   : > { %4889 = vmatmul.mubr.f32.gmra.mrb[4].mxu1 %v708_v3  ;;  %6082 = vmatprep.subr.bf16.mxu1 %v9423_v40  ;;  %v1235_v3 = vand.u32 4294901760, %v1234_v52  ;;  %v7433_v11 = vand.u32 4294901760, %v503_v12 }
  0xdd   : > { %6084 = vmatpush3.bf16.msra.mxu1 %v6083_v54  ;;  %5218 = vmatprep.mubr.msk.f32.mxu0 %vm6961_vm4, %v9538_v48  ;;  %v7369_v54 = vsub.f32 %v491_v57, %v7347_v1  ;;  %v758_v57 = vand.u32 4294901760, %v757_v46 }
  0xde   : > { %5219 = vmatmul.mubr.f32.gmra.mrb[4].mxu0 %v7214_v61  ;;  %6106 = vmatprep.subr.bf16.mxu0 %v9423_v40  ;;  %9553 = vst [vmem:[#allocation19_spill] sm:$0xff] %v7433_v11  ;;  %v7451_v29 = vsub.f32 %v503_v12, %v7433_v11 }
  0xdf   : > { %4891 = vmatprep.mubr.msk.f32.mxu1 %vm6961_vm4, %v9538_v48  ;;  %6108 = vmatpush3.bf16.msra.mxu0 %v7165_v31  ;;  %v9411_v52 = vand.u32 4294901760, %v7369_v54 }
  0xe0   : > { %4892 = vmatmul.mubr.f32.gmra.mrb[6].mxu1 %v718_v5  ;;  %6085 = vmatprep.subr.bf16.mxu1 %v9423_v40  ;;  %v7371_v5 = vand.u32 4294901760, %v494_v18  ;;  %v9422_v53 = vand.u32 4294901760, %v7451_v29 }
  0xe1   : > { %6087 = vmatpush3.bf16.msra.mxu1 %v6086_v47  ;;  %5221 = vmatprep.mubr.msk.f32.mxu0 %vm6961_vm4, %v9538_v48  ;;  %v497_v47 = vsel %vm462_vm8, %v424_v21, 0 }
  0xe2   : > { %5222 = vmatmul.mubr.f32.gmra.mrb[6].mxu0 %v7239_v30  ;;  %6109 = vmatprep.subr.bf16.mxu0 %v9423_v40  ;;  %9550 = vst [vmem:[#allocation16_spill] sm:$0xff] %v7371_v5  ;;  %v7392_v28 = vsub.f32 %v494_v18, %v7371_v5  ;;  %v777_v18 = vsub.f32 %v7369_v54, %v9411_v52 }
  0xe3   : > { %4894 = vmatprep.mubr.msk.f32.mxu1 %vm6961_vm4, %v9538_v48  ;;  %6111 = vmatpush3.bf16.msra.mxu0 %v7218_v7 }
  0xe4   : > { %4895 = vmatmul.mubr.f32.gmra.mrb[8].mxu1 %v728_v49  ;;  %5045 = vmatprep.subr.mxu1 %v9538_v48  ;;  %v425_v49 = vld [vmem:[%s9406_s3 + $0x60] sm:$0xff]  ;;  %v9413_v21 = vand.u32 4294901760, %v7392_v28 }
  0xe5   : > { %5046 = vmatpush3.msra.mxu1 %v1235_v3  ;;  %5224 = vmatprep.mubr.msk.f32.mxu0 %vm6961_vm4, %v9538_v48  ;;  %v7397_v3 = vand.u32 4294901760, %v497_v47 }
  0xe6   : > { %5225 = vmatmul.mubr.f32.gmra.mrb[8].mxu0 %v7249_v35  ;;  %5375 = vmatprep.subr.mxu0 %v9538_v48 }
  0xe7   : > { %4897 = vmatprep.mubr.msk.f32.mxu1 %vm6961_vm4, %v9538_v48  ;;  %5376 = vmatpush3.msra.mxu0 %v7227_v22  ;;  %9551 = vst [vmem:[#allocation17_spill] sm:$0xff] %v7397_v3  ;;  %v7413_v46 = vsub.f32 %v497_v47, %v7397_v3  ;;  %v787_v47 = vsub.f32 %v7392_v28, %v9413_v21  ;;  %v7444_v21 = vand.u32 4294901760, %v506_v37 }
  0xe8   : > { %4898 = vmatmul.mubr.f32.gmra.mrb[10].mxu1 %v738_v6  ;;  %5227 = vmatprep.mubr.msk.f32.mxu0 %vm6961_vm4, %v9538_v48  ;;  %v500_v6 = vsel %vm462_vm8, %v425_v49, 0 }
  0xe9   : > { %4900 = vmatprep.mubr.msk.f32.mxu1 %vm6961_vm4, %v9538_v48  ;;  %6112 = vmatprep.subr.bf16.mxu0 %v9423_v40  ;;  %v7415_v49 = vand.u32 4294901760, %v500_v6  ;;  %9554 = vst [vmem:[#allocation20_spill] sm:$0xff] %v7444_v21 }
  0xea   : > { %5228 = vmatmul.mubr.f32.gmra.mrb[10].mxu0 %v7281_v36  ;;  %6280 = vmatprep.subr.bf16.mxu1 %v9423_v40 }
  0xeb   : > { %5230 = vmatprep.mubr.msk.f32.mxu0 %vm6961_vm4, %v9538_v48  ;;  %9552 = vst [vmem:[#allocation18_spill] sm:$0xff] %v7415_v49  ;;  %v7431_v52 = vsub.f32 %v500_v6, %v7415_v49 }
  0xec   : > { %4901 = vmatmul.mubr.f32.gmra.mrb[12].mxu1 %v748_v45  ;;  %v768_v45 = vand.u32 4294901760, %v767_v23  ;;  %v9416_v23 = vand.u32 4294901760, %v7413_v46 }
  0xed   : > { %4903 = vmatprep.mubr.msk.f32.mxu1 %vm6961_vm4, %v9538_v48  ;;  %v9419_v6 = vand.u32 4294901760, %v7431_v52 }
  0xee   : > { %5231 = vmatmul.mubr.f32.gmra.mrb[12].mxu0 %v7308_v32  ;;  %v797_v14 = vsub.f32 %v7413_v46, %v9416_v23 }
  0xef   : > { %5233 = vmatprep.mubr.msk.f32.mxu0 %vm6961_vm4, %v9538_v48 }
  0xf0   : > { %4904 = vmatmul.mubr.f32.gmra.mrb[14].mxu1 %v758_v57  ;;  %v778_v57 = vand.u32 4294901760, %v777_v18  ;;  %v428_v18 = vld [vmem:[%s9406_s3 + $0x78] sm:$0xff]  ;;  %v798_v12 = vand.u32 4294901760, %v797_v14 }
  0xf1   : > { %4906 = vmatprep.mubr.msk.f32.mxu1 %vm6961_vm4, %v9538_v48  ;;  %v509_v19 = vsel %vm462_vm8, %v428_v18, 0  ;;  %v807_v18 = vsub.f32 %v7431_v52, %v9419_v6 }
  0xf2   : > { %5234 = vmatmul.mubr.f32.gmra.mrb[14].mxu0 %v7332_v55  ;;  %v7465_v23 = vand.u32 4294901760, %v509_v19 }
  0xf3   : > { %5236 = vmatprep.mubr.msk.f32.mxu0 %vm6961_vm4, %v9538_v48  ;;  %v808_v6 = vand.u32 4294901760, %v807_v18 }
  0xf4   : > { %4907 = vmatmul.mubr.f32.gmra.mrb[16].mxu1 %v768_v45  ;;  %v788_v45 = vand.u32 4294901760, %v787_v47  ;;  %v7463_v47 = vsub.f32 %v506_v37, %v7444_v21  ;;  %9555 = vst [vmem:[#allocation21_spill] sm:$0xff] %v7465_v23  ;;  %v430_v37 = vld [vmem:[%s9406_s3 + $0x88] sm:$0xff]  ;;  %v7482_v14 = vsub.f32 %v509_v19, %v7465_v23  ;;  %v431_v19 = vld [vmem:[%s9406_s3 + $0x90] sm:$0xff]  ;;  %v9565_v23 = vand.u32 4294901760, %v7106_v58 }
  0xf5   : > { %4909 = vmatprep.mubr.msk.f32.mxu1 %vm6961_vm4, %v9538_v48  ;;  %v515_v60 = vsel %vm462_vm8, %v430_v37, 0  ;;  %v518_v42 = vsel %vm462_vm8, %v431_v19, 0  ;;  %v9566_v21 = vand.u32 4294901760, %v7108_v59 }
  0xf6   : > { %5237 = vmatmul.mubr.f32.gmra.mrb[16].mxu0 %v7355_v17  ;;  %v9429_v18 = vand.u32 4294901760, %v7482_v14  ;;  %v7505_v37 = vand.u32 4294901760, %v515_v60  ;;  %v7523_v19 = vand.u32 4294901760, %v518_v42 }
  0xf7   : > { %5239 = vmatprep.mubr.msk.f32.mxu0 %vm6961_vm4, %v9538_v48  ;;  %v6113_v11 = vpack.c.bf16 %v9566_v21, %v9565_v23  ;;  %v9569_v23 = vmov 0.0|0.0  }
  0xf8   : > { %4910 = vmatmul.mubr.f32.gmra.mrb[18].mxu1 %v778_v57  ;;  %v429_v57 = vld [vmem:[%s9406_s3 + $0x80] sm:$0xff]  ;;  %9557 = vst [vmem:[#allocation23_spill] sm:$0xff] %v7505_v37  ;;  %9558 = vst [vmem:[#allocation24_spill] sm:$0xff] %v7523_v19  ;;  %v7541_v0 = vsub.f32 %v518_v42, %v7523_v19 }
  0xf9   : > { %4912 = vmatprep.mubr.msk.f32.mxu1 %vm6961_vm4, %v9538_v48  ;;  %v512_v51 = vsel %vm462_vm8, %v429_v57, 0  ;;  %v817_v57 = vsub.f32 %v7451_v29, %v9422_v53  ;;  %v437_v19 = vld [vmem:[%s9406_s3 + $0xc0] sm:$0xff] }
  0xfa   : > { %5240 = vmatmul.mubr.f32.gmra.mrb[18].mxu0 %v7369_v54  ;;  %v7487_v13 = vand.u32 4294901760, %v512_v51  ;;  %v9438_v7 = vand.u32 4294901760, %v7541_v0 }
  0xfb   : > { %5242 = vmatprep.mubr.msk.f32.mxu0 %vm6961_vm4, %v9538_v48  ;;  %v818_v53 = vand.u32 4294901760, %v817_v57 }
  0xfc   : > { %4913 = vmatmul.mubr.f32.gmra.mrb[20].mxu1 %v788_v45  ;;  %v9427_v45 = vand.u32 4294901760, %v7463_v47  ;;  %9556 = vst [vmem:[#allocation22_spill] sm:$0xff] %v7487_v13  ;;  %v7503_v40 = vsub.f32 %v512_v51, %v7487_v13  ;;  %v837_v51 = vsub.f32 %v7482_v14, %v9429_v18  ;;  %v7534_v18 = vand.u32 4294901760, %v521_v27 }
  0xfd   : > { %4915 = vmatprep.mubr.msk.f32.mxu1 %vm6961_vm4, %v9538_v48 }
  0xfe   : > { %5243 = vmatmul.mubr.f32.gmra.mrb[20].mxu0 %v7392_v28  ;;  %v9432_v57 = vand.u32 4294901760, %v7503_v40  ;;  %9559 = vst [vmem:[#allocation25_spill] sm:$0xff] %v7534_v18 }
  0xff   : > { %5245 = vmatprep.mubr.msk.f32.mxu0 %vm6961_vm4, %v9538_v48 }
 0x100   : > { %4916 = vmatmul.mubr.f32.gmra.mrb[22].mxu1 %v798_v12  ;;  %v827_v12 = vsub.f32 %v7463_v47, %v9427_v45  ;;  %v7521_v45 = vsub.f32 %v515_v60, %v7505_v37  ;;  %v847_v33 = vsub.f32 %v7503_v40, %v9432_v57 }
 0x101   : > { %4918 = vmatprep.mubr.msk.f32.mxu1 %vm6961_vm4, %v9538_v48 }
 0x102   : > { %5246 = vmatmul.mubr.f32.gmra.mrb[22].mxu0 %v7413_v46  ;;  %v9435_v60 = vand.u32 4294901760, %v7521_v45  ;;  %v848_v42 = vand.u32 4294901760, %v847_v33 }
 0x103   : > { %5248 = vmatprep.mubr.msk.f32.mxu0 %vm6961_vm4, %v9538_v48 }
 0x104   : > { %4919 = vmatmul.mubr.f32.gmra.mrb[24].mxu1 %v808_v6  ;;  %v828_v6 = vand.u32 4294901760, %v827_v12  ;;  %v433_v12 = vld [vmem:[%s9406_s3 + $0xa0] sm:$0xff] }
 0x105   : > { %4921 = vmatprep.mubr.msk.f32.mxu1 %vm6961_vm4, %v9538_v48  ;;  %v524_v22 = vsel %vm462_vm8, %v433_v12, 0  ;;  %v857_v12 = vsub.f32 %v7521_v45, %v9435_v60 }
 0x106   : > { %5249 = vmatmul.mubr.f32.gmra.mrb[24].mxu0 %v7431_v52  ;;  %v7555_v57 = vand.u32 4294901760, %v524_v22 }
 0x107   : > { %5251 = vmatprep.mubr.msk.f32.mxu0 %vm6961_vm4, %v9538_v48  ;;  %v858_v60 = vand.u32 4294901760, %v857_v12 }
 0x108   : > { %4922 = vmatmul.mubr.f32.gmra.mrb[26].mxu1 %v818_v53  ;;  %v838_v53 = vand.u32 4294901760, %v837_v51  ;;  %v7553_v51 = vsub.f32 %v521_v27, %v7534_v18  ;;  %9560 = vst [vmem:[#allocation26_spill] sm:$0xff] %v7555_v57  ;;  %v435_v27 = vld [vmem:[%s9406_s3 + $0xb0] sm:$0xff]  ;;  %v7572_v33 = vsub.f32 %v524_v22, %v7555_v57  ;;  %v436_v22 = vld [vmem:[%s9406_s3 + $0xb8] sm:$0xff] }
 0x109   : > { %4924 = vmatprep.mubr.msk.f32.mxu1 %vm6961_vm4, %v9538_v48  ;;  %v530_v62 = vsel %vm462_vm8, %v435_v27, 0  ;;  %v533_v18 = vsel %vm462_vm8, %v436_v22, 0 }
 0x10a   : > { %5252 = vmatmul.mubr.f32.gmra.mrb[26].mxu0 %v7451_v29  ;;  %v9448_v12 = vand.u32 4294901760, %v7572_v33  ;;  %v7595_v27 = vand.u32 4294901760, %v530_v62  ;;  %v7613_v22 = vand.u32 4294901760, %v533_v18 }
 0x10b   : > { %5254 = vmatprep.mubr.msk.f32.mxu0 %vm6961_vm4, %v9538_v48 }
 0x10c   : > { %4925 = vmatmul.mubr.f32.gmra.mrb[28].mxu1 %v828_v6  ;;  %v434_v6 = vld [vmem:[%s9406_s3 + $0xa8] sm:$0xff]  ;;  %9562 = vst [vmem:[#allocation28_spill] sm:$0xff] %v7595_v27  ;;  %9563 = vst [vmem:[#allocation29_spill] sm:$0xff] %v7613_v22 }
 0x10d   : > { %4927 = vmatprep.mubr.msk.f32.mxu1 %vm6961_vm4, %v9538_v48  ;;  %v527_v31 = vsel %vm462_vm8, %v434_v6, 0  ;;  %v867_v6 = vsub.f32 %v7541_v0, %v9438_v7 }
 0x10e   : > { %5255 = vmatmul.mubr.f32.gmra.mrb[28].mxu0 %v7463_v47  ;;  %v7577_v8 = vand.u32 4294901760, %v527_v31 }
 0x10f   : > { %5257 = vmatprep.mubr.msk.f32.mxu0 %vm6961_vm4, %v9538_v48  ;;  %v868_v7 = vand.u32 4294901760, %v867_v6 }
 0x110   : > { %4928 = vmatmul.mubr.f32.gmra.mrb[30].mxu1 %v838_v53  ;;  %v9445_v53 = vand.u32 4294901760, %v7553_v51  ;;  %9561 = vst [vmem:[#allocation27_spill] sm:$0xff] %v7577_v8  ;;  %v7593_v57 = vsub.f32 %v527_v31, %v7577_v8  ;;  %v887_v31 = vsub.f32 %v7572_v33, %v9448_v12  ;;  %v536_v8 = vsel %vm462_vm8, %v437_v19, 0 }
 0x111   : > { %4930 = vmatprep.mubr.msk.f32.mxu1 %vm6961_vm4, %v9538_v48  ;;  %v7624_v12 = vand.u32 4294901760, %v536_v8 }
 0x112   : > { %5258 = vmatmul.mubr.f32.gmra.mrb[30].mxu0 %v7482_v14  ;;  %v9453_v6 = vand.u32 4294901760, %v7593_v57 }
 0x113   : > { %5260 = vmatprep.mubr.msk.f32.mxu0 %vm6961_vm4, %v9538_v48  ;;  %9564 = vst [vmem:[#allocation30_spill] sm:$0xff] %v7624_v12 }
 0x114   : > { %4931 = vmatmul.mubr.f32.gmra.mrb[32].mxu1 %v848_v42  ;;  %v877_v42 = vsub.f32 %v7553_v51, %v9445_v53  ;;  %v7611_v53 = vsub.f32 %v530_v62, %v7595_v27  ;;  %v897_v62 = vsub.f32 %v7593_v57, %v9453_v6  ;;  %v7631_v27 = vsub.f32 %v533_v18, %v7613_v22 }
 0x115   : > { %4933 = vmatprep.mubr.msk.f32.mxu1 %vm6961_vm4, %v9538_v48 }
 0x116   : > { %5261 = vmatmul.mubr.f32.gmra.mrb[32].mxu0 %v7503_v40  ;;  %v9458_v19 = vand.u32 4294901760, %v7611_v53  ;;  %v898_v18 = vand.u32 4294901760, %v897_v62  ;;  %v9470_v22 = vand.u32 4294901760, %v7631_v27 }
 0x117   : > { %5263 = vmatprep.mubr.msk.f32.mxu0 %vm6961_vm4, %v9538_v48 }
 0x118   : > { %4934 = vmatmul.mubr.f32.gmra.mrb[34].mxu1 %v858_v60  ;;  %v878_v60 = vand.u32 4294901760, %v877_v42  ;;  %v438_v42 = vld [vmem:[%s9406_s3 + $0xc8] sm:$0xff] }
 0x119   : > { %4936 = vmatprep.mubr.msk.f32.mxu1 %vm6961_vm4, %v9538_v48  ;;  %v539_v37 = vsel %vm462_vm8, %v438_v42, 0  ;;  %v907_v42 = vsub.f32 %v7611_v53, %v9458_v19 }
 0x11a   : > { %5264 = vmatmul.mubr.f32.gmra.mrb[34].mxu0 %v7521_v45  ;;  %v7645_v6 = vand.u32 4294901760, %v539_v37 }
 0x11b   : > { %5266 = vmatprep.mubr.msk.f32.mxu0 %vm6961_vm4, %v9538_v48  ;;  %v908_v19 = vand.u32 4294901760, %v907_v42 }
 0x11c   : > { %4937 = vmatmul.mubr.f32.gmra.mrb[36].mxu1 %v868_v7  ;;  %v888_v7 = vand.u32 4294901760, %v887_v31  ;;  %v7643_v31 = vsub.f32 %v536_v8, %v7624_v12  ;;  %v440_v8 = vld [vmem:[%s9406_s3 + $0xd8] sm:$0xff]  ;;  %v7662_v62 = vsub.f32 %v539_v37, %v7645_v6  ;;  %v9567_v37 = vand.u32 4294901760, %v7158_v25 }
 0x11d   : > { %4939 = vmatprep.mubr.msk.f32.mxu1 %vm6961_vm4, %v9538_v48 }
 0x11e   : > { %5267 = vmatmul.mubr.f32.gmra.mrb[36].mxu0 %v7541_v0  ;;  %v9568_v58 = vand.u32 4294901760, %v7643_v31  ;;  %v9467_v21 = vand.u32 4294901760, %v7662_v62 }
 0x11f   : > { %5269 = vmatprep.mubr.msk.f32.mxu0 %vm6961_vm4, %v9538_v48 }
 0x120   : > { %4940 = vmatmul.mubr.f32.gmra.mrb[38].mxu1 %v878_v60  ;;  %v439_v60 = vld [vmem:[%s9406_s3 + $0xd0] sm:$0xff]  ;;  %v927_v59 = vsub.f32 %v7643_v31, %v9568_v58  ;;  %v9570_v58 = vand.u32 4294901760, %v7185_v43 }
 0x121   : > { %4942 = vmatprep.mubr.msk.f32.mxu1 %vm6961_vm4, %v9538_v48  ;;  %v542_v13 = vsel %vm462_vm8, %v439_v60, 0  ;;  %v917_v60 = vsub.f32 %v7631_v27, %v9470_v22  ;;  %v9578_v22 = vand.u32 4294901760, %v7281_v36 }
 0x122   : > { %5270 = vmatmul.mubr.f32.gmra.mrb[38].mxu0 %v7553_v51  ;;  %v7667_v12 = vand.u32 4294901760, %v542_v13 }
 0x123   : > { %5272 = vmatprep.mubr.msk.f32.mxu0 %vm6961_vm4, %v9538_v48  ;;  %v918_v42 = vand.u32 4294901760, %v917_v60 }
 0x124   : > { %4943 = vmatmul.mubr.f32.gmra.mrb[40].mxu1 %v888_v7  ;;  %v545_v7 = vsel %vm462_vm8, %v440_v8, 0  ;;  %v7689_v25 = vsub.f32 %v542_v13, %v7667_v12  ;;  %v928_v13 = vand.u32 4294901760, %v927_v59  ;;  %v443_v59 = vld [vmem:[%s9406_s3 + $0xf0] sm:$0xff] }
 0x125   : > { %4945 = vmatprep.mubr.msk.f32.mxu1 %vm6961_vm4, %v9538_v48  ;;  %v7691_v8 = vand.u32 4294901760, %v545_v7 }
 0x126   : > { %5273 = vmatmul.mubr.f32.gmra.mrb[40].mxu0 %v7572_v33  ;;  %v9469_v60 = vand.u32 4294901760, %v7689_v25 }
 0x127   : > { %5377 = vmatprep.mubr.msk.f32.mxu0 %vm6961_vm4, %v9538_v48 }
 0x128   : > { %4946 = vmatmul.mubr.f32.gmra.mrb[42].mxu1 %v898_v18  ;;  %v441_v18 = vld [vmem:[%s9406_s3 + $0xe0] sm:$0xff] }
 0x129   : > { %4948 = vmatprep.mubr.msk.f32.mxu1 %vm6961_vm4, %v9538_v48 }
 0x12a   : > { %5378 = vmatmul.mubr.f32.vlgmr.msra.gmra.mrb[0].mxu0 %v9567_v37  ;;  %v442_v37 = vld [vmem:[%s9406_s3 + $0xe8] sm:$0xff] }
 0x12b   : > { %6114 = vmatpush3.bf16.msra.mxu0 %v6113_v11  ;;  %5380 = vmatprep.mubr.msk.f32.mxu0 %vm6961_vm4, %v9538_v48  ;;  %v548_v11 = vsel %vm462_vm8, %v441_v18, 0  ;;  %v7710_v18 = vsub.f32 %v545_v7, %v7691_v8 }
 0x12c   : > { %4949 = vmatmul.mubr.f32.gmra.mrb[44].mxu1 %v908_v19  ;;  %6115 = vmatprep.subr.bf16.mxu0 %v9569_v23  ;;  %v937_v19 = vsub.f32 %v7662_v62, %v9467_v21  ;;  %v7712_v43 = vand.u32 4294901760, %v548_v11 }
 0x12d   : > { %4951 = vmatprep.mubr.msk.f32.mxu1 %vm6961_vm4, %v9538_v48  ;;  %v9468_v21 = vand.u32 4294901760, %v7710_v18 }
 0x12e   : > { %5381 = vmatmul.mubr.f32.gmra.mrb[2].mxu0 %v9570_v58  ;;  %v938_v7 = vand.u32 4294901760, %v937_v19  ;;  %v9573_v19 = vand.u32 4294901760, %v7239_v30 }
 0x12f   : > { %6117 = vmatpush3.bf16.msra.mxu0 %v7148_v20  ;;  %5383 = vmatprep.mubr.msk.f32.mxu0 %vm6961_vm4, %v9538_v48  ;;  %v551_v20 = vsel %vm462_vm8, %v442_v37, 0  ;;  %v947_v37 = vsub.f32 %v7689_v25, %v9469_v60  ;;  %v957_v30 = vsub.f32 %v7710_v18, %v9468_v21 }
 0x130   : > { %4952 = vmatmul.mubr.f32.gmra.mrb[46].mxu1 %v918_v42  ;;  %6118 = vmatprep.subr.bf16.mxu0 %v9569_v23  ;;  %v9571_v42 = vand.u32 4294901760, %v7214_v61  ;;  %v7725_v58 = vand.u32 4294901760, %v551_v20  ;;  %v7733_v61 = vsub.f32 %v548_v11, %v7712_v43 }
 0x131   : > { %4954 = vmatprep.mubr.msk.f32.mxu1 %vm6961_vm4, %v9538_v48 }
 0x132   : > { %5384 = vmatmul.mubr.f32.gmra.mrb[4].mxu0 %v9571_v42  ;;  %9572 = vst [vmem:[#allocation31_spill] sm:$0xff] %v7725_v58  ;;  %v7747_v11 = vsub.f32 %v551_v20, %v7725_v58  ;;  %v9575_v20 = vand.u32 4294901760, %v7249_v35 }
 0x133   : > { %6120 = vmatpush3.bf16.msra.mxu0 %v7196_v50  ;;  %5386 = vmatprep.mubr.msk.f32.mxu0 %vm6961_vm4, %v9538_v48  ;;  %v554_v50 = vsel %vm462_vm8, %v443_v59, 0  ;;  %v948_v59 = vand.u32 4294901760, %v947_v37  ;;  %v9576_v37 = vand.u32 4294901760, %v7258_v2 }
 0x134   : > { %4955 = vmatmul.mubr.f32.gmra.mrb[48].mxu1 %v928_v13  ;;  %6121 = vmatprep.subr.bf16.mxu0 %v9569_v23  ;;  %v444_v13 = vld [vmem:[%s9406_s3 + $0xf8] sm:$0xff]  ;;  %v7749_v42 = vand.u32 4294901760, %v554_v50  ;;  %v9474_v21 = vand.u32 4294901760, %v7747_v11 }
 0x135   : > { %4957 = vmatprep.mubr.msk.f32.mxu1 %vm6961_vm4, %v9538_v48 }
 0x136   : > { %5387 = vmatmul.mubr.f32.gmra.mrb[6].mxu0 %v9573_v19  ;;  %9574 = vst [vmem:[#allocation32_spill] sm:$0xff] %v7749_v42  ;;  %v9471_v19 = vand.u32 4294901760, %v7733_v61  ;;  %v7770_v60 = vsub.f32 %v554_v50, %v7749_v42  ;;  %v446_v50 = vld [vmem:[%s9406_s3 + $0x108] sm:$0xff]  ;;  %v447_v42 = vld [vmem:[%s9406_s3 + $0x110] sm:$0xff] }
 0x137   : > { %6123 = vmatpush3.bf16.msra.mxu0 %v7245_v34  ;;  %5389 = vmatprep.mubr.msk.f32.mxu0 %vm6961_vm4, %v9538_v48  ;;  %v557_v34 = vsel %vm462_vm8, %v444_v13, 0  ;;  %v958_v13 = vand.u32 4294901760, %v957_v30  ;;  %v566_v58 = vsel %vm462_vm8, %v447_v42, 0 }
 0x138   : > { %4958 = vmatmul.mubr.f32.gmra.mrb[50].mxu1 %v938_v7  ;;  %5540 = vmatprep.subr.mxu0 %v9538_v48  ;;  %v445_v7 = vld [vmem:[%s9406_s3 + $0x100] sm:$0xff]  ;;  %v967_v35 = vsub.f32 %v7733_v61, %v9471_v19  ;;  %v9479_v30 = vand.u32 4294901760, %v7770_v60 }
 0x139   : > { %4960 = vmatprep.mubr.msk.f32.mxu1 %vm6961_vm4, %v9538_v48 }
 0x13a   : > { %5390 = vmatmul.mubr.f32.gmra.mrb[8].mxu0 %v9575_v20  ;;  %v7775_v20 = vand.u32 4294901760, %v557_v34  ;;  %v968_v19 = vand.u32 4294901760, %v967_v35 }
 0x13b   : > { %5541 = vmatpush3.msra.mxu0 %v9576_v37  ;;  %5392 = vmatprep.mubr.msk.f32.mxu0 %vm6961_vm4, %v9538_v48  ;;  %v560_v37 = vsel %vm462_vm8, %v445_v7, 0 }
 0x13c   : > { %4961 = vmatmul.mubr.f32.gmra.mrb[52].mxu1 %v948_v59  ;;  %9577 = vst [vmem:[#allocation33_spill] sm:$0xff] %v7775_v20  ;;  %6124 = vmatprep.subr.bf16.mxu0 %v9569_v23  ;;  %v977_v59 = vsub.f32 %v7747_v11, %v9474_v21  ;;  %v7793_v7 = vsub.f32 %v557_v34, %v7775_v20  ;;  %v7795_v36 = vand.u32 4294901760, %v560_v37  ;;  %v9580_v21 = vand.u32 4294901760, %v7308_v32  ;;  %v448_v32 = vld [vmem:[%s9406_s3 + $0x118] sm:$0xff] }
 0x13d   : > { %4963 = vmatprep.mubr.msk.f32.mxu1 %vm6961_vm4, %v9538_v48  ;;  %v987_v34 = vsub.f32 %v7770_v60, %v9479_v30 }
 0x13e   : > { %5393 = vmatmul.mubr.f32.gmra.mrb[10].mxu0 %v9578_v22  ;;  %9579 = vst [vmem:[#allocation34_spill] sm:$0xff] %v7795_v36  ;;  %v563_v22 = vsel %vm462_vm8, %v446_v50, 0  ;;  %v9482_v35 = vand.u32 4294901760, %v7793_v7  ;;  %v7812_v50 = vsub.f32 %v560_v37, %v7795_v36  ;;  %v7826_v37 = vand.u32 4294901760, %v566_v58 }
 0x13f   : > { %5395 = vmatprep.mubr.msk.f32.mxu0 %vm6961_vm4, %v9538_v48  ;;  %v7814_v20 = vand.u32 4294901760, %v563_v22  ;;  %v569_v36 = vsel %vm462_vm8, %v448_v32, 0 }
 0x140   : > { %4964 = vmatmul.mubr.f32.gmra.mrb[54].mxu1 %v958_v13  ;;  %v978_v13 = vand.u32 4294901760, %v977_v59  ;;  %9583 = vst [vmem:[#allocation36_spill] sm:$0xff] %v7826_v37  ;;  %v997_v42 = vsub.f32 %v7793_v7, %v9482_v35  ;;  %v9483_v59 = vand.u32 4294901760, %v7812_v50  ;;  %v9586_v35 = vand.u32 4294901760, %v7369_v54 }
 0x141   : > { %4966 = vmatprep.mubr.msk.f32.mxu1 %vm6961_vm4, %v9538_v48  ;;  %9581 = vst [vmem:[#allocation35_spill] sm:$0xff] %v7814_v20  ;;  %v7833_v30 = vsub.f32 %v563_v22, %v7814_v20  ;;  %v7848_v22 = vand.u32 4294901760, %v569_v36 }
 0x142   : > { %5396 = vmatmul.mubr.f32.gmra.mrb[12].mxu0 %v9580_v21  ;;  %v9582_v21 = vand.u32 4294901760, %v7332_v55  ;;  %v9584_v55 = vand.u32 4294901760, %v7355_v17  ;;  %v998_v32 = vand.u32 4294901760, %v997_v42 }
 0x143   : > { %5398 = vmatprep.mubr.msk.f32.mxu0 %vm6961_vm4, %v9538_v48  ;;  %9585 = vst [vmem:[#allocation37_spill] sm:$0xff] %v7848_v22  ;;  %v9486_v17 = vand.u32 4294901760, %v7833_v30  ;;  %v7866_v42 = vsub.f32 %v569_v36, %v7848_v22  ;;  %v451_v36 = vld [vmem:[%s9406_s3 + $0x130] sm:$0xff]  ;;  %v452_v22 = vld [vmem:[%s9406_s3 + $0x138] sm:$0xff] }
 0x144   : > { %4967 = vmatmul.mubr.f32.gmra.mrb[56].mxu1 %v968_v19  ;;  %v988_v19 = vand.u32 4294901760, %v987_v34  ;;  %v7846_v34 = vsub.f32 %v566_v58, %v7826_v37  ;;  %v450_v58 = vld [vmem:[%s9406_s3 + $0x128] sm:$0xff]  ;;  %v9588_v37 = vand.u32 4294901760, %v7392_v28  ;;  %v581_v20 = vsel %vm462_vm8, %v452_v22, 0 }
 0x145   : > { %4969 = vmatprep.mubr.msk.f32.mxu1 %vm6961_vm4, %v9538_v48 }
 0x146   : > { %5399 = vmatmul.mubr.f32.gmra.mrb[14].mxu0 %v9582_v21  ;;  %v1007_v21 = vsub.f32 %v7812_v50, %v9483_v59 }
 0x147   : > { %5401 = vmatprep.mubr.msk.f32.mxu0 %vm6961_vm4, %v9538_v48 }
 0x148   : > { %4970 = vmatmul.mubr.f32.gmra.mrb[58].mxu1 %v978_v13  ;;  %v449_v13 = vld [vmem:[%s9406_s3 + $0x120] sm:$0xff]  ;;  %v1008_v59 = vand.u32 4294901760, %v1007_v21  ;;  %v9494_v21 = vand.u32 4294901760, %v7866_v42 }
 0x149   : > { %4972 = vmatprep.mubr.msk.f32.mxu1 %vm6961_vm4, %v9538_v48 }
 0x14a   : > { %5402 = vmatmul.mubr.f32.gmra.mrb[16].mxu0 %v9584_v55  ;;  %v572_v55 = vsel %vm462_vm8, %v449_v13, 0  ;;  %v1017_v13 = vsub.f32 %v7833_v30, %v9486_v17 }
 0x14b   : > { %5404 = vmatprep.mubr.msk.f32.mxu0 %vm6961_vm4, %v9538_v48  ;;  %v7871_v54 = vand.u32 4294901760, %v572_v55 }
 0x14c   : > { %4973 = vmatmul.mubr.f32.gmra.mrb[60].mxu1 %v988_v19  ;;  %v9489_v19 = vand.u32 4294901760, %v7846_v34  ;;  %v1018_v17 = vand.u32 4294901760, %v1017_v13 }
 0x14d   : > { %4975 = vmatprep.mubr.msk.f32.mxu1 %vm6961_vm4, %v9538_v48  ;;  %9587 = vst [vmem:[#allocation38_spill] sm:$0xff] %v7871_v54 }
 0x14e   : > { %5405 = vmatmul.mubr.f32.gmra.mrb[18].mxu0 %v9586_v35  ;;  %v575_v35 = vsel %vm462_vm8, %v450_v58, 0  ;;  %v7888_v58 = vsub.f32 %v572_v55, %v7871_v54  ;;  %v1037_v55 = vsub.f32 %v7866_v42, %v9494_v21 }
 0x14f   : > { %5407 = vmatprep.mubr.msk.f32.mxu0 %vm6961_vm4, %v9538_v48  ;;  %v7890_v28 = vand.u32 4294901760, %v575_v35 }
 0x150   : > { %4976 = vmatmul.mubr.f32.gmra.mrb[62].mxu1 %v998_v32  ;;  %v1027_v32 = vsub.f32 %v7846_v34, %v9489_v19  ;;  %v9590_v19 = vand.u32 4294901760, %v7413_v46  ;;  %v9497_v13 = vand.u32 4294901760, %v7888_v58  ;;  %v453_v46 = vld [vmem:[%s9406_s3 + $0x140] sm:$0xff] }
 0x151   : > { %4978 = vmatprep.mubr.msk.f32.mxu1 %vm6961_vm4, %v9538_v48  ;;  %9589 = vst [vmem:[#allocation39_spill] sm:$0xff] %v7890_v28 }
 0x152   : > { %5408 = vmatmul.mubr.f32.gmra.mrb[20].mxu0 %v9588_v37  ;;  %v578_v37 = vsel %vm462_vm8, %v451_v36, 0  ;;  %v7907_v36 = vsub.f32 %v575_v35, %v7890_v28  ;;  %v7921_v35 = vand.u32 4294901760, %v581_v20  ;;  %v1047_v22 = vsub.f32 %v7888_v58, %v9497_v13 }
 0x153   : > { %5410 = vmatprep.mubr.msk.f32.mxu0 %vm6961_vm4, %v9538_v48  ;;  %v7909_v54 = vand.u32 4294901760, %v578_v37  ;;  %v584_v28 = vsel %vm462_vm8, %v453_v46, 0  ;;  %v9596_v13 = vand.u32 4294901760, %v7463_v47 }
 0x154   : > { %4979 = vmatmul.mubr.f32.gmra.mrb[64].mxu1 %v1008_v59  ;;  %v1028_v59 = vand.u32 4294901760, %v1027_v32  ;;  %9593 = vst [vmem:[#allocation41_spill] sm:$0xff] %v7921_v35  ;;  %v9498_v32 = vand.u32 4294901760, %v7907_v36  ;;  %v1048_v46 = vand.u32 4294901760, %v1047_v22 }
 0x155   : > { %4981 = vmatprep.mubr.msk.f32.mxu1 %vm6961_vm4, %v9538_v48  ;;  %9591 = vst [vmem:[#allocation40_spill] sm:$0xff] %v7909_v54  ;;  %v7928_v21 = vsub.f32 %v578_v37, %v7909_v54  ;;  %v7943_v37 = vand.u32 4294901760, %v584_v28 }
 0x156   : > { %5411 = vmatmul.mubr.f32.gmra.mrb[22].mxu0 %v9590_v19  ;;  %v9592_v19 = vand.u32 4294901760, %v7431_v52  ;;  %v9594_v52 = vand.u32 4294901760, %v7451_v29 }
 0x157   : > { %5413 = vmatprep.mubr.msk.f32.mxu0 %vm6961_vm4, %v9538_v48  ;;  %9595 = vst [vmem:[#allocation42_spill] sm:$0xff] %v7943_v37  ;;  %v9501_v29 = vand.u32 4294901760, %v7928_v21  ;;  %v7961_v22 = vsub.f32 %v584_v28, %v7943_v37  ;;  %v456_v28 = vld [vmem:[%s9406_s3 + $0x158] sm:$0xff]  ;;  %v457_v37 = vld [vmem:[%s9406_s3 + $0x160] sm:$0xff] }
 0x158   : > { %4982 = vmatmul.mubr.f32.gmra.mrb[66].mxu1 %v1018_v17  ;;  %v1038_v17 = vand.u32 4294901760, %v1037_v55  ;;  %v7941_v55 = vsub.f32 %v581_v20, %v7921_v35  ;;  %v455_v20 = vld [vmem:[%s9406_s3 + $0x150] sm:$0xff]  ;;  %v9598_v35 = vand.u32 4294901760, %v7482_v14  ;;  %v596_v54 = vsel %vm462_vm8, %v457_v37, 0 }
 0x159   : > { %4984 = vmatprep.mubr.msk.f32.mxu1 %vm6961_vm4, %v9538_v48 }
 0x15a   : > { %5414 = vmatmul.mubr.f32.gmra.mrb[24].mxu0 %v9592_v19  ;;  %v1057_v19 = vsub.f32 %v7907_v36, %v9498_v32 }
 0x15b   : > { %5416 = vmatprep.mubr.msk.f32.mxu0 %vm6961_vm4, %v9538_v48 }
 0x15c   : > { %4985 = vmatmul.mubr.f32.gmra.mrb[68].mxu1 %v1028_v59  ;;  %v454_v59 = vld [vmem:[%s9406_s3 + $0x148] sm:$0xff]  ;;  %v1058_v32 = vand.u32 4294901760, %v1057_v19  ;;  %v9509_v19 = vand.u32 4294901760, %v7961_v22 }
 0x15d   : > { %4987 = vmatprep.mubr.msk.f32.mxu1 %vm6961_vm4, %v9538_v48 }
 0x15e   : > { %5417 = vmatmul.mubr.f32.gmra.mrb[26].mxu0 %v9594_v52  ;;  %v587_v52 = vsel %vm462_vm8, %v454_v59, 0  ;;  %v1067_v59 = vsub.f32 %v7928_v21, %v9501_v29 }
 0x15f   : > { %5419 = vmatprep.mubr.msk.f32.mxu0 %vm6961_vm4, %v9538_v48  ;;  %v7966_v47 = vand.u32 4294901760, %v587_v52 }
 0x160   : > { %4988 = vmatmul.mubr.f32.gmra.mrb[70].mxu1 %v1038_v17  ;;  %v9504_v17 = vand.u32 4294901760, %v7941_v55  ;;  %v1068_v29 = vand.u32 4294901760, %v1067_v59 }
 0x161   : > { %4990 = vmatprep.mubr.msk.f32.mxu1 %vm6961_vm4, %v9538_v48  ;;  %9597 = vst [vmem:[#allocation43_spill] sm:$0xff] %v7966_v47 }
 0x162   : > { %5420 = vmatmul.mubr.f32.gmra.mrb[28].mxu0 %v9596_v13  ;;  %v590_v13 = vsel %vm462_vm8, %v455_v20, 0  ;;  %v7983_v20 = vsub.f32 %v587_v52, %v7966_v47  ;;  %v1087_v52 = vsub.f32 %v7961_v22, %v9509_v19  ;;  %v9603_v19 = vand.u32 4294901760, %v7541_v0 }
 0x163   : > { %5422 = vmatprep.mubr.msk.f32.mxu0 %vm6961_vm4, %v9538_v48  ;;  %v7985_v14 = vand.u32 4294901760, %v590_v13 }
 0x164   : > { %4991 = vmatmul.mubr.f32.gmra.mrb[72].mxu1 %v1048_v46  ;;  %v1077_v46 = vsub.f32 %v7941_v55, %v9504_v17  ;;  %v9599_v17 = vand.u32 4294901760, %v7503_v40  ;;  %v9510_v59 = vand.u32 4294901760, %v7983_v20  ;;  %v9601_v40 = vand.u32 4294901760, %v7521_v45 }
 0x165   : > { %4993 = vmatprep.mubr.msk.f32.mxu1 %vm6961_vm4, %v9538_v48 }
 0x166   : > { %5423 = vmatmul.mubr.f32.gmra.mrb[30].mxu0 %v9598_v35  ;;  %v593_v35 = vsel %vm462_vm8, %v456_v28, 0  ;;  %v8002_v28 = vsub.f32 %v590_v13, %v7985_v14  ;;  %v1088_v13 = vand.u32 4294901760, %v1087_v52  ;;  %v1097_v37 = vsub.f32 %v7983_v20, %v9510_v59 }
 0x167   : > { %5425 = vmatprep.mubr.msk.f32.mxu0 %vm6961_vm4, %v9538_v48  ;;  %v8004_v47 = vand.u32 4294901760, %v593_v35 }
 0x168   : > { %4994 = vmatmul.mubr.f32.gmra.mrb[74].mxu1 %v1058_v32  ;;  %v1078_v32 = vand.u32 4294901760, %v1077_v46  ;;  %v9513_v46 = vand.u32 4294901760, %v8002_v28 }
 0x169   : > { %4996 = vmatprep.mubr.msk.f32.mxu1 %vm6961_vm4, %v9538_v48  ;;  %9600 = vst [vmem:[#allocation44_spill] sm:$0xff] %v8004_v47  ;;  %v8023_v45 = vsub.f32 %v593_v35, %v8004_v47  ;;  %v1098_v35 = vand.u32 4294901760, %v1097_v37  ;;  %v9605_v47 = vand.u32 4294901760, %v7553_v51 }
 0x16a   : > { %5426 = vmatmul.mubr.f32.gmra.mrb[32].mxu0 %v9599_v17  ;;  %v458_v17 = vld [vmem:[%s9406_s3 + $0x168] sm:$0xff]  ;;  %v1107_v59 = vsub.f32 %v8002_v28, %v9513_v46 }
 0x16b   : > { %5428 = vmatprep.mubr.msk.f32.mxu0 %vm6961_vm4, %v9538_v48 }
 0x16c   : > { %4997 = vmatmul.mubr.f32.gmra.mrb[76].mxu1 %v1068_v29  ;;  %v8016_v29 = vand.u32 4294901760, %v596_v54  ;;  %v1108_v37 = vand.u32 4294901760, %v1107_v59  ;;  %v461_v59 = vld [vmem:[%s9406_s3 + $0x180] sm:$0xff] }
 0x16d   : > { %4999 = vmatprep.mubr.msk.f32.mxu1 %vm6961_vm4, %v9538_v48 }
 0x16e   : > { %5429 = vmatmul.mubr.f32.gmra.mrb[34].mxu0 %v9601_v40  ;;  %9602 = vst [vmem:[#allocation45_spill] sm:$0xff] %v8016_v29  ;;  %v599_v40 = vsel %vm462_vm8, %v458_v17, 0  ;;  %v8036_v52 = vsub.f32 %v596_v54, %v8016_v29  ;;  %v9516_v17 = vand.u32 4294901760, %v8023_v45  ;;  %v460_v54 = vld [vmem:[%s9406_s3 + $0x178] sm:$0xff]  ;;  %v9607_v29 = vand.u32 4294901760, %v7572_v33 }
 0x16f   : > { %5431 = vmatprep.mubr.msk.f32.mxu0 %vm6961_vm4, %v9538_v48  ;;  %v8042_v0 = vand.u32 4294901760, %v599_v40 }
 0x170   : > { %5000 = vmatmul.mubr.f32.gmra.mrb[78].mxu1 %v1078_v32  ;;  %v459_v32 = vld [vmem:[%s9406_s3 + $0x170] sm:$0xff]  ;;  %v1117_v46 = vsub.f32 %v8023_v45, %v9516_v17 }
 0x171   : > { %5002 = vmatprep.mubr.msk.f32.mxu1 %vm6961_vm4, %v9538_v48  ;;  %9604 = vst [vmem:[#allocation46_spill] sm:$0xff] %v8042_v0 }
 0x172   : > { %5432 = vmatmul.mubr.f32.gmra.mrb[36].mxu0 %v9603_v19  ;;  %v602_v19 = vsel %vm462_vm8, %v459_v32, 0  ;;  %v8059_v32 = vsub.f32 %v599_v40, %v8042_v0  ;;  %v9608_v0 = vand.u32 4294901760, %v7593_v57 }
 0x173   : > { %5434 = vmatprep.mubr.msk.f32.mxu0 %vm6961_vm4, %v9538_v48  ;;  %v8061_v51 = vand.u32 4294901760, %v602_v19 }
 0x174   : > { %5003 = vmatmul.mubr.f32.gmra.mrb[80].mxu1 %v1088_v13  ;;  %v9519_v13 = vand.u32 4294901760, %v8036_v52  ;;  %v9522_v17 = vand.u32 4294901760, %v8059_v32 }
 0x175   : > { %5005 = vmatprep.mubr.msk.f32.mxu1 %vm6961_vm4, %v9538_v48  ;;  %9606 = vst [vmem:[#allocation47_spill] sm:$0xff] %v8061_v51 }
 0x176   : > { %5435 = vmatmul.mubr.f32.gmra.mrb[38].mxu0 %v9605_v47  ;;  %v605_v47 = vsel %vm462_vm8, %v460_v54, 0  ;;  %v1127_v40 = vsub.f32 %v8036_v52, %v9519_v13  ;;  %v8078_v54 = vsub.f32 %v602_v19, %v8061_v51 }
 0x177   : > { %5437 = vmatprep.mubr.msk.f32.mxu0 %vm6961_vm4, %v9538_v48  ;;  %v8080_v33 = vand.u32 4294901760, %v605_v47 }
 0x178   : > { %5006 = vmatmul.mubr.f32.gmra.mrb[82].mxu1 %v1098_v35  ;;  %v1118_v35 = vand.u32 4294901760, %v1117_v46  ;;  %v1137_v46 = vsub.f32 %v8059_v32, %v9522_v17  ;;  %v1146_v19 = vand.u32 4294901760, %v8078_v54  ;;  %v9610_v17 = vand.u32 4294901760, %v7631_v27 }
 0x179   : > { %5008 = vmatprep.mubr.msk.f32.mxu1 %vm6961_vm4, %v9538_v48  ;;  %v8094_v13 = vsub.f32 %v605_v47, %v8080_v33 }
 0x17a   : > { %5438 = vmatmul.mubr.f32.gmra.mrb[40].mxu0 %v9607_v29  ;;  %v608_v29 = vsel %vm462_vm8, %v461_v59, 0  ;;  %v1138_v59 = vand.u32 4294901760, %v1137_v46 }
 0x17b   : > { %5440 = vmatprep.mubr.msk.f32.mxu0 %vm6961_vm4, %v9538_v48  ;;  %v8096_v51 = vand.u32 4294901760, %v608_v29  ;;  %v1156_v47 = vand.u32 4294901760, %v8094_v13 }
 0x17c   : > { %5009 = vmatmul.mubr.f32.gmra.mrb[84].mxu1 %v1108_v37  ;;  %v1128_v37 = vand.u32 4294901760, %v1127_v40  ;;  %v1147_v40 = vsub.f32 %v8078_v54, %v1146_v19 }
 0x17d   : > { %5011 = vmatprep.mubr.msk.f32.mxu1 %vm6961_vm4, %v9538_v48  ;;  %v1157_v46 = vsub.f32 %v8094_v13, %v1156_v47 }
 0x17e   : > { %5441 = vmatmul.mubr.f32.gmra.mrb[42].mxu0 %v9608_v0  ;;  %v9609_v0 = vand.u32 4294901760, %v7611_v53 }
 0x17f   : > { %5443 = vmatprep.mubr.msk.f32.mxu0 %vm6961_vm4, %v9538_v48 }
 0x180   : > { %5012 = vmatmul.mubr.f32.gmra.mrb[86].mxu1 %v1118_v35  ;;  %v8109_v35 = vsub.f32 %v608_v29, %v8096_v51  ;;  %v9611_v29 = vand.u32 4294901760, %v7643_v31 }
 0x181   : > { %5014 = vmatprep.mubr.msk.f32.mxu1 %vm6961_vm4, %v9538_v48 }
 0x182   : > { %5444 = vmatmul.mubr.f32.gmra.mrb[44].mxu0 %v9609_v0  ;;  %v1166_v0 = vand.u32 4294901760, %v8109_v35 }
 0x183   : > { %5446 = vmatprep.mubr.msk.f32.mxu0 %vm6961_vm4, %v9538_v48 }
 0x184   : > { %5015 = vmatmul.mubr.f32.gmra.mrb[88].mxu1 %v1128_v37  ;;  %v1148_v37 = vand.u32 4294901760, %v1147_v40  ;;  %v9612_v40 = vand.u32 4294901760, %v7662_v62 }
 0x185   : > { %5017 = vmatprep.mubr.msk.f32.mxu1 %vm6961_vm4, %v9538_v48 }
 0x186   : > { %5447 = vmatmul.mubr.f32.gmra.mrb[46].mxu0 %v9610_v17  ;;  %v1158_v17 = vand.u32 4294901760, %v1157_v46  ;;  %v9614_v46 = vand.u32 4294901760, %v7710_v18 }
 0x187   : > { %5449 = vmatprep.mubr.msk.f32.mxu0 %vm6961_vm4, %v9538_v48 }
 0x188   : > { %5018 = vmatmul.mubr.f32.gmra.mrb[90].mxu1 %v1138_v59  ;;  %v1167_v59 = vsub.f32 %v8109_v35, %v1166_v0 }
 0x189   : > { %5020 = vmatprep.mubr.msk.f32.mxu1 %vm6961_vm4, %v9538_v48 }
 0x18a   : > { %5450 = vmatmul.mubr.f32.gmra.mrb[48].mxu0 %v9611_v29  ;;  %v1168_v29 = vand.u32 4294901760, %v1167_v59  ;;  %v9620_v59 = vand.u32 4294901760, %v7833_v30 }
 0x18b   : > { %5452 = vmatprep.mubr.msk.f32.mxu0 %vm6961_vm4, %v9538_v48 }
 0x18c   : > { %5021 = vmatmul.mubr.f32.gmra.mrb[92].mxu1 %v1148_v37  ;;  %v9613_v37 = vand.u32 4294901760, %v7689_v25 }
 0x18d   : > { %5023 = vmatprep.mubr.msk.f32.mxu1 %vm6961_vm4, %v9538_v48 }
 0x18e   : > { %5453 = vmatmul.mubr.f32.gmra.mrb[50].mxu0 %v9612_v40  ;;  %v9622_v40 = vand.u32 4294901760, %v7866_v42 }
 0x18f   : > { %5455 = vmatprep.mubr.msk.f32.mxu0 %vm6961_vm4, %v9538_v48 }
 0x190   : > { %5024 = vmatmul.mubr.f32.gmra.mrb[94].mxu1 %v1158_v17  ;;  %v9615_v17 = vand.u32 4294901760, %v7733_v61 }
 0x191   : > { %5026 = vmatprep.mubr.msk.f32.mxu1 %vm6961_vm4, %v9538_v48 }
 0x192   : > { %5456 = vmatmul.mubr.f32.gmra.mrb[52].mxu0 %v9613_v37  ;;  %v9624_v37 = vand.u32 4294901760, %v7907_v36 }
 0x193   : > { %5458 = vmatprep.mubr.msk.f32.mxu0 %vm6961_vm4, %v9538_v48 }
 0x194   : > { %5027 = vmatmul.mubr.f32.gmra.mrb[96].mxu1 %v1168_v29  ;;  %v9623_v29 = vand.u32 4294901760, %v7888_v58 }
 0x195   : > { %5047 = vmatprep.mubr.msk.f32.mxu1 %vm6961_vm4, %v9538_v48 }
 0x196   : > { %5459 = vmatmul.mubr.f32.gmra.mrb[54].mxu0 %v9614_v46  ;;  %v9625_v46 = vand.u32 4294901760, %v7928_v21 }
 0x197   : > { %5461 = vmatprep.mubr.msk.f32.mxu0 %vm6961_vm4, %v9538_v48 }
 0x198   : > { %5048 = vmatmul.mubr.f32.vlgmr.msra.gmra.mrb[0].mxu1 %v7141_v16 }
 0x199   : > { %6285 = vmatpush3.bf16.msra.mxu1 %v7120_v4  ;;  %5050 = vmatprep.mubr.msk.f32.mxu1 %vm6961_vm4, %v9538_v48  ;;  %v9616_v4 = vand.u32 4294901760, %v7747_v11 }
 0x19a   : > { %5462 = vmatmul.mubr.f32.gmra.mrb[56].mxu0 %v9615_v17  ;;  %6281 = vmatprep.subr.bf16.mxu1 %v9569_v23  ;;  %v9626_v17 = vand.u32 4294901760, %v7941_v55 }
 0x19b   : > { %5464 = vmatprep.mubr.msk.f32.mxu0 %vm6961_vm4, %v9538_v48 }
 0x19c   : > { %5051 = vmatmul.mubr.f32.gmra.mrb[2].mxu1 %v7160_v26 }
 0x19d   : > { %6286 = vmatpush3.bf16.msra.mxu1 %v7138_v15  ;;  %5053 = vmatprep.mubr.msk.f32.mxu1 %vm6961_vm4, %v9538_v48  ;;  %v9617_v15 = vand.u32 4294901760, %v7770_v60 }
 0x19e   : > { %5465 = vmatmul.mubr.f32.gmra.mrb[58].mxu0 %v9616_v4  ;;  %6282 = vmatprep.subr.bf16.mxu1 %v9569_v23  ;;  %v9627_v4 = vand.u32 4294901760, %v7961_v22 }
 0x19f   : > { %5467 = vmatprep.mubr.msk.f32.mxu0 %vm6961_vm4, %v9538_v48 }
 0x1a0   : > { %5054 = vmatmul.mubr.f32.gmra.mrb[4].mxu1 %v7187_v44 }
 0x1a1   : > { %6287 = vmatpush3.bf16.msra.mxu1 %v7177_v39  ;;  %5056 = vmatprep.mubr.msk.f32.mxu1 %vm6961_vm4, %v9538_v48  ;;  %v9618_v39 = vand.u32 4294901760, %v7793_v7 }
 0x1a2   : > { %5468 = vmatmul.mubr.f32.gmra.mrb[60].mxu0 %v9617_v15  ;;  %6283 = vmatprep.subr.bf16.mxu1 %v9569_v23  ;;  %v9628_v15 = vld [vmem:[#allocation19_spill] sm:$0xff] }
 0x1a3   : > { %5470 = vmatprep.mubr.msk.f32.mxu0 %vm6961_vm4, %v9538_v48 }
 0x1a4   : > { %5057 = vmatmul.mubr.f32.gmra.mrb[6].mxu1 %v7216_v63 }
 0x1a5   : > { %6288 = vmatpush3.bf16.msra.mxu1 %v7231_v24  ;;  %5059 = vmatprep.mubr.msk.f32.mxu1 %vm6961_vm4, %v9538_v48  ;;  %v9619_v24 = vand.u32 4294901760, %v7812_v50 }
 0x1a6   : > { %5471 = vmatmul.mubr.f32.gmra.mrb[62].mxu0 %v9618_v39  ;;  %6284 = vmatprep.subr.mxu1 %v9538_v48  ;;  %v9629_v39 = vand.u32 4294901760, %v7983_v20 }
 0x1a7   : > { %5473 = vmatprep.mubr.msk.f32.mxu0 %vm6961_vm4, %v9538_v48 }
 0x1a8   : > { %5060 = vmatmul.mubr.f32.gmra.mrb[8].mxu1 %v7220_v10 }
 0x1a9   : > { %6289 = vmatpush3.msra.mxu1 %v7258_v2  ;;  %5062 = vmatprep.mubr.msk.f32.mxu1 %vm6961_vm4, %v9538_v48  ;;  %v9621_v2 = vand.u32 4294901760, %v7846_v34 }
 0x1aa   : > { %5474 = vmatmul.mubr.f32.gmra.mrb[64].mxu0 %v9619_v24  ;;  %6136 = vmatprep.subr.bf16.mxu1 %v9569_v23  ;;  %v9630_v24 = vld [vmem:[#allocation20_spill] sm:$0xff] }
 0x1ab   : > { %5476 = vmatprep.mubr.msk.f32.mxu0 %vm6961_vm4, %v9538_v48 }
 0x1ac   : > { %5063 = vmatmul.mubr.f32.gmra.mrb[10].mxu1 %v7251_v38 }
 0x1ad   : > { %5065 = vmatprep.mubr.msk.f32.mxu1 %vm6961_vm4, %v9538_v48 }
 0x1ae   : > { %5477 = vmatmul.mubr.f32.gmra.mrb[66].mxu0 %v9620_v59  ;;  %v9631_v59 = vand.u32 4294901760, %v8002_v28 }
 0x1af   : > { %5479 = vmatprep.mubr.msk.f32.mxu0 %vm6961_vm4, %v9538_v48 }
 0x1b0   : > { %5066 = vmatmul.mubr.f32.gmra.mrb[12].mxu1 %v7287_v9 }
 0x1b1   : > { %5068 = vmatprep.mubr.msk.f32.mxu1 %vm6961_vm4, %v9538_v48 }
 0x1b2   : > { %5480 = vmatmul.mubr.f32.gmra.mrb[68].mxu0 %v9621_v2  ;;  %v9632_v2 = vld [vmem:[#allocation21_spill] sm:$0xff] }
 0x1b3   : > { %5482 = vmatprep.mubr.msk.f32.mxu0 %vm6961_vm4, %v9538_v48 }
 0x1b4   : > { %5069 = vmatmul.mubr.f32.gmra.mrb[14].mxu1 %v7310_v41 }
 0x1b5   : > { %5071 = vmatprep.mubr.msk.f32.mxu1 %vm6961_vm4, %v9538_v48 }
 0x1b6   : > { %5483 = vmatmul.mubr.f32.gmra.mrb[70].mxu0 %v9622_v40  ;;  %v9633_v40 = vand.u32 4294901760, %v8023_v45 }
 0x1b7   : > { %5485 = vmatprep.mubr.msk.f32.mxu0 %vm6961_vm4, %v9538_v48 }
 0x1b8   : > { %5072 = vmatmul.mubr.f32.gmra.mrb[16].mxu1 %v7334_v56 }
 0x1b9   : > { %5074 = vmatprep.mubr.msk.f32.mxu1 %vm6961_vm4, %v9538_v48 }
 0x1ba   : > { %5486 = vmatmul.mubr.f32.gmra.mrb[72].mxu0 %v9623_v29  ;;  %v9634_v29 = vld [vmem:[#allocation22_spill] sm:$0xff] }
 0x1bb   : > { %5488 = vmatprep.mubr.msk.f32.mxu0 %vm6961_vm4, %v9538_v48 }
 0x1bc   : > { %5075 = vmatmul.mubr.f32.gmra.mrb[18].mxu1 %v7347_v1 }
 0x1bd   : > { %5077 = vmatprep.mubr.msk.f32.mxu1 %vm6961_vm4, %v9538_v48 }
 0x1be   : > { %5489 = vmatmul.mubr.f32.gmra.mrb[74].mxu0 %v9624_v37  ;;  %v9635_v37 = vand.u32 4294901760, %v8036_v52 }
 0x1bf   : > { %5491 = vmatprep.mubr.msk.f32.mxu0 %vm6961_vm4, %v9538_v48 }
 0x1c0   : > { %5078 = vmatmul.mubr.f32.gmra.mrb[20].mxu1 %v7371_v5 }
 0x1c1   : > { %5080 = vmatprep.mubr.msk.f32.mxu1 %vm6961_vm4, %v9538_v48 }
 0x1c2   : > { %5492 = vmatmul.mubr.f32.gmra.mrb[76].mxu0 %v9625_v46  ;;  %v9636_v46 = vld [vmem:[#allocation23_spill] sm:$0xff] }
 0x1c3   : > { %5494 = vmatprep.mubr.msk.f32.mxu0 %vm6961_vm4, %v9538_v48 }
 0x1c4   : > { %5081 = vmatmul.mubr.f32.gmra.mrb[22].mxu1 %v7397_v3 }
 0x1c5   : > { %5083 = vmatprep.mubr.msk.f32.mxu1 %vm6961_vm4, %v9538_v48 }
 0x1c6   : > { %5495 = vmatmul.mubr.f32.gmra.mrb[78].mxu0 %v9626_v17  ;;  %v9637_v17 = vand.u32 4294901760, %v8059_v32 }
 0x1c7   : > { %5497 = vmatprep.mubr.msk.f32.mxu0 %vm6961_vm4, %v9538_v48 }
 0x1c8   : > { %5084 = vmatmul.mubr.f32.gmra.mrb[24].mxu1 %v7415_v49 }
 0x1c9   : > { %5086 = vmatprep.mubr.msk.f32.mxu1 %vm6961_vm4, %v9538_v48 }
 0x1ca   : > { %5498 = vmatmul.mubr.f32.gmra.mrb[80].mxu0 %v9627_v4  ;;  %v9638_v4 = vld [vmem:[#allocation24_spill] sm:$0xff] }
 0x1cb   : > { %5500 = vmatprep.mubr.msk.f32.mxu0 %vm6961_vm4, %v9538_v48 }
 0x1cc   : > { %5087 = vmatmul.mubr.f32.gmra.mrb[26].mxu1 %v9628_v15 }
 0x1cd   : > { %5089 = vmatprep.mubr.msk.f32.mxu1 %vm6961_vm4, %v9538_v48 }
 0x1ce   : > { %5501 = vmatmul.mubr.f32.gmra.mrb[82].mxu0 %v9629_v39  ;;  %v9639_v39 = vld [vmem:[#allocation25_spill] sm:$0xff] }
 0x1cf   : > { %5503 = vmatprep.mubr.msk.f32.mxu0 %vm6961_vm4, %v9538_v48 }
 0x1d0   : > { %5090 = vmatmul.mubr.f32.gmra.mrb[28].mxu1 %v9630_v24 }
 0x1d1   : > { %5092 = vmatprep.mubr.msk.f32.mxu1 %vm6961_vm4, %v9538_v48 }
 0x1d2   : > { %5504 = vmatmul.mubr.f32.gmra.mrb[84].mxu0 %v9631_v59  ;;  %v9640_v59 = vld [vmem:[#allocation26_spill] sm:$0xff] }
 0x1d3   : > { %5506 = vmatprep.mubr.msk.f32.mxu0 %vm6961_vm4, %v9538_v48 }
 0x1d4   : > { %5093 = vmatmul.mubr.f32.gmra.mrb[30].mxu1 %v9632_v2 }
 0x1d5   : > { %5095 = vmatprep.mubr.msk.f32.mxu1 %vm6961_vm4, %v9538_v48 }
 0x1d6   : > { %5507 = vmatmul.mubr.f32.gmra.mrb[86].mxu0 %v9633_v40  ;;  %v9643_v40 = vld [vmem:[#allocation28_spill] sm:$0xff] }
 0x1d7   : > { %5509 = vmatprep.mubr.msk.f32.mxu0 %vm6961_vm4, %v9538_v48 }
 0x1d8   : > { %5096 = vmatmul.mubr.f32.gmra.mrb[32].mxu1 %v9634_v29 }
 0x1d9   : > { %5098 = vmatprep.mubr.msk.f32.mxu1 %vm6961_vm4, %v9538_v48 }
 0x1da   : > { %5510 = vmatmul.mubr.f32.gmra.mrb[88].mxu0 %v9635_v37  ;;  %v9645_v37 = vld [vmem:[#allocation29_spill] sm:$0xff] }
 0x1db   : > { %5512 = vmatprep.mubr.msk.f32.mxu0 %vm6961_vm4, %v9538_v48 }
 0x1dc   : > { %5099 = vmatmul.mubr.f32.gmra.mrb[34].mxu1 %v9636_v46 }
 0x1dd   : > { %5101 = vmatprep.mubr.msk.f32.mxu1 %vm6961_vm4, %v9538_v48 }
 0x1de   : > { %5513 = vmatmul.mubr.f32.gmra.mrb[90].mxu0 %v9637_v17  ;;  %v9646_v17 = vld [vmem:[#allocation11_spill] sm:$0xff] }
 0x1df   : > { %5515 = vmatprep.mubr.msk.f32.mxu0 %vm6961_vm4, %v9538_v48 }
 0x1e0   : > { %5102 = vmatmul.mubr.f32.gmra.mrb[36].mxu1 %v9638_v4 }
 0x1e1   : > { %5104 = vmatprep.mubr.msk.f32.mxu1 %vm6961_vm4, %v9538_v48 }
 0x1e2   : > { %5516 = vmatmul.mubr.f32.gmra.mrb[92].mxu0 %v1146_v19  ;;  %v9641_v19 = vld [vmem:[#allocation27_spill] sm:$0xff] }
 0x1e3   : > { %5518 = vmatprep.mubr.msk.f32.mxu0 %vm6961_vm4, %v9538_v48 }
 0x1e4   : > { %5105 = vmatmul.mubr.f32.gmra.mrb[38].mxu1 %v9639_v39 }
 0x1e5   : > { %5107 = vmatprep.mubr.msk.f32.mxu1 %vm6961_vm4, %v9538_v48 }
 0x1e6   : > { %5519 = vmatmul.mubr.f32.gmra.mrb[94].mxu0 %v1156_v47  ;;  %v9642_v47 = vld [vmem:[#allocation9_spill] sm:$0xff] }
 0x1e7   : > { %5521 = vmatprep.mubr.msk.f32.mxu0 %vm6961_vm4, %v9538_v48 }
 0x1e8   : > { %5108 = vmatmul.mubr.f32.gmra.mrb[40].mxu1 %v9640_v59 }
 0x1e9   : > { %5110 = vmatprep.mubr.msk.f32.mxu1 %vm6961_vm4, %v9538_v48 }
 0x1ea   : > { %5522 = vmatmul.mubr.f32.gmra.mrb[96].mxu0 %v1166_v0  ;;  %v9644_v0 = vld [vmem:[#allocation10_spill] sm:$0xff] }
 0x1eb   : > { %5542 = vmatprep.mubr.msk.f32.mxu0 %vm6961_vm4, %v9538_v48 }
 0x1ec   : > { %5111 = vmatmul.mubr.f32.gmra.mrb[42].mxu1 %v9641_v19 }
 0x1ed   : > { %5113 = vmatprep.mubr.msk.f32.mxu1 %vm6961_vm4, %v9538_v48 }
 0x1ee   : > { %5543 = vmatmul.mubr.f32.vlgmr.msra.gmra.mrb[0].mxu0 %v7141_v16 }
 0x1ef   : > { %6126 = vmatpush3.bf16.msra.mxu0 %v9642_v47  ;;  %5545 = vmatprep.mubr.msk.f32.mxu0 %vm6961_vm4, %v9538_v48  ;;  %v9647_v47 = vld [vmem:[#allocation30_spill] sm:$0xff] }
 0x1f0   : > { %5114 = vmatmul.mubr.f32.gmra.mrb[44].mxu1 %v9643_v40  ;;  %6127 = vmatprep.subr.bf16.mxu0 %v9569_v23 }
 0x1f1   : > { %5116 = vmatprep.mubr.msk.f32.mxu1 %vm6961_vm4, %v9538_v48 }
 0x1f2   : > { %5546 = vmatmul.mubr.f32.gmra.mrb[2].mxu0 %v7160_v26 }
 0x1f3   : > { %6129 = vmatpush3.bf16.msra.mxu0 %v9644_v0  ;;  %5548 = vmatprep.mubr.msk.f32.mxu0 %vm6961_vm4, %v9538_v48  ;;  %v9648_v0 = vld [vmem:[#allocation12_spill] sm:$0xff] }
 0x1f4   : > { %5117 = vmatmul.mubr.f32.gmra.mrb[46].mxu1 %v9645_v37  ;;  %6130 = vmatprep.subr.bf16.mxu0 %v9569_v23 }
 0x1f5   : > { %5119 = vmatprep.mubr.msk.f32.mxu1 %vm6961_vm4, %v9538_v48 }
 0x1f6   : > { %5549 = vmatmul.mubr.f32.gmra.mrb[4].mxu0 %v7187_v44 }
 0x1f7   : > { %6132 = vmatpush3.bf16.msra.mxu0 %v9646_v17  ;;  %5551 = vmatprep.mubr.msk.f32.mxu0 %vm6961_vm4, %v9538_v48  ;;  %v9649_v17 = vld [vmem:[#allocation13_spill] sm:$0xff] }
 0x1f8   : > { %5120 = vmatmul.mubr.f32.gmra.mrb[48].mxu1 %v9647_v47  ;;  %6133 = vmatprep.subr.bf16.mxu0 %v9569_v23  ;;  %v9652_v23 = vld [vmem:[#allocation33_spill] sm:$0xff] }
 0x1f9   : > { %5122 = vmatprep.mubr.msk.f32.mxu1 %vm6961_vm4, %v9538_v48 }
 0x1fa   : > { %5552 = vmatmul.mubr.f32.gmra.mrb[6].mxu0 %v7216_v63 }
 0x1fb   : > { %6135 = vmatpush3.bf16.msra.mxu0 %v9648_v0  ;;  %5554 = vmatprep.mubr.msk.f32.mxu0 %vm6961_vm4, %v9538_v48  ;;  %v9650_v0 = vld [vmem:[#allocation31_spill] sm:$0xff] }
 0x1fc   : > { %5123 = vmatmul.mubr.f32.gmra.mrb[50].mxu1 %v7645_v6  ;;  %5705 = vmatprep.subr.mxu0 %v9538_v48 }
 0x1fd   : > { %5125 = vmatprep.mubr.msk.f32.mxu1 %vm6961_vm4, %v9538_v48 }
 0x1fe   : > { %5555 = vmatmul.mubr.f32.gmra.mrb[8].mxu0 %v7220_v10 }
 0x1ff   : > { %5706 = vmatpush3.msra.mxu0 %v9649_v17  ;;  %5557 = vmatprep.mubr.msk.f32.mxu0 %vm6961_vm4, %v9538_v48  ;;  %v9651_v17 = vld [vmem:[#allocation32_spill] sm:$0xff] }
 0x200   : > { %5126 = vmatmul.mubr.f32.gmra.mrb[52].mxu1 %v7667_v12 }
 0x201   : > { %5128 = vmatprep.mubr.msk.f32.mxu1 %vm6961_vm4, %v9538_v48 }
 0x202   : > { %5558 = vmatmul.mubr.f32.gmra.mrb[10].mxu0 %v7251_v38 }
 0x203   : > { %5560 = vmatprep.mubr.msk.f32.mxu0 %vm6961_vm4, %v9538_v48 }
 0x204   : > { %5129 = vmatmul.mubr.f32.gmra.mrb[54].mxu1 %v7691_v8 }
 0x205   : > { %5131 = vmatprep.mubr.msk.f32.mxu1 %vm6961_vm4, %v9538_v48 }
 0x206   : > { %5561 = vmatmul.mubr.f32.gmra.mrb[12].mxu0 %v7287_v9 }
 0x207   : > { %5563 = vmatprep.mubr.msk.f32.mxu0 %vm6961_vm4, %v9538_v48 }
 0x208   : > { %5132 = vmatmul.mubr.f32.gmra.mrb[56].mxu1 %v7712_v43 }
 0x209   : > { %5134 = vmatprep.mubr.msk.f32.mxu1 %vm6961_vm4, %v9538_v48 }
 0x20a   : > { %5564 = vmatmul.mubr.f32.gmra.mrb[14].mxu0 %v7310_v41 }
 0x20b   : > { %5566 = vmatprep.mubr.msk.f32.mxu0 %vm6961_vm4, %v9538_v48 }
 0x20c   : > { %5135 = vmatmul.mubr.f32.gmra.mrb[58].mxu1 %v9650_v0 }
 0x20d   : > { %5137 = vmatprep.mubr.msk.f32.mxu1 %vm6961_vm4, %v9538_v48 }
 0x20e   : > { %5567 = vmatmul.mubr.f32.gmra.mrb[16].mxu0 %v7334_v56  ;;  %v9653_v56 = vld [vmem:[#allocation34_spill] sm:$0xff] }
 0x20f   : > { %5569 = vmatprep.mubr.msk.f32.mxu0 %vm6961_vm4, %v9538_v48 }
 0x210   : > { %5138 = vmatmul.mubr.f32.gmra.mrb[60].mxu1 %v9651_v17 }
 0x211   : > { %5140 = vmatprep.mubr.msk.f32.mxu1 %vm6961_vm4, %v9538_v48 }
 0x212   : > { %5570 = vmatmul.mubr.f32.gmra.mrb[18].mxu0 %v7347_v1  ;;  %v9654_v1 = vld [vmem:[#allocation35_spill] sm:$0xff] }
 0x213   : > { %5572 = vmatprep.mubr.msk.f32.mxu0 %vm6961_vm4, %v9538_v48 }
 0x214   : > { %5141 = vmatmul.mubr.f32.gmra.mrb[62].mxu1 %v9652_v23 }
 0x215   : > { %5143 = vmatprep.mubr.msk.f32.mxu1 %vm6961_vm4, %v9538_v48 }
 0x216   : > { %5573 = vmatmul.mubr.f32.gmra.mrb[20].mxu0 %v7371_v5  ;;  %v9655_v5 = vld [vmem:[#allocation36_spill] sm:$0xff] }
 0x217   : > { %5575 = vmatprep.mubr.msk.f32.mxu0 %vm6961_vm4, %v9538_v48 }
 0x218   : > { %5144 = vmatmul.mubr.f32.gmra.mrb[64].mxu1 %v9653_v56 }
 0x219   : > { %5146 = vmatprep.mubr.msk.f32.mxu1 %vm6961_vm4, %v9538_v48 }
 0x21a   : > { %5576 = vmatmul.mubr.f32.gmra.mrb[22].mxu0 %v7397_v3  ;;  %v9656_v3 = vld [vmem:[#allocation37_spill] sm:$0xff] }
 0x21b   : > { %5578 = vmatprep.mubr.msk.f32.mxu0 %vm6961_vm4, %v9538_v48 }
 0x21c   : > { %5147 = vmatmul.mubr.f32.gmra.mrb[66].mxu1 %v9654_v1 }
 0x21d   : > { %5149 = vmatprep.mubr.msk.f32.mxu1 %vm6961_vm4, %v9538_v48 }
 0x21e   : > { %5579 = vmatmul.mubr.f32.gmra.mrb[24].mxu0 %v7415_v49  ;;  %v9657_v49 = vld [vmem:[#allocation38_spill] sm:$0xff] }
 0x21f   : > { %5581 = vmatprep.mubr.msk.f32.mxu0 %vm6961_vm4, %v9538_v48 }
 0x220   : > { %5150 = vmatmul.mubr.f32.gmra.mrb[68].mxu1 %v9655_v5 }
 0x221   : > { %5152 = vmatprep.mubr.msk.f32.mxu1 %vm6961_vm4, %v9538_v48 }
 0x222   : > { %5582 = vmatmul.mubr.f32.gmra.mrb[26].mxu0 %v9628_v15  ;;  %v9658_v15 = vld [vmem:[#allocation39_spill] sm:$0xff] }
 0x223   : > { %5584 = vmatprep.mubr.msk.f32.mxu0 %vm6961_vm4, %v9538_v48 }
 0x224   : > { %5153 = vmatmul.mubr.f32.gmra.mrb[70].mxu1 %v9656_v3 }
 0x225   : > { %5155 = vmatprep.mubr.msk.f32.mxu1 %vm6961_vm4, %v9538_v48 }
 0x226   : > { %5585 = vmatmul.mubr.f32.gmra.mrb[28].mxu0 %v9630_v24  ;;  %v9659_v24 = vld [vmem:[#allocation40_spill] sm:$0xff] }
 0x227   : > { %5587 = vmatprep.mubr.msk.f32.mxu0 %vm6961_vm4, %v9538_v48 }
 0x228   : > { %5156 = vmatmul.mubr.f32.gmra.mrb[72].mxu1 %v9657_v49 }
 0x229   : > { %5158 = vmatprep.mubr.msk.f32.mxu1 %vm6961_vm4, %v9538_v48 }
 0x22a   : > { %5588 = vmatmul.mubr.f32.gmra.mrb[30].mxu0 %v9632_v2  ;;  %v9660_v2 = vld [vmem:[#allocation41_spill] sm:$0xff] }
 0x22b   : > { %5590 = vmatprep.mubr.msk.f32.mxu0 %vm6961_vm4, %v9538_v48 }
 0x22c   : > { %5159 = vmatmul.mubr.f32.gmra.mrb[74].mxu1 %v9658_v15 }
 0x22d   : > { %5161 = vmatprep.mubr.msk.f32.mxu1 %vm6961_vm4, %v9538_v48 }
 0x22e   : > { %5591 = vmatmul.mubr.f32.gmra.mrb[32].mxu0 %v9634_v29  ;;  %v9661_v29 = vld [vmem:[#allocation42_spill] sm:$0xff] }
 0x22f   : > { %5593 = vmatprep.mubr.msk.f32.mxu0 %vm6961_vm4, %v9538_v48 }
 0x230   : > { %5162 = vmatmul.mubr.f32.gmra.mrb[76].mxu1 %v9659_v24 }
 0x231   : > { %5164 = vmatprep.mubr.msk.f32.mxu1 %vm6961_vm4, %v9538_v48 }
 0x232   : > { %5594 = vmatmul.mubr.f32.gmra.mrb[34].mxu0 %v9636_v46  ;;  %v9662_v46 = vld [vmem:[#allocation43_spill] sm:$0xff] }
 0x233   : > { %5596 = vmatprep.mubr.msk.f32.mxu0 %vm6961_vm4, %v9538_v48 }
 0x234   : > { %5165 = vmatmul.mubr.f32.gmra.mrb[78].mxu1 %v9660_v2 }
 0x235   : > { %5167 = vmatprep.mubr.msk.f32.mxu1 %vm6961_vm4, %v9538_v48 }
 0x236   : > { %5597 = vmatmul.mubr.f32.gmra.mrb[36].mxu0 %v9638_v4 }
 0x237   : > { %5599 = vmatprep.mubr.msk.f32.mxu0 %vm6961_vm4, %v9538_v48 }
 0x238   : > { %5168 = vmatmul.mubr.f32.gmra.mrb[80].mxu1 %v9661_v29 }
 0x239   : > { %5170 = vmatprep.mubr.msk.f32.mxu1 %vm6961_vm4, %v9538_v48 }
 0x23a   : > { %5600 = vmatmul.mubr.f32.gmra.mrb[38].mxu0 %v9639_v39  ;;  %v9663_v39 = vld [vmem:[#allocation44_spill] sm:$0xff] }
 0x23b   : > { %5602 = vmatprep.mubr.msk.f32.mxu0 %vm6961_vm4, %v9538_v48 }
 0x23c   : > { %5171 = vmatmul.mubr.f32.gmra.mrb[82].mxu1 %v9662_v46 }
 0x23d   : > { %5173 = vmatprep.mubr.msk.f32.mxu1 %vm6961_vm4, %v9538_v48 }
 0x23e   : > { %5603 = vmatmul.mubr.f32.gmra.mrb[40].mxu0 %v9640_v59  ;;  %v9664_v59 = vld [vmem:[#allocation45_spill] sm:$0xff] }
 0x23f   : > { %5605 = vmatprep.mubr.msk.f32.mxu0 %vm6961_vm4, %v9538_v48 }
 0x240   : > { %5174 = vmatmul.mubr.f32.gmra.mrb[84].mxu1 %v7985_v14 }
 0x241   : > { %5176 = vmatprep.mubr.msk.f32.mxu1 %vm6961_vm4, %v9538_v48 }
 0x242   : > { %5606 = vmatmul.mubr.f32.gmra.mrb[42].mxu0 %v9641_v19  ;;  %v9665_v19 = vld [vmem:[#allocation46_spill] sm:$0xff] }
 0x243   : > { %5608 = vmatprep.mubr.msk.f32.mxu0 %vm6961_vm4, %v9538_v48 }
 0x244   : > { %5177 = vmatmul.mubr.f32.gmra.mrb[86].mxu1 %v9663_v39 }
 0x245   : > { %5179 = vmatprep.mubr.msk.f32.mxu1 %vm6961_vm4, %v9538_v48 }
 0x246   : > { %5609 = vmatmul.mubr.f32.gmra.mrb[44].mxu0 %v9643_v40  ;;  %v9666_v40 = vld [vmem:[#allocation47_spill] sm:$0xff] }
 0x247   : > { %5611 = vmatprep.mubr.msk.f32.mxu0 %vm6961_vm4, %v9538_v48 }
 0x248   : > { %5180 = vmatmul.mubr.f32.gmra.mrb[88].mxu1 %v9664_v59 }
 0x249   : > { %5182 = vmatprep.mubr.msk.f32.mxu1 %vm6961_vm4, %v9538_v48 }
 0x24a   : > { %5612 = vmatmul.mubr.f32.gmra.mrb[46].mxu0 %v9645_v37 }
 0x24b   : > { %5614 = vmatprep.mubr.msk.f32.mxu0 %vm6961_vm4, %v9538_v48 }
 0x24c   : > { %5183 = vmatmul.mubr.f32.gmra.mrb[90].mxu1 %v9665_v19 }
 0x24d   : > { %5185 = vmatprep.mubr.msk.f32.mxu1 %vm6961_vm4, %v9538_v48 }
 0x24e   : > { %5615 = vmatmul.mubr.f32.gmra.mrb[48].mxu0 %v9647_v47 }
 0x24f   : > { %5617 = vmatprep.mubr.msk.f32.mxu0 %vm6961_vm4, %v9538_v48 }
 0x250   : > { %5186 = vmatmul.mubr.f32.gmra.mrb[92].mxu1 %v9666_v40 }
 0x251   : > { %5188 = vmatprep.mubr.msk.f32.mxu1 %vm6961_vm4, %v9538_v48 }
 0x252   : > { %5618 = vmatmul.mubr.f32.gmra.mrb[50].mxu0 %v7645_v6 }
 0x253   : > { %5620 = vmatprep.mubr.msk.f32.mxu0 %vm6961_vm4, %v9538_v48 }
 0x254   : > { %5189 = vmatmul.mubr.f32.gmra.mrb[94].mxu1 %v8080_v33 }
 0x255   : > { %5191 = vmatprep.mubr.msk.f32.mxu1 %vm6961_vm4, %v9538_v48 }
 0x256   : > { %5621 = vmatmul.mubr.f32.gmra.mrb[52].mxu0 %v7667_v12 }
 0x257   : > { %5623 = vmatprep.mubr.msk.f32.mxu0 %vm6961_vm4, %v9538_v48 }
 0x258   : > { %5192 = vmatmul.mubr.f32.gmra.mrb[96].mxu1 %v8096_v51 }
 0x259   : > { %5275 = vmatprep.mubr.msk.f32.mxu1 %vm6961_vm4, %v9538_v48 }
 0x25a   : > { %5624 = vmatmul.mubr.f32.gmra.mrb[54].mxu0 %v7691_v8 }
 0x25b   : > { %5626 = vmatprep.mubr.msk.f32.mxu0 %vm6961_vm4, %v9538_v48 }
 0x25c   : > { %5276 = vmatmul.mubr.f32.vlgmr.msra.gmra.mrb[42].mxu1 %v7593_v57 }
 0x25d   : > { %5278 = vmatprep.mubr.msk.f32.mxu1 %vm6961_vm4, %v9538_v48 }
 0x25e   : > { %5627 = vmatmul.mubr.f32.gmra.mrb[56].mxu0 %v7712_v43 }
 0x25f   : > { %5629 = vmatprep.mubr.msk.f32.mxu0 %vm6961_vm4, %v9538_v48 }
 0x260   : > { %5279 = vmatmul.mubr.f32.gmra.mrb[44].mxu1 %v7611_v53 }
 0x261   : > { %5281 = vmatprep.mubr.msk.f32.mxu1 %vm6961_vm4, %v9538_v48 }
 0x262   : > { %5630 = vmatmul.mubr.f32.gmra.mrb[58].mxu0 %v9650_v0 }
 0x263   : > { %5632 = vmatprep.mubr.msk.f32.mxu0 %vm6961_vm4, %v9538_v48 }
 0x264   : > { %5282 = vmatmul.mubr.f32.gmra.mrb[46].mxu1 %v7631_v27 }
 0x265   : > { %5284 = vmatprep.mubr.msk.f32.mxu1 %vm6961_vm4, %v9538_v48 }
 0x266   : > { %5633 = vmatmul.mubr.f32.gmra.mrb[60].mxu0 %v9651_v17 }
 0x267   : > { %5635 = vmatprep.mubr.msk.f32.mxu0 %vm6961_vm4, %v9538_v48 }
 0x268   : > { %5285 = vmatmul.mubr.f32.gmra.mrb[48].mxu1 %v7643_v31 }
 0x269   : > { %5287 = vmatprep.mubr.msk.f32.mxu1 %vm6961_vm4, %v9538_v48 }
 0x26a   : > { %5636 = vmatmul.mubr.f32.gmra.mrb[62].mxu0 %v9652_v23 }
 0x26b   : > { %v8504_v57 = vpop.f32.mrb[0].mxu1  ;;  %5638 = vmatprep.mubr.msk.f32.mxu0 %vm6961_vm4, %v9538_v48 }
 0x26c   : > { %v5049_v53 = vpop.f32.mrb[1].mxu1  ;;  %5288 = vmatmul.mubr.f32.gmra.mrb[50].mxu1 %v7662_v62 }
 0x26d   : > { %5290 = vmatprep.mubr.msk.f32.mxu1 %vm6961_vm4, %v9538_v48 }
 0x26e   : > { %5639 = vmatmul.mubr.f32.gmra.mrb[64].mxu0 %v9653_v56 }
 0x26f   : > { %v8512_v27 = vpop.f32.mrb[2].mxu1  ;;  %5641 = vmatprep.mubr.msk.f32.mxu0 %vm6961_vm4, %v9538_v48 }
 0x270   : > { %v5052_v31 = vpop.f32.mrb[3].mxu1  ;;  %5291 = vmatmul.mubr.f32.gmra.mrb[52].mxu1 %v7689_v25 }
 0x271   : > { %5293 = vmatprep.mubr.msk.f32.mxu1 %vm6961_vm4, %v9538_v48 }
 0x272   : > { %5642 = vmatmul.mubr.f32.gmra.mrb[66].mxu0 %v9654_v1 }
 0x273   : > { %v8520_v53 = vpop.f32.mrb[4].mxu1  ;;  %5644 = vmatprep.mubr.msk.f32.mxu0 %vm6961_vm4, %v9538_v48 }
 0x274   : > { %v5055_v62 = vpop.f32.mrb[5].mxu1  ;;  %5294 = vmatmul.mubr.f32.gmra.mrb[54].mxu1 %v7710_v18 }
 0x275   : > { %5296 = vmatprep.mubr.msk.f32.mxu1 %vm6961_vm4, %v9538_v48 }
 0x276   : > { %5645 = vmatmul.mubr.f32.gmra.mrb[68].mxu0 %v9655_v5 }
 0x277   : > { %v8528_v31 = vpop.f32.mrb[6].mxu1  ;;  %5647 = vmatprep.mubr.msk.f32.mxu0 %vm6961_vm4, %v9538_v48 }
 0x278   : > { %v5058_v25 = vpop.f32.mrb[7].mxu1  ;;  %5297 = vmatmul.mubr.f32.gmra.mrb[56].mxu1 %v7733_v61 }
 0x279   : > { %5299 = vmatprep.mubr.msk.f32.mxu1 %vm6961_vm4, %v9538_v48 }
 0x27a   : > { %5648 = vmatmul.mubr.f32.gmra.mrb[70].mxu0 %v9656_v3 }
 0x27b   : > { %v8536_v62 = vpop.f32.mrb[8].mxu1  ;;  %5650 = vmatprep.mubr.msk.f32.mxu0 %vm6961_vm4, %v9538_v48 }
 0x27c   : > { %v5061_v18 = vpop.f32.mrb[9].mxu1  ;;  %5300 = vmatmul.mubr.f32.gmra.mrb[58].mxu1 %v7747_v11 }
 0x27d   : > { %5302 = vmatprep.mubr.msk.f32.mxu1 %vm6961_vm4, %v9538_v48 }
 0x27e   : > { %5651 = vmatmul.mubr.f32.gmra.mrb[72].mxu0 %v9657_v49 }
 0x27f   : > { %v8544_v25 = vpop.f32.mrb[10].mxu1  ;;  %5653 = vmatprep.mubr.msk.f32.mxu0 %vm6961_vm4, %v9538_v48 }
 0x280   : > { %v5064_v61 = vpop.f32.mrb[11].mxu1  ;;  %5303 = vmatmul.mubr.f32.gmra.mrb[60].mxu1 %v7770_v60 }
 0x281   : > { %5305 = vmatprep.mubr.msk.f32.mxu1 %vm6961_vm4, %v9538_v48 }
 0x282   : > { %5654 = vmatmul.mubr.f32.gmra.mrb[74].mxu0 %v9658_v15 }
 0x283   : > { %v8552_v18 = vpop.f32.mrb[12].mxu1  ;;  %5656 = vmatprep.mubr.msk.f32.mxu0 %vm6961_vm4, %v9538_v48 }
 0x284   : > { %v5067_v11 = vpop.f32.mrb[13].mxu1  ;;  %5306 = vmatmul.mubr.f32.gmra.mrb[62].mxu1 %v7793_v7 }
 0x285   : > { %5308 = vmatprep.mubr.msk.f32.mxu1 %vm6961_vm4, %v9538_v48 }
 0x286   : > { %5657 = vmatmul.mubr.f32.gmra.mrb[76].mxu0 %v9659_v24 }
 0x287   : > { %v8560_v61 = vpop.f32.mrb[14].mxu1  ;;  %5659 = vmatprep.mubr.msk.f32.mxu0 %vm6961_vm4, %v9538_v48 }
 0x288   : > { %v5070_v60 = vpop.f32.mrb[15].mxu1  ;;  %5309 = vmatmul.mubr.f32.gmra.mrb[64].mxu1 %v7812_v50 }
 0x289   : > { %5311 = vmatprep.mubr.msk.f32.mxu1 %vm6961_vm4, %v9538_v48 }
 0x28a   : > { %5660 = vmatmul.mubr.f32.gmra.mrb[78].mxu0 %v9660_v2 }
 0x28b   : > { %v8568_v11 = vpop.f32.mrb[16].mxu1  ;;  %5662 = vmatprep.mubr.msk.f32.mxu0 %vm6961_vm4, %v9538_v48 }
 0x28c   : > { %v5073_v7 = vpop.f32.mrb[17].mxu1  ;;  %5312 = vmatmul.mubr.f32.gmra.mrb[66].mxu1 %v7833_v30 }
 0x28d   : > { %5314 = vmatprep.mubr.msk.f32.mxu1 %vm6961_vm4, %v9538_v48 }
 0x28e   : > { %5663 = vmatmul.mubr.f32.gmra.mrb[80].mxu0 %v9661_v29 }
 0x28f   : > { %v8576_v60 = vpop.f32.mrb[18].mxu1  ;;  %5665 = vmatprep.mubr.msk.f32.mxu0 %vm6961_vm4, %v9538_v48 }
 0x290   : > { %v5076_v50 = vpop.f32.mrb[19].mxu1  ;;  %5315 = vmatmul.mubr.f32.gmra.mrb[68].mxu1 %v7846_v34 }
 0x291   : > { %5317 = vmatprep.mubr.msk.f32.mxu1 %vm6961_vm4, %v9538_v48 }
 0x292   : > { %5666 = vmatmul.mubr.f32.gmra.mrb[82].mxu0 %v9662_v46 }
 0x293   : > { %v8584_v7 = vpop.f32.mrb[20].mxu1  ;;  %5668 = vmatprep.mubr.msk.f32.mxu0 %vm6961_vm4, %v9538_v48 }
 0x294   : > { %v5079_v30 = vpop.f32.mrb[21].mxu1  ;;  %5318 = vmatmul.mubr.f32.gmra.mrb[70].mxu1 %v7866_v42 }
 0x295   : > { %5320 = vmatprep.mubr.msk.f32.mxu1 %vm6961_vm4, %v9538_v48 }
 0x296   : > { %5669 = vmatmul.mubr.f32.gmra.mrb[84].mxu0 %v7985_v14 }
 0x297   : > { %v8592_v50 = vpop.f32.mrb[22].mxu1  ;;  %5671 = vmatprep.mubr.msk.f32.mxu0 %vm6961_vm4, %v9538_v48 }
 0x298   : > { %v5082_v34 = vpop.f32.mrb[23].mxu1  ;;  %5321 = vmatmul.mubr.f32.gmra.mrb[72].mxu1 %v7888_v58 }
 0x299   : > { %5323 = vmatprep.mubr.msk.f32.mxu1 %vm6961_vm4, %v9538_v48 }
 0x29a   : > { %5672 = vmatmul.mubr.f32.gmra.mrb[86].mxu0 %v9663_v39 }
 0x29b   : > { %v8600_v30 = vpop.f32.mrb[24].mxu1  ;;  %5674 = vmatprep.mubr.msk.f32.mxu0 %vm6961_vm4, %v9538_v48 }
 0x29c   : > { %v5085_v42 = vpop.f32.mrb[25].mxu1  ;;  %5324 = vmatmul.mubr.f32.gmra.mrb[74].mxu1 %v7907_v36 }
 0x29d   : > { %5326 = vmatprep.mubr.msk.f32.mxu1 %vm6961_vm4, %v9538_v48 }
 0x29e   : > { %5675 = vmatmul.mubr.f32.gmra.mrb[88].mxu0 %v9664_v59 }
 0x29f   : > { %v8608_v34 = vpop.f32.mrb[26].mxu1  ;;  %5677 = vmatprep.mubr.msk.f32.mxu0 %vm6961_vm4, %v9538_v48 }
 0x2a0   : > { %v5088_v58 = vpop.f32.mrb[27].mxu1  ;;  %5327 = vmatmul.mubr.f32.gmra.mrb[76].mxu1 %v7928_v21 }
 0x2a1   : > { %5329 = vmatprep.mubr.msk.f32.mxu1 %vm6961_vm4, %v9538_v48 }
 0x2a2   : > { %5678 = vmatmul.mubr.f32.gmra.mrb[90].mxu0 %v9665_v19 }
 0x2a3   : > { %v8616_v42 = vpop.f32.mrb[28].mxu1  ;;  %5680 = vmatprep.mubr.msk.f32.mxu0 %vm6961_vm4, %v9538_v48 }
 0x2a4   : > { %v5091_v36 = vpop.f32.mrb[29].mxu1  ;;  %5330 = vmatmul.mubr.f32.gmra.mrb[78].mxu1 %v7941_v55 }
 0x2a5   : > { %5332 = vmatprep.mubr.msk.f32.mxu1 %vm6961_vm4, %v9538_v48 }
 0x2a6   : > { %5681 = vmatmul.mubr.f32.gmra.mrb[92].mxu0 %v9666_v40 }
 0x2a7   : > { %v8624_v58 = vpop.f32.mrb[30].mxu1  ;;  %5683 = vmatprep.mubr.msk.f32.mxu0 %vm6961_vm4, %v9538_v48 }
 0x2a8   : > { %v5094_v21 = vpop.f32.mrb[31].mxu1  ;;  %5333 = vmatmul.mubr.f32.gmra.mrb[80].mxu1 %v7961_v22 }
 0x2a9   : > { %5335 = vmatprep.mubr.msk.f32.mxu1 %vm6961_vm4, %v9538_v48 }
 0x2aa   : > { %5684 = vmatmul.mubr.f32.gmra.mrb[94].mxu0 %v8080_v33 }
 0x2ab   : > { %v8632_v36 = vpop.f32.mrb[32].mxu1  ;;  %5686 = vmatprep.mubr.msk.f32.mxu0 %vm6961_vm4, %v9538_v48 }
 0x2ac   : > { %v5097_v55 = vpop.f32.mrb[33].mxu1  ;;  %5336 = vmatmul.mubr.f32.gmra.mrb[82].mxu1 %v7983_v20 }
 0x2ad   : > { %5338 = vmatprep.mubr.msk.f32.mxu1 %vm6961_vm4, %v9538_v48 }
 0x2ae   : > { %5687 = vmatmul.mubr.f32.gmra.mrb[96].mxu0 %v8096_v51 }
 0x2af   : > { %v8640_v21 = vpop.f32.mrb[34].mxu1  ;;  %5707 = vmatprep.mubr.msk.f32.mxu0 %vm6961_vm4, %v9538_v48 }
 0x2b0   : > { %v5100_v22 = vpop.f32.mrb[35].mxu1  ;;  %5339 = vmatmul.mubr.f32.gmra.mrb[84].mxu1 %v8002_v28 }
 0x2b1   : > { %5341 = vmatprep.mubr.msk.f32.mxu1 %vm6961_vm4, %v9538_v48 }
 0x2b2   : > { %5708 = vmatmul.mubr.f32.vlgmr.msra.gmra.mrb[0].mxu0 %v7141_v16 }
 0x2b3   : > { %v8648_v55 = vpop.f32.mrb[36].mxu1  ;;  %5710 = vmatprep.mubr.msk.f32.mxu0 %vm6961_vm4, %v9538_v48 }
 0x2b4   : > { %v5103_v20 = vpop.f32.mrb[37].mxu1  ;;  %5342 = vmatmul.mubr.f32.gmra.mrb[86].mxu1 %v8023_v45 }
 0x2b5   : > { %5344 = vmatprep.mubr.msk.f32.mxu1 %vm6961_vm4, %v9538_v48  ;;  %v9679_v20 = vld [vmem:[#allocation27_spill] sm:$0xff] }
 0x2b6   : > { %5711 = vmatmul.mubr.f32.gmra.mrb[2].mxu0 %v7160_v26  ;;  %v9667_v26 = vld [vmem:[#allocation14_spill] sm:$0xff] }
 0x2b7   : > { %v8656_v22 = vpop.f32.mrb[38].mxu1  ;;  %5713 = vmatprep.mubr.msk.f32.mxu0 %vm6961_vm4, %v9538_v48 }
 0x2b8   : > { %v5106_v28 = vpop.f32.mrb[39].mxu1  ;;  %5345 = vmatmul.mubr.f32.gmra.mrb[88].mxu1 %v8036_v52  ;;  %v9674_v52 = vld [vmem:[#allocation21_spill] sm:$0xff] }
 0x2b9   : > { %5347 = vmatprep.mubr.msk.f32.mxu1 %vm6961_vm4, %v9538_v48  ;;  %v9680_v28 = vld [vmem:[#allocation28_spill] sm:$0xff] }
 0x2ba   : > { %5714 = vmatmul.mubr.f32.gmra.mrb[4].mxu0 %v7187_v44  ;;  %v9668_v44 = vld [vmem:[#allocation15_spill] sm:$0xff] }
 0x2bb   : > { %v8664_v16 = vpop.f32.mrb[40].mxu1  ;;  %5716 = vmatprep.mubr.msk.f32.mxu0 %vm6961_vm4, %v9538_v48 }
 0x2bc   : > { %v5109_v45 = vpop.f32.mrb[41].mxu1  ;;  %5348 = vmatmul.mubr.f32.gmra.mrb[90].mxu1 %v8059_v32  ;;  %v9676_v32 = vld [vmem:[#allocation23_spill] sm:$0xff] }
 0x2bd   : > { %5350 = vmatprep.mubr.msk.f32.mxu1 %vm6961_vm4, %v9538_v48 }
 0x2be   : > { %5717 = vmatmul.mubr.f32.gmra.mrb[6].mxu0 %v7216_v63  ;;  %v9669_v63 = vld [vmem:[#allocation16_spill] sm:$0xff] }
 0x2bf   : > { %5719 = vmatprep.mubr.msk.f32.mxu0 %vm6961_vm4, %v9538_v48 }
 0x2c0   : > { %5351 = vmatmul.mubr.f32.gmra.mrb[92].mxu1 %v8078_v54  ;;  %v9677_v54 = vld [vmem:[#allocation25_spill] sm:$0xff] }
 0x2c1   : > { %5353 = vmatprep.mubr.msk.f32.mxu1 %vm6961_vm4, %v9538_v48 }
 0x2c2   : > { %5720 = vmatmul.mubr.f32.gmra.mrb[8].mxu0 %v7220_v10  ;;  %v9670_v10 = vld [vmem:[#allocation17_spill] sm:$0xff] }
 0x2c3   : > { %5722 = vmatprep.mubr.msk.f32.mxu0 %vm6961_vm4, %v9538_v48 }
 0x2c4   : > { %5354 = vmatmul.mubr.f32.gmra.mrb[94].mxu1 %v8094_v13  ;;  %v9675_v13 = vld [vmem:[#allocation22_spill] sm:$0xff] }
 0x2c5   : > { %5356 = vmatprep.mubr.msk.f32.mxu1 %vm6961_vm4, %v9538_v48 }
 0x2c6   : > { %5723 = vmatmul.mubr.f32.gmra.mrb[10].mxu0 %v7251_v38  ;;  %v9671_v38 = vld [vmem:[#allocation18_spill] sm:$0xff] }
 0x2c7   : > { %5725 = vmatprep.mubr.msk.f32.mxu0 %vm6961_vm4, %v9538_v48 }
 0x2c8   : > { %5357 = vmatmul.mubr.f32.gmra.mrb[96].mxu1 %v8109_v35  ;;  %v9678_v35 = vld [vmem:[#allocation26_spill] sm:$0xff] }
 0x2c9   : > { %5886 = vmatprep.mubr.msk.f32.mxu1 %vm6961_vm4, %v9538_v48 }
 0x2ca   : > { %5726 = vmatmul.mubr.f32.gmra.mrb[12].mxu0 %v7287_v9  ;;  %v9672_v9 = vld [vmem:[#allocation19_spill] sm:$0xff] }
 0x2cb   : > { %5728 = vmatprep.mubr.msk.f32.mxu0 %vm6961_vm4, %v9538_v48 }
 0x2ce   : > { %5729 = vmatmul.mubr.f32.gmra.mrb[14].mxu0 %v7310_v41  ;;  %v9673_v41 = vld [vmem:[#allocation20_spill] sm:$0xff] }
 0x2cf   : > { %5731 = vmatprep.mubr.msk.f32.mxu0 %vm6961_vm4, %v9538_v48 }
 0x2d2   : > { %5732 = vmatmul.mubr.f32.gmra.mrb[16].mxu0 %v9667_v26 }
 0x2d3   : > { %5734 = vmatprep.mubr.msk.f32.mxu0 %vm6961_vm4, %v9538_v48 }
 0x2d6   : > { %5735 = vmatmul.mubr.f32.gmra.mrb[18].mxu0 %v9668_v44 }
 0x2d7   : > { %5737 = vmatprep.mubr.msk.f32.mxu0 %vm6961_vm4, %v9538_v48 }
 0x2da   : > { %5738 = vmatmul.mubr.f32.gmra.mrb[20].mxu0 %v9669_v63 }
 0x2db   : > { %5740 = vmatprep.mubr.msk.f32.mxu0 %vm6961_vm4, %v9538_v48 }
 0x2de   : > { %5741 = vmatmul.mubr.f32.gmra.mrb[22].mxu0 %v9670_v10 }
 0x2df   : > { %5743 = vmatprep.mubr.msk.f32.mxu0 %vm6961_vm4, %v9538_v48 }
 0x2e2   : > { %5744 = vmatmul.mubr.f32.gmra.mrb[24].mxu0 %v9671_v38 }
 0x2e3   : > { %5746 = vmatprep.mubr.msk.f32.mxu0 %vm6961_vm4, %v9538_v48 }
 0x2e6   : > { %5747 = vmatmul.mubr.f32.gmra.mrb[26].mxu0 %v9672_v9 }
 0x2e7   : > { %5749 = vmatprep.mubr.msk.f32.mxu0 %vm6961_vm4, %v9538_v48 }
 0x2ea   : > { %5750 = vmatmul.mubr.f32.gmra.mrb[28].mxu0 %v9673_v41 }
 0x2eb   : > { %5752 = vmatprep.mubr.msk.f32.mxu0 %vm6961_vm4, %v9538_v48 }
 0x2ee   : > { %5753 = vmatmul.mubr.f32.gmra.mrb[30].mxu0 %v9674_v52 }
 0x2ef   : > { %5755 = vmatprep.mubr.msk.f32.mxu0 %vm6961_vm4, %v9538_v48 }
 0x2f2   : > { %5756 = vmatmul.mubr.f32.gmra.mrb[32].mxu0 %v9675_v13 }
 0x2f3   : > { %5758 = vmatprep.mubr.msk.f32.mxu0 %vm6961_vm4, %v9538_v48 }
 0x2f6   : > { %5759 = vmatmul.mubr.f32.gmra.mrb[34].mxu0 %v9676_v32 }
 0x2f7   : > { %5761 = vmatprep.mubr.msk.f32.mxu0 %vm6961_vm4, %v9538_v48 }
 0x2fa   : > { %5762 = vmatmul.mubr.f32.gmra.mrb[36].mxu0 %v9638_v4 }
 0x2fb   : > { %5764 = vmatprep.mubr.msk.f32.mxu0 %vm6961_vm4, %v9538_v48 }
 0x2fe   : > { %5765 = vmatmul.mubr.f32.gmra.mrb[38].mxu0 %v9677_v54 }
 0x2ff   : > { %5767 = vmatprep.mubr.msk.f32.mxu0 %vm6961_vm4, %v9538_v48 }
 0x302   : > { %5768 = vmatmul.mubr.f32.gmra.mrb[40].mxu0 %v9678_v35 }
 0x303   : > { %5770 = vmatprep.mubr.msk.f32.mxu0 %vm6961_vm4, %v9538_v48 }
 0x306   : > { %5771 = vmatmul.mubr.f32.gmra.mrb[42].mxu0 %v9679_v20 }
 0x307   : > { %5773 = vmatprep.mubr.msk.f32.mxu0 %vm6961_vm4, %v9538_v48 }
 0x30a   : > { %5774 = vmatmul.mubr.f32.gmra.mrb[44].mxu0 %v9680_v28 }
 0x30b   : > { %5776 = vmatprep.mubr.msk.f32.mxu0 %vm6961_vm4, %v9538_v48 }
 0x30e   : > { %5777 = vmatmul.mubr.f32.gmra.mrb[46].mxu0 %v9645_v37 }
 0x30f   : > { %5779 = vmatprep.mubr.msk.f32.mxu0 %vm6961_vm4, %v9538_v48 }
 0x312   : > { %5780 = vmatmul.mubr.f32.gmra.mrb[48].mxu0 %v9647_v47 }
 0x313   : > { %5782 = vmatprep.mubr.msk.f32.mxu0 %vm6961_vm4, %v9538_v48 }
 0x316   : > { %5783 = vmatmul.mubr.f32.gmra.mrb[50].mxu0 %v7645_v6 }
 0x317   : > { %5785 = vmatprep.mubr.msk.f32.mxu0 %vm6961_vm4, %v9538_v48 }
 0x31a   : > { %5786 = vmatmul.mubr.f32.gmra.mrb[52].mxu0 %v7667_v12 }
 0x31b   : > { %5788 = vmatprep.mubr.msk.f32.mxu0 %vm6961_vm4, %v9538_v48 }
 0x31e   : > { %5789 = vmatmul.mubr.f32.gmra.mrb[54].mxu0 %v7691_v8 }
 0x31f   : > { %5791 = vmatprep.mubr.msk.f32.mxu0 %vm6961_vm4, %v9538_v48 }
 0x322   : > { %5792 = vmatmul.mubr.f32.gmra.mrb[56].mxu0 %v7712_v43 }
 0x323   : > { %5794 = vmatprep.mubr.msk.f32.mxu0 %vm6961_vm4, %v9538_v48 }
 0x326   : > { %5795 = vmatmul.mubr.f32.gmra.mrb[58].mxu0 %v9650_v0 }
 0x327   : > { %5797 = vmatprep.mubr.msk.f32.mxu0 %vm6961_vm4, %v9538_v48 }
 0x32a   : > { %5798 = vmatmul.mubr.f32.gmra.mrb[60].mxu0 %v9651_v17 }
 0x32b   : > { %5800 = vmatprep.mubr.msk.f32.mxu0 %vm6961_vm4, %v9538_v48 }
 0x32e   : > { %5801 = vmatmul.mubr.f32.gmra.mrb[62].mxu0 %v9652_v23 }
 0x32f   : > { %v8765_v12 = vpop.f32.mrb[42].mxu1  ;;  %5803 = vmatprep.mubr.msk.f32.mxu0 %vm6961_vm4, %v9538_v48 }
 0x330   : > { %v5277_v6 = vpop.f32.mrb[43].mxu1 }
 0x332   : > { %5804 = vmatmul.mubr.f32.gmra.mrb[64].mxu0 %v9653_v56 }
 0x333   : > { %v8770_v8 = vpop.f32.mrb[44].mxu1  ;;  %5806 = vmatprep.mubr.msk.f32.mxu0 %vm6961_vm4, %v9538_v48 }
 0x334   : > { %v5280_v43 = vpop.f32.mrb[45].mxu1 }
 0x336   : > { %5807 = vmatmul.mubr.f32.gmra.mrb[66].mxu0 %v9654_v1 }
 0x337   : > { %v8775_v4 = vpop.f32.mrb[46].mxu1  ;;  %5809 = vmatprep.mubr.msk.f32.mxu0 %vm6961_vm4, %v9538_v48 }
 0x338   : > { %v5283_v23 = vpop.f32.mrb[47].mxu1 }
 0x33a   : > { %5810 = vmatmul.mubr.f32.gmra.mrb[68].mxu0 %v9655_v5 }
 0x33b   : > { %v8780_v37 = vpop.f32.mrb[48].mxu1  ;;  %5812 = vmatprep.mubr.msk.f32.mxu0 %vm6961_vm4, %v9538_v48 }
 0x33c   : > { %v5286_v56 = vpop.f32.mrb[49].mxu1 }
 0x33e   : > { %5813 = vmatmul.mubr.f32.gmra.mrb[70].mxu0 %v9656_v3 }
 0x33f   : > { %v8785_v47 = vpop.f32.mrb[50].mxu1  ;;  %5815 = vmatprep.mubr.msk.f32.mxu0 %vm6961_vm4, %v9538_v48 }
 0x340   : > { %v5289_v1 = vpop.f32.mrb[51].mxu1 }
 0x342   : > { %5816 = vmatmul.mubr.f32.gmra.mrb[72].mxu0 %v9657_v49 }
 0x343   : > { %v8790_v0 = vpop.f32.mrb[52].mxu1  ;;  %5818 = vmatprep.mubr.msk.f32.mxu0 %vm6961_vm4, %v9538_v48 }
 0x344   : > { %v5292_v5 = vpop.f32.mrb[53].mxu1 }
 0x346   : > { %5819 = vmatmul.mubr.f32.gmra.mrb[74].mxu0 %v9658_v15 }
 0x347   : > { %v8795_v17 = vpop.f32.mrb[54].mxu1  ;;  %5821 = vmatprep.mubr.msk.f32.mxu0 %vm6961_vm4, %v9538_v48 }
 0x348   : > { %v5295_v3 = vpop.f32.mrb[55].mxu1 }
 0x34a   : > { %5822 = vmatmul.mubr.f32.gmra.mrb[76].mxu0 %v9659_v24 }
 0x34b   : > { %v8800_v45 = vpop.f32.mrb[56].mxu1  ;;  %5824 = vmatprep.mubr.msk.f32.mxu0 %vm6961_vm4, %v9538_v48 }
 0x34c   : > { %v5298_v49 = vpop.f32.mrb[57].mxu1 }
 0x34e   : > { %5825 = vmatmul.mubr.f32.gmra.mrb[78].mxu0 %v9660_v2 }
 0x34f   : > { %v8805_v26 = vpop.f32.mrb[58].mxu1  ;;  %5827 = vmatprep.mubr.msk.f32.mxu0 %vm6961_vm4, %v9538_v48 }
 0x350   : > { %v5301_v15 = vpop.f32.mrb[59].mxu1 }
 0x352   : > { %5828 = vmatmul.mubr.f32.gmra.mrb[80].mxu0 %v9661_v29 }
 0x353   : > { %v8810_v44 = vpop.f32.mrb[60].mxu1  ;;  %5830 = vmatprep.mubr.msk.f32.mxu0 %vm6961_vm4, %v9538_v48 }
 0x354   : > { %v5304_v24 = vpop.f32.mrb[61].mxu1 }
 0x356   : > { %5831 = vmatmul.mubr.f32.gmra.mrb[82].mxu0 %v9662_v46 }
 0x357   : > { %v8815_v63 = vpop.f32.mrb[62].mxu1  ;;  %5833 = vmatprep.mubr.msk.f32.mxu0 %vm6961_vm4, %v9538_v48 }
 0x358   : > { %v5307_v2 = vpop.f32.mrb[63].mxu1 }
 0x35a   : > { %5834 = vmatmul.mubr.f32.gmra.mrb[84].mxu0 %v7985_v14 }
 0x35b   : > { %v8820_v10 = vpop.f32.mrb[64].mxu1  ;;  %5836 = vmatprep.mubr.msk.f32.mxu0 %vm6961_vm4, %v9538_v48 }
 0x35c   : > { %v5310_v29 = vpop.f32.mrb[65].mxu1 }
 0x35e   : > { %5837 = vmatmul.mubr.f32.gmra.mrb[86].mxu0 %v9663_v39 }
 0x35f   : > { %v8825_v38 = vpop.f32.mrb[66].mxu1  ;;  %5839 = vmatprep.mubr.msk.f32.mxu0 %vm6961_vm4, %v9538_v48 }
 0x360   : > { %v5313_v46 = vpop.f32.mrb[67].mxu1 }
 0x362   : > { %5840 = vmatmul.mubr.f32.gmra.mrb[88].mxu0 %v9664_v59 }
 0x363   : > { %v8830_v9 = vpop.f32.mrb[68].mxu1  ;;  %5842 = vmatprep.mubr.msk.f32.mxu0 %vm6961_vm4, %v9538_v48 }
 0x364   : > { %v5316_v14 = vpop.f32.mrb[69].mxu1 }
 0x366   : > { %5843 = vmatmul.mubr.f32.gmra.mrb[90].mxu0 %v9665_v19 }
 0x367   : > { %v8835_v41 = vpop.f32.mrb[70].mxu1  ;;  %5845 = vmatprep.mubr.msk.f32.mxu0 %vm6961_vm4, %v9538_v48 }
 0x368   : > { %v5319_v39 = vpop.f32.mrb[71].mxu1 }
 0x36a   : > { %5846 = vmatmul.mubr.f32.gmra.mrb[92].mxu0 %v9666_v40 }
 0x36b   : > { %v8840_v52 = vpop.f32.mrb[72].mxu1  ;;  %5848 = vmatprep.mubr.msk.f32.mxu0 %vm6961_vm4, %v9538_v48 }
 0x36c   : > { %v5322_v59 = vpop.f32.mrb[73].mxu1 }
 0x36e   : > { %5849 = vmatmul.mubr.f32.gmra.mrb[94].mxu0 %v8080_v33 }
 0x36f   : > { %v8845_v13 = vpop.f32.mrb[74].mxu1  ;;  %5851 = vmatprep.mubr.msk.f32.mxu0 %vm6961_vm4, %v9538_v48 }
 0x370   : > { %v5325_v19 = vpop.f32.mrb[75].mxu1 }
 0x372   : > { %5852 = vmatmul.mubr.f32.gmra.mrb[96].mxu0 %v8096_v51 }
 0x373   : > { %v8850_v32 = vpop.f32.mrb[76].mxu1 }
 0x374   : > { %v5328_v54 = vpop.f32.mrb[77].mxu1 }
 0x377   : > { %v8852_v40 = vpop.f32.mrb[78].mxu1 }
 0x378   : > { %v5331_v35 = vpop.f32.mrb[79].mxu1 }
 0x37b   : > { %v8854_v20 = vpop.f32.mrb[80].mxu1 }
 0x37c   : > { %v5334_v28 = vpop.f32.mrb[81].mxu1 }
 0x37f   : > { %v8856_v6 = vpop.f32.mrb[82].mxu1 }
 0x380   : > { %v5337_v33 = vpop.f32.mrb[83].mxu1 }
 0x383   : > { %v8858_v43 = vpop.f32.mrb[84].mxu1 }
 0x384   : > { %v5340_v23 = vpop.f32.mrb[85].mxu1 }
 0x385   : > { %v2932_v56 = vpop.f32.mrb[0].mxu0 }
 0x386   : > { %v8861_v1 = vadd.f32 %v2932_v56, %v8504_v57  ;;  %v5709_v51 = vpop.f32.mrb[1].mxu0 }
 0x387   : > { %v8863_v5 = vpop.f32.mrb[86].mxu1 }
 0x388   : > { %v5343_v3 = vpop.f32.mrb[87].mxu1 }
 0x389   : > { %v2938_v49 = vpop.f32.mrb[2].mxu0 }
 0x38a   : > { %v8866_v15 = vadd.f32 %v2938_v49, %v8512_v27  ;;  %v5712_v24 = vpop.f32.mrb[3].mxu0 }
 0x38b   : > { %v8868_v2 = vpop.f32.mrb[88].mxu1 }
 0x38c   : > { %9681 = vst [vmem:[#allocation24_spill] sm:$0xff] %v8868_v2  ;;  %v5346_v29 = vpop.f32.mrb[89].mxu1 }
 0x38d   : > { %v2944_v46 = vpop.f32.mrb[4].mxu0 }
 0x38e   : > { %v8871_v14 = vadd.f32 %v2944_v46, %v8520_v53  ;;  %v5715_v39 = vpop.f32.mrb[5].mxu0 }
 0x38f   : > { %v8873_v59 = vpop.f32.mrb[90].mxu1 }
 0x390   : > { %9682 = vst [vmem:[#allocation9_spill] sm:$0xff] %v8873_v59  ;;  %v5349_v57 = vpop.f32.mrb[91].mxu1 }
 0x391   : > { %v2950_v19 = vpop.f32.mrb[6].mxu0 }
 0x392   : > { %v8876_v54 = vadd.f32 %v2950_v19, %v8528_v31  ;;  %v5718_v35 = vpop.f32.mrb[7].mxu0 }
 0x393   : > { %v8878_v28 = vpop.f32.mrb[92].mxu1 }
 0x394   : > { %9683 = vst [vmem:[#allocation10_spill] sm:$0xff] %v8878_v28  ;;  %v5352_v27 = vpop.f32.mrb[93].mxu1 }
 0x395   : > { %v2956_v33 = vpop.f32.mrb[8].mxu0 }
 0x396   : > { %v6294_v23 = vadd.f32 %v2956_v33, %v8536_v62  ;;  %v5721_v56 = vpop.f32.mrb[9].mxu0 }
 0x397   : > { %v8881_v51 = vpop.f32.mrb[94].mxu1 }
 0x398   : > { %9684 = vst [vmem:[#allocation29_spill] sm:$0xff] %v8881_v51  ;;  %v5355_v53 = vpop.f32.mrb[95].mxu1 }
 0x399   : > { %v2962_v3 = vpop.f32.mrb[10].mxu0 }
 0x39a   : > { %v8884_v49 = vadd.f32 %v2962_v3, %v8544_v25  ;;  %v5724_v24 = vpop.f32.mrb[11].mxu0 }
 0x39b   : > { %v8886_v29 = vpop.f32.mrb[96].mxu1 }
 0x39c   : > { %9685 = vst [vmem:[#allocation11_spill] sm:$0xff] %v8886_v29  ;;  %v5358_v31 = vpop.f32.mrb[97].mxu1 }
 0x39d   : > { %v2968_v46 = vpop.f32.mrb[12].mxu0 }
 0x39e   : > { %v8889_v39 = vadd.f32 %v2968_v46, %v8552_v18  ;;  %v5727_v57 = vpop.f32.mrb[13].mxu0 }
 0x3a1   : > { %v2974_v19 = vpop.f32.mrb[14].mxu0 }
 0x3a2   : > { %v8892_v62 = vadd.f32 %v2974_v19, %v8560_v61  ;;  %v5730_v35 = vpop.f32.mrb[15].mxu0 }
 0x3a5   : > { %v2980_v27 = vpop.f32.mrb[16].mxu0 }
 0x3a6   : > { %v8895_v33 = vadd.f32 %v2980_v27, %v8568_v11  ;;  %v5733_v25 = vpop.f32.mrb[17].mxu0 }
 0x3a9   : > { %v2986_v56 = vpop.f32.mrb[18].mxu0 }
 0x3aa   : > { %v8898_v53 = vadd.f32 %v2986_v56, %v8576_v60  ;;  %v5736_v3 = vpop.f32.mrb[19].mxu0 }
 0x3ad   : > { %v2992_v24 = vpop.f32.mrb[20].mxu0 }
 0x3ae   : > { %v8901_v18 = vadd.f32 %v2992_v24, %v8584_v7  ;;  %v5739_v31 = vpop.f32.mrb[21].mxu0 }
 0x3b1   : > { %v2998_v46 = vpop.f32.mrb[22].mxu0 }
 0x3b2   : > { %v8904_v61 = vadd.f32 %v2998_v46, %v8592_v50  ;;  %v5742_v57 = vpop.f32.mrb[23].mxu0 }
 0x3b5   : > { %v3004_v19 = vpop.f32.mrb[24].mxu0 }
 0x3b6   : > { %v8907_v11 = vadd.f32 %v3004_v19, %v8600_v30  ;;  %v5745_v35 = vpop.f32.mrb[25].mxu0 }
 0x3b9   : > { %v3010_v27 = vpop.f32.mrb[26].mxu0 }
 0x3ba   : > { %v8910_v60 = vadd.f32 %v3010_v27, %v8608_v34  ;;  %v5748_v25 = vpop.f32.mrb[27].mxu0 }
 0x3bd   : > { %v3016_v56 = vpop.f32.mrb[28].mxu0 }
 0x3be   : > { %v8913_v7 = vadd.f32 %v3016_v56, %v8616_v42  ;;  %v5751_v3 = vpop.f32.mrb[29].mxu0 }
 0x3c1   : > { %v3022_v24 = vpop.f32.mrb[30].mxu0 }
 0x3c2   : > { %v8916_v50 = vadd.f32 %v3022_v24, %v8624_v58  ;;  %v5754_v31 = vpop.f32.mrb[31].mxu0 }
 0x3c5   : > { %v3028_v46 = vpop.f32.mrb[32].mxu0 }
 0x3c6   : > { %v6306_v30 = vadd.f32 %v3028_v46, %v8632_v36  ;;  %v5757_v57 = vpop.f32.mrb[33].mxu0 }
 0x3c8   : > { %v3224_v19 = vmul.f32 %v6306_v30, %v8861_v1  ;;  %v3252_v35 = vmul.f32 %v6306_v30, %v6294_v23 }
 0x3c9   : > { %v3034_v34 = vpop.f32.mrb[34].mxu0 }
 0x3ca   : > { %v6307_v27 = vadd.f32 %v3034_v34, %v8640_v21  ;;  %v5760_v25 = vpop.f32.mrb[35].mxu0 }
 0x3cc   : > { %v3225_v42 = vmul.f32 %v6307_v27, %v8866_v15  ;;  %v3253_v56 = vmul.f32 %v6307_v27, %v8884_v49 }
 0x3cd   : > { %v3040_v3 = vpop.f32.mrb[36].mxu0 }
 0x3ce   : > { %v6308_v58 = vadd.f32 %v3040_v3, %v8648_v55  ;;  %v5763_v24 = vpop.f32.mrb[37].mxu0 }
 0x3d0   : > { %v3226_v31 = vmul.f32 %v6308_v58, %v8871_v14  ;;  %v3254_v36 = vmul.f32 %v6308_v58, %v8889_v39 }
 0x3d1   : > { %v3046_v46 = vpop.f32.mrb[38].mxu0 }
 0x3d2   : > { %v6309_v57 = vadd.f32 %v3046_v46, %v8656_v22  ;;  %v5766_v30 = vpop.f32.mrb[39].mxu0 }
 0x3d4   : > { %v3227_v48 = vmul.f32 %v6309_v57, %v8876_v54  ;;  %v3255_v21 = vmul.f32 %v6309_v57, %v8892_v62 }
 0x3d5   : > { %v3052_v34 = vpop.f32.mrb[40].mxu0 }
 0x3d6   : > { %v6310_v25 = vadd.f32 %v3052_v34, %v8664_v16  ;;  %v5769_v27 = vpop.f32.mrb[41].mxu0 }
 0x3d8   : > { %v3228_v29 = vmul.f32 %v6310_v25, %v6294_v23  ;;  %v3256_v55 = vmul.f32 %v6310_v25, %v8861_v1 }
 0x3d9   : > { %v3058_v3 = vpop.f32.mrb[42].mxu0 }
 0x3da   : > { %v3232_v24 = vadd.f32 %v3228_v29, %v3224_v19  ;;  %v3260_v51 = vsub.f32 %v3252_v35, %v3256_v55  ;;  %v6311_v58 = vadd.f32 %v3058_v3, %v8765_v12  ;;  %v5772_v28 = vpop.f32.mrb[43].mxu0 }
 0x3dc   : > { %v3229_v22 = vmul.f32 %v6311_v58, %v8884_v49  ;;  %v3257_v46 = vmul.f32 %v6311_v58, %v8866_v15 }
 0x3dd   : > { %v3064_v30 = vpop.f32.mrb[44].mxu0 }
 0x3de   : > { %v3233_v59 = vadd.f32 %v3229_v22, %v3225_v42  ;;  %v3261_v57 = vsub.f32 %v3253_v56, %v3257_v46  ;;  %v6312_v2 = vadd.f32 %v3064_v30, %v8770_v8  ;;  %v5775_v16 = vpop.f32.mrb[45].mxu0 }
 0x3e0   : > { %v3230_v23 = vmul.f32 %v6312_v2, %v8889_v39  ;;  %v3258_v1 = vmul.f32 %v6312_v2, %v8871_v14 }
 0x3e1   : > { %v3070_v34 = vpop.f32.mrb[46].mxu0 }
 0x3e2   : > { %v3234_v29 = vadd.f32 %v3230_v23, %v3226_v31  ;;  %v3262_v19 = vsub.f32 %v3254_v36, %v3258_v1  ;;  %v6313_v12 = vadd.f32 %v3070_v34, %v8775_v4  ;;  %v5778_v28 = vpop.f32.mrb[47].mxu0 }
 0x3e4   : > { %v3231_v49 = vmul.f32 %v6313_v12, %v8892_v62  ;;  %v3259_v15 = vmul.f32 %v6313_v12, %v8876_v54 }
 0x3e5   : > { %v3076_v35 = vpop.f32.mrb[48].mxu0 }
 0x3e6   : > { %v3235_v42 = vadd.f32 %v3231_v49, %v3227_v48  ;;  %v3263_v56 = vsub.f32 %v3255_v21, %v3259_v15  ;;  %v6314_v8 = vadd.f32 %v3076_v35, %v8780_v37  ;;  %v5781_v25 = vpop.f32.mrb[49].mxu0 }
 0x3e8   : > { %v3236_v39 = vmul.f32 %v6314_v8, %v8895_v33  ;;  %v3264_v2 = vmul.f32 %v6314_v8, %v8907_v11 }
 0x3e9   : > { %v3082_v14 = vpop.f32.mrb[50].mxu0 }
 0x3ea   : > { %v3240_v31 = vadd.f32 %v3236_v39, %v3232_v24  ;;  %v3268_v36 = vadd.f32 %v3264_v2, %v3260_v51  ;;  %v6315_v4 = vadd.f32 %v3082_v14, %v8785_v47  ;;  %v5784_v27 = vpop.f32.mrb[51].mxu0 }
 0x3ec   : > { %v3237_v62 = vmul.f32 %v6315_v4, %v8898_v53  ;;  %v3265_v54 = vmul.f32 %v6315_v4, %v8910_v60 }
 0x3ed   : > { %v3088_v55 = vpop.f32.mrb[52].mxu0 }
 0x3ee   : > { %v3241_v48 = vadd.f32 %v3237_v62, %v3233_v59  ;;  %v3269_v21 = vadd.f32 %v3265_v54, %v3261_v57  ;;  %v6316_v37 = vadd.f32 %v3088_v55, %v8790_v0  ;;  %v5787_v3 = vpop.f32.mrb[53].mxu0 }
 0x3f0   : > { %v3238_v58 = vmul.f32 %v6316_v37, %v8901_v18  ;;  %v3266_v22 = vmul.f32 %v6316_v37, %v8913_v7 }
 0x3f1   : > { %v3094_v46 = vpop.f32.mrb[54].mxu0 }
 0x3f2   : > { %v3242_v24 = vadd.f32 %v3238_v58, %v3234_v29  ;;  %v3270_v51 = vadd.f32 %v3266_v22, %v3262_v19  ;;  %v6317_v47 = vadd.f32 %v3094_v46, %v8795_v17  ;;  %v5790_v30 = vpop.f32.mrb[55].mxu0 }
 0x3f4   : > { %v3239_v16 = vmul.f32 %v6317_v47, %v8904_v61  ;;  %v3267_v23 = vmul.f32 %v6317_v47, %v8916_v50 }
 0x3f5   : > { %v3100_v1 = vpop.f32.mrb[56].mxu0 }
 0x3f6   : > { %v3243_v59 = vadd.f32 %v3239_v16, %v3235_v42  ;;  %v3271_v57 = vadd.f32 %v3267_v23, %v3263_v56  ;;  %v6318_v0 = vadd.f32 %v3100_v1, %v8800_v45  ;;  %v5793_v34 = vpop.f32.mrb[57].mxu0 }
 0x3f8   : > { %v3244_v12 = vmul.f32 %v6318_v0, %v8907_v11  ;;  %v3272_v28 = vmul.f32 %v6318_v0, %v8895_v33 }
 0x3f9   : > { %v3106_v49 = vpop.f32.mrb[58].mxu0 }
 0x3fa   : > { %v8955_v29 = vadd.f32 %v3244_v12, %v3240_v31  ;;  %v8957_v19 = vsub.f32 %v3268_v36, %v3272_v28  ;;  %v6319_v17 = vadd.f32 %v3106_v49, %v8805_v26  ;;  %v5796_v15 = vpop.f32.mrb[59].mxu0 }
 0x3fc   : > { %v3245_v35 = vmul.f32 %v6319_v17, %v8910_v60  ;;  %v3273_v42 = vmul.f32 %v6319_v17, %v8898_v53 }
 0x3fd   : > { %v3112_v56 = vpop.f32.mrb[60].mxu0 }
 0x3fe   : > { %v8962_v8 = vadd.f32 %v3245_v35, %v3241_v48  ;;  %v8964_v45 = vsub.f32 %v3269_v21, %v3273_v42  ;;  %v6320_v11 = vadd.f32 %v3112_v56, %v8810_v44  ;;  %v5799_v33 = vpop.f32.mrb[61].mxu0 }
 0x400   : > { %v3246_v25 = vmul.f32 %v6320_v11, %v8913_v7  ;;  %v3274_v39 = vmul.f32 %v6320_v11, %v8901_v18 }
 0x401   : > { %v3118_v2 = vpop.f32.mrb[62].mxu0 }
 0x402   : > { %v8969_v14 = vadd.f32 %v3246_v25, %v3242_v24  ;;  %v8971_v26 = vsub.f32 %v3270_v51, %v3274_v39  ;;  %v6321_v60 = vadd.f32 %v3118_v2, %v8815_v63  ;;  %v5802_v53 = vpop.f32.mrb[63].mxu0 }
 0x404   : > { %v3247_v31 = vmul.f32 %v6321_v60, %v8916_v50  ;;  %v3275_v36 = vmul.f32 %v6321_v60, %v8904_v61 }
 0x405   : > { %v3124_v4 = vpop.f32.mrb[64].mxu0 }
 0x406   : > { %v8976_v27 = vadd.f32 %v3247_v31, %v3243_v59  ;;  %v8978_v44 = vsub.f32 %v3271_v57, %v3275_v36  ;;  %v6322_v7 = vadd.f32 %v3124_v4, %v8820_v10  ;;  %v5805_v18 = vpop.f32.mrb[65].mxu0 }
 0x408   : > { %v3280_v62 = vmul.f32 %v6322_v7, %v8955_v29  ;;  %v3296_v54 = vmul.f32 %v6322_v7, %v8957_v19 }
 0x409   : > { %v3130_v55 = vpop.f32.mrb[66].mxu0 }
 0x40a   : > { %v6323_v63 = vadd.f32 %v3130_v55, %v8825_v38  ;;  %v5808_v48 = vpop.f32.mrb[67].mxu0 }
 0x40c   : > { %v3281_v50 = vmul.f32 %v6323_v63, %v8962_v8  ;;  %v3297_v61 = vmul.f32 %v6323_v63, %v8964_v45 }
 0x40d   : > { %v3136_v21 = vpop.f32.mrb[68].mxu0 }
 0x40e   : > { %v6324_v37 = vadd.f32 %v3136_v21, %v8830_v9  ;;  %v5811_v3 = vpop.f32.mrb[69].mxu0 }
 0x40f   : > { %v9686_v3 = vmov 0.0|0.0  }
 0x410   : > { %v3282_v58 = vmul.f32 %v6324_v37, %v8969_v14  ;;  %v3298_v10 = vmul.f32 %v6324_v37, %v8971_v26 }
 0x411   : > { %v3142_v22 = vpop.f32.mrb[70].mxu0 }
 0x412   : > { %v6325_v46 = vadd.f32 %v3142_v22, %v8835_v41  ;;  %v5814_v24 = vpop.f32.mrb[71].mxu0 }
 0x414   : > { %v3283_v51 = vmul.f32 %v6325_v46, %v8976_v27  ;;  %v3299_v38 = vmul.f32 %v6325_v46, %v8978_v44 }
 0x415   : > { %v3148_v47 = vpop.f32.mrb[72].mxu0 }
 0x416   : > { %v6326_v30 = vadd.f32 %v3148_v47, %v8840_v52  ;;  %v5817_v16 = vpop.f32.mrb[73].mxu0 }
 0x418   : > { %v3284_v23 = vmul.f32 %v6326_v30, %v8957_v19  ;;  %v3292_v9 = vmul.f32 %v6326_v30, %v8955_v29 }
 0x419   : > { %v3154_v1 = vpop.f32.mrb[74].mxu0 }
 0x41a   : > { %v3288_v59 = vsub.f32 %v3280_v62, %v3284_v23  ;;  %v3300_v57 = vadd.f32 %v3296_v54, %v3292_v9  ;;  %v6327_v0 = vadd.f32 %v3154_v1, %v8845_v13  ;;  %v5820_v34 = vpop.f32.mrb[75].mxu0 }
 0x41c   : > { %v3330_v41 = vand.u32 4294901760, %v3288_v59  ;;  %v3342_v12 = vand.u32 4294901760, %v3300_v57  ;;  %v3285_v28 = vmul.f32 %v6327_v0, %v8964_v45  ;;  %v3293_v49 = vmul.f32 %v6327_v0, %v8962_v8 }
 0x41d   : > { %v3160_v17 = vpop.f32.mrb[76].mxu0 }
 0x41e   : > { %v8998_v15 = vsub.f32 %v3288_v59, %v3330_v41  ;;  %v9000_v52 = vsub.f32 %v3300_v57, %v3342_v12  ;;  %v3289_v35 = vsub.f32 %v3281_v50, %v3285_v28  ;;  %v3301_v42 = vadd.f32 %v3297_v61, %v3293_v49  ;;  %v5823_v56 = vpop.f32.mrb[77].mxu0 }
 0x41f   : > { %v6328_v11 = vadd.f32 %v3160_v17, %v8850_v32 }
 0x420   : > { %v3423_v33 = vand.u32 4294901760, %v8998_v15  ;;  %v3333_v13 = vand.u32 4294901760, %v3289_v35  ;;  %v3345_v25 = vand.u32 4294901760, %v3301_v42  ;;  %v3451_v39 = vand.u32 4294901760, %v9000_v52 }
 0x421   : > { %v3286_v2 = vmul.f32 %v6328_v11, %v8971_v26  ;;  %v3294_v60 = vmul.f32 %v6328_v11, %v8969_v14  ;;  %v3166_v53 = vpop.f32.mrb[78].mxu0 }
 0x422   : > { %v9007_v31 = vsub.f32 %v3289_v35, %v3333_v13  ;;  %v9009_v36 = vsub.f32 %v3301_v42, %v3345_v25  ;;  %v6329_v4 = vadd.f32 %v3166_v53, %v8852_v40  ;;  %v5826_v7 = vpop.f32.mrb[79].mxu0  ;;  %v9012_v18 = vpack.c.bf16 %v3333_v13, %v3330_v41 }
 0x423   : > { %v3290_v32 = vsub.f32 %v3282_v58, %v3286_v2  ;;  %v3302_v62 = vadd.f32 %v3298_v10, %v3294_v60  ;;  %v9014_v54 = vpack.c.bf16 %v3345_v25, %v3342_v12  ;;  %v3424_v55 = vsub.f32 %v8998_v15, %v3423_v33 }
 0x424   : > { %v3430_v63 = vand.u32 4294901760, %v9007_v31  ;;  %v3458_v48 = vand.u32 4294901760, %v9009_v36  ;;  %v3287_v50 = vmul.f32 %v6329_v4, %v8978_v44  ;;  %v3295_v61 = vmul.f32 %v6329_v4, %v8976_v27  ;;  %6138 = vmatpush3.bf16.msra.mxu1 %v9012_v18 }
 0x425   : > { %v3336_v40 = vand.u32 4294901760, %v3290_v32  ;;  %v3348_v21 = vand.u32 4294901760, %v3302_v62  ;;  %v3172_v37 = vpop.f32.mrb[80].mxu0  ;;  %6139 = vmatprep.subr.bf16.mxu1 %v9686_v3  ;;  %v3425_v58 = vand.u32 4294901760, %v3424_v55  ;;  %v3452_v10 = vsub.f32 %v9000_v52, %v3451_v39 }
 0x426   : > { %v3291_v22 = vsub.f32 %v3283_v51, %v3287_v50  ;;  %v3303_v46 = vadd.f32 %v3299_v38, %v3295_v61  ;;  %v6330_v24 = vadd.f32 %v3172_v37, %v8854_v20  ;;  %v5829_v47 = vpop.f32.mrb[81].mxu0  ;;  %v3431_v30 = vsub.f32 %v9007_v31, %v3430_v63 }
 0x427   : > { %v9030_v16 = vsub.f32 %v3290_v32, %v3336_v40  ;;  %v9032_v23 = vsub.f32 %v3302_v62, %v3348_v21  ;;  %v3453_v9 = vand.u32 4294901760, %v3452_v10  ;;  %v3459_v1 = vsub.f32 %v9009_v36, %v3458_v48 }
 0x428   : > { %v3339_v59 = vand.u32 4294901760, %v3291_v22  ;;  %v3351_v57 = vand.u32 4294901760, %v3303_v46  ;;  %v3304_v0 = vmul.f32 %v6330_v24, %v8955_v29  ;;  %v3320_v51 = vmul.f32 %v6330_v24, %v8957_v19 }
 0x429   : > { %v3437_v20 = vand.u32 4294901760, %v9030_v16  ;;  %v3465_v38 = vand.u32 4294901760, %v9032_v23  ;;  %v3178_v34 = vpop.f32.mrb[82].mxu0  ;;  %v3432_v41 = vand.u32 4294901760, %v3431_v30  ;;  %v3460_v12 = vand.u32 4294901760, %v3459_v1 }
 0x42a   : > { %v9041_v28 = vsub.f32 %v3291_v22, %v3339_v59  ;;  %v9043_v49 = vsub.f32 %v3303_v46, %v3351_v57  ;;  %v6331_v17 = vadd.f32 %v3178_v34, %v8856_v6  ;;  %v5832_v35 = vpop.f32.mrb[83].mxu0  ;;  %v9046_v42 = vpack.c.bf16 %v3339_v59, %v3336_v40 }
 0x42b   : > { %v9048_v56 = vpack.c.bf16 %v3351_v57, %v3348_v21  ;;  %v9050_v11 = vpack.c.bf16 %v3432_v41, %v3425_v58  ;;  %v3438_v13 = vsub.f32 %v9030_v16, %v3437_v20  ;;  %v9053_v25 = vpack.c.bf16 %v3460_v12, %v3453_v9 }
 0x42c   : > { %v3444_v2 = vand.u32 4294901760, %v9041_v28  ;;  %v3472_v60 = vand.u32 4294901760, %v9043_v49  ;;  %v3305_v53 = vmul.f32 %v6331_v17, %v8962_v8  ;;  %v3321_v4 = vmul.f32 %v6331_v17, %v8964_v45  ;;  %6141 = vmatpush3.bf16.msra.mxu1 %v9046_v42 }
 0x42d   : > { %v3184_v6 = vpop.f32.mrb[84].mxu0  ;;  %6142 = vmatprep.subr.bf16.mxu1 %v9686_v3  ;;  %v3439_v7 = vand.u32 4294901760, %v3438_v13  ;;  %v3466_v32 = vsub.f32 %v9032_v23, %v3465_v38  ;;  %v6185_v62 = vpack.c.bf16 %v9007_v31, %v8998_v15  ;;  %v6188_v55 = vpack.c.bf16 %v9041_v28, %v9030_v16 }
 0x42e   : > { %v6332_v50 = vadd.f32 %v3184_v6, %v8858_v43  ;;  %v5835_v61 = vpop.f32.mrb[85].mxu0  ;;  %v3445_v40 = vsub.f32 %v9041_v28, %v3444_v2  ;;  %v3473_v21 = vsub.f32 %v9043_v49, %v3472_v60  ;;  %v6191_v37 = vpack.c.bf16 %v9009_v36, %v9000_v52 }
 0x42f   : > { %v3467_v58 = vand.u32 4294901760, %v3466_v32  ;;  %v6194_v10 = vpack.c.bf16 %v9043_v49, %v9032_v23  ;;  %v9075_v22 = vpack.c.bf16 %v3430_v63, %v3423_v33  ;;  %v9077_v46 = vpack.c.bf16 %v3444_v2, %v3437_v20 }
 0x430   : > { %v3306_v43 = vmul.f32 %v6332_v50, %v8969_v14  ;;  %v3322_v24 = vmul.f32 %v6332_v50, %v8971_v26  ;;  %6144 = vmatpush3.bf16.msra.mxu1 %v9014_v54  ;;  %v3446_v47 = vand.u32 4294901760, %v3445_v40  ;;  %v3474_v30 = vand.u32 4294901760, %v3473_v21 }
 0x431   : > { %v3190_v9 = vpop.f32.mrb[86].mxu0  ;;  %6145 = vmatprep.subr.bf16.mxu1 %v9686_v3  ;;  %v9087_v1 = vpack.c.bf16 %v3458_v48, %v3451_v39  ;;  %v9089_v33 = vpack.c.bf16 %v3472_v60, %v3465_v38  ;;  %v9687_v39 = vld [vmem:[#allocation24_spill] sm:$0xff]  ;;  %v6965_v28 = vmov 920167782  }
 0x432   : > { %v6333_v63 = vadd.f32 %v3190_v9, %v8863_v5  ;;  %v5838_v59 = vpop.f32.mrb[87].mxu0  ;;  %v9092_v57 = vpack.c.bf16 %v3446_v47, %v3439_v7  ;;  %v9094_v20 = vpack.c.bf16 %v3474_v30, %v3467_v58  ;;  %v3328_v5 = vld [vmem:[%s9407_s4] sm:$0xf]  ;;  %v9688_v7 = vld [vmem:[#allocation9_spill] sm:$0xff] }
 0x433   : > { %v9106_v2 = vand.u32 4294901760, %v3328_v5 }
 0x434   : > { %v3307_v34 = vmul.f32 %v6333_v63, %v8976_v27  ;;  %v3323_v41 = vmul.f32 %v6333_v63, %v8978_v44  ;;  %6147 = vmatpush3.bf16.msra.mxu1 %v9048_v56  ;;  %v9689_v63 = vld [vmem:[#allocation10_spill] sm:$0xff] }
 0x435   : > { %v3196_v12 = vpop.f32.mrb[88].mxu0  ;;  %6148 = vmatprep.subr.bf16.mxu1 %v9686_v3  ;;  %v9112_v30 = vsub.f32 %v3328_v5, %v9106_v2 }
 0x436   : > { %v6334_v48 = vadd.f32 %v3196_v12, %v9687_v39  ;;  %v5841_v38 = vpop.f32.mrb[89].mxu0 }
 0x438   : > { %v3308_v17 = vmul.f32 %v6334_v48, %v8957_v19  ;;  %v3316_v35 = vmul.f32 %v6334_v48, %v8955_v29 }
 0x439   : > { %v3202_v13 = vpop.f32.mrb[90].mxu0 }
 0x43a   : > { %v3312_v60 = vsub.f32 %v3304_v0, %v3308_v17  ;;  %v3324_v6 = vadd.f32 %v3320_v51, %v3316_v35  ;;  %v6335_v32 = vadd.f32 %v3202_v13, %v9688_v7  ;;  %v5844_v50 = vpop.f32.mrb[91].mxu0  ;;  %v3412_v17 = vand.u32 4294901760, %v9112_v30 }
 0x43c   : > { %v3354_v61 = vand.u32 4294901760, %v3312_v60  ;;  %v3366_v40 = vand.u32 4294901760, %v3324_v6  ;;  %v3309_v21 = vmul.f32 %v6335_v32, %v8964_v45  ;;  %v3317_v58 = vmul.f32 %v6335_v32, %v8962_v8 }
 0x43d   : > { %v3208_v47 = vpop.f32.mrb[92].mxu0 }
 0x43e   : > { %v9114_v19 = vsub.f32 %v3312_v60, %v3354_v61  ;;  %v9116_v29 = vsub.f32 %v3324_v6, %v3366_v40  ;;  %v3313_v9 = vsub.f32 %v3305_v53, %v3309_v21  ;;  %v3325_v0 = vadd.f32 %v3321_v4, %v3317_v58  ;;  %v5847_v51 = vpop.f32.mrb[93].mxu0  ;;  %v9690_v4 = vld [vmem:[#allocation29_spill] sm:$0xff] }
 0x43f   : > { %v6336_v59 = vadd.f32 %v3208_v47, %v9689_v63  ;;  %v9691_v63 = vld [vmem:[#allocation11_spill] sm:$0xff] }
 0x440   : > { %v3479_v12 = vand.u32 4294901760, %v9114_v19  ;;  %v3357_v39 = vand.u32 4294901760, %v3313_v9  ;;  %v3369_v48 = vand.u32 4294901760, %v3325_v0  ;;  %v3507_v45 = vand.u32 4294901760, %v9116_v29 }
 0x441   : > { %v3310_v8 = vmul.f32 %v6336_v59, %v8971_v26  ;;  %v3318_v38 = vmul.f32 %v6336_v59, %v8969_v14  ;;  %v3214_v5 = vpop.f32.mrb[94].mxu0 }
 0x442   : > { %v9124_v35 = vsub.f32 %v3313_v9, %v3357_v39  ;;  %v9126_v53 = vsub.f32 %v3325_v0, %v3369_v48  ;;  %v6337_v13 = vadd.f32 %v3214_v5, %v9690_v4  ;;  %v5850_v60 = vpop.f32.mrb[95].mxu0  ;;  %v9129_v6 = vpack.c.bf16 %v3357_v39, %v3354_v61 }
 0x443   : > { %v3314_v7 = vsub.f32 %v3306_v43, %v3310_v8  ;;  %v3326_v32 = vadd.f32 %v3322_v24, %v3318_v38  ;;  %v9131_v50 = vpack.c.bf16 %v3369_v48, %v3366_v40  ;;  %v3480_v26 = vsub.f32 %v9114_v19, %v3479_v12 }
 0x444   : > { %v3486_v14 = vand.u32 4294901760, %v9124_v35  ;;  %v3514_v21 = vand.u32 4294901760, %v9126_v53  ;;  %v3311_v58 = vmul.f32 %v6337_v13, %v8978_v44  ;;  %v3319_v47 = vmul.f32 %v6337_v13, %v8976_v27  ;;  %6150 = vmatpush3.bf16.msra.mxu1 %v9129_v6 }
 0x445   : > { %v3360_v9 = vand.u32 4294901760, %v3314_v7  ;;  %v3372_v0 = vand.u32 4294901760, %v3326_v32  ;;  %v3220_v61 = vpop.f32.mrb[96].mxu0  ;;  %6151 = vmatprep.subr.bf16.mxu1 %v9686_v3  ;;  %v3481_v43 = vand.u32 4294901760, %v3480_v26  ;;  %v3508_v24 = vsub.f32 %v9116_v29, %v3507_v45 }
 0x446   : > { %v3315_v40 = vsub.f32 %v3307_v34, %v3311_v58  ;;  %v3327_v51 = vadd.f32 %v3323_v41, %v3319_v47  ;;  %v9142_v59 = vadd.f32 %v3220_v61, %v9691_v63  ;;  %v5853_v39 = vpop.f32.mrb[97].mxu0  ;;  %v3487_v44 = vsub.f32 %v9124_v35, %v3486_v14 }
 0x447   : > { %v9145_v48 = vsub.f32 %v3314_v7, %v3360_v9  ;;  %v9147_v27 = vsub.f32 %v3326_v32, %v3372_v0  ;;  %v3509_v8 = vand.u32 4294901760, %v3508_v24  ;;  %v3515_v38 = vsub.f32 %v9126_v53, %v3514_v21 }
 0x448   : > { %v3363_v5 = vand.u32 4294901760, %v3315_v40  ;;  %v3375_v4 = vand.u32 4294901760, %v3327_v51  ;;  %v3488_v13 = vand.u32 4294901760, %v3487_v44  ;;  %v6203_v7 = vpack.c.bf16 %v9126_v53, %v9116_v29 }
 0x449   : > { %v3493_v41 = vand.u32 4294901760, %v9145_v48  ;;  %v3521_v60 = vand.u32 4294901760, %v9147_v27  ;;  %v3516_v26 = vand.u32 4294901760, %v3515_v38  ;;  %v9694_v15 = vpack.c.bf16 %v9124_v35, %v9114_v19 }
 0x44a   : > { %v9156_v58 = vsub.f32 %v3315_v40, %v3363_v5  ;;  %v9158_v32 = vsub.f32 %v3327_v51, %v3375_v4  ;;  %v9160_v47 = vpack.c.bf16 %v3363_v5, %v3360_v9  ;;  %v9162_v61 = vpack.c.bf16 %v3375_v4, %v3372_v0 }
 0x44b   : > { %v6173_v24 = vpack.c.bf16 %v3488_v13, %v3481_v43  ;;  %v3494_v63 = vsub.f32 %v9145_v48, %v3493_v41  ;;  %v6179_v39 = vpack.c.bf16 %v3516_v26, %v3509_v8  ;;  %v3522_v44 = vsub.f32 %v9147_v27, %v3521_v60 }
 0x44c   : > { %v3500_v34 = vand.u32 4294901760, %v9156_v58  ;;  %v3528_v38 = vand.u32 4294901760, %v9158_v32  ;;  %6153 = vmatpush3.bf16.msra.mxu1 %v9160_v47  ;;  %v6200_v40 = vpack.c.bf16 %v9156_v58, %v9145_v48  ;;  %v6206_v9 = vpack.c.bf16 %v9158_v32, %v9147_v27 }
 0x44d   : > { %6154 = vmatprep.subr.bf16.mxu1 %v9686_v3  ;;  %v9174_v0 = vpack.c.bf16 %v3486_v14, %v3479_v12  ;;  %v9176_v43 = vpack.c.bf16 %v3514_v21, %v3507_v45  ;;  %v3413_v48 = vsub.f32 %v9112_v30, %v3412_v17  ;;  %v3495_v27 = vand.u32 4294901760, %v3494_v63 }
 0x44e   : > { %v3501_v51 = vsub.f32 %v9156_v58, %v3500_v34  ;;  %v3529_v8 = vsub.f32 %v9158_v32, %v3528_v38  ;;  %v9180_v5 = vpack.c.bf16 %v3500_v34, %v3493_v41  ;;  %v9182_v4 = vpack.c.bf16 %v3528_v38, %v3521_v60 }
 0x44f   : > { %v3523_v12 = vand.u32 4294901760, %v3522_v44  ;;  %v3414_v26 = vand.u32 4294901760, %v3413_v48  ;;  %v9692_v34 = vmov 0.0   ;;  %v3973_v52 = vand.u32 2139095040, %v9142_v59 }
 0x450   : > { %6156 = vmatpush3.bf16.msra.mxu1 %v9131_v50  ;;  %v3502_v13 = vand.u32 4294901760, %v3501_v51  ;;  %v3530_v14 = vand.u32 4294901760, %v3529_v8  ;;  %vm3972_vm5 = vcmp.lt.s32.totalorder %v9142_v59, 0  ;;  %vm4062_vm12 = vweird.f32 %v9142_v59 }
 0x451   : > { %6157 = vmatprep.subr.bf16.mxu1 %v9686_v3  ;;  %v3974_v31 = vshrl.u32 %v3973_v52, 23 }
 0x452   : > { %v6176_v45 = vpack.c.bf16 %v3502_v13, %v3495_v27  ;;  %v6182_v21 = vpack.c.bf16 %v3530_v14, %v3523_v12 }
 0x453   : > { %v4401_v36 = vadd.s32 4294967169, %v3974_v31 }
 0x454   : > { %6159 = vmatpush3.bf16.msra.mxu1 %v9162_v61 }
 0x455   : > { %6160 = vmatprep.subr.bf16.mxu1 %v9686_v3 }
 0x457   : > { %5887 = vmatmul.mubr.f32.vlgmr.msra.gmra.mrb[98].mxu1 %v3414_v26 }
 0x458   : > { %6162 = vmatpush3.bf16.msra.mxu1 %v9050_v11  ;;  %5921 = vmatprep.mubr.msk.f32.mxu1 %vm6961_vm4, %v9692_v34  ;;  %v9693_v11 = vld [vmem:[#allocation8_spill] sm:$0xff] }
 0x459   : > { %6163 = vmatprep.subr.bf16.mxu1 %v9686_v3  ;;  %6837 = vrcp.f32 %v9693_v11 }
 0x45c   : > { %6165 = vmatpush3.bf16.msra.mxu1 %v9092_v57 }
 0x45d   : > { %6166 = vmatprep.subr.bf16.mxu1 %v9686_v3 }
 0x460   : > { %6168 = vmatpush3.bf16.msra.mxu1 %v9053_v25 }
 0x461   : > { %6169 = vmatprep.subr.bf16.mxu1 %v9686_v3 }
 0x463   : > { %v6838_v25 = vpop.eup %6837 }
 0x464   : > { %6171 = vmatpush3.bf16.msra.mxu1 %v9094_v20  ;;  %6742 = vpush %v6838_v25 }
 0x465   : > { %6172 = vmatprep.subr.bf16.mxu1 %v9686_v3 }
 0x468   : > { %6174 = vmatpush3.bf16.msra.mxu1 %v6173_v24 }
 0x469   : > { %6175 = vmatprep.subr.bf16.mxu1 %v9686_v3 }
 0x46c   : > { %6177 = vmatpush3.bf16.msra.mxu1 %v6176_v45 }
 0x46d   : > { %6178 = vmatprep.subr.bf16.mxu1 %v9686_v3 }
 0x470   : > { %6180 = vmatpush3.bf16.msra.mxu1 %v6179_v39 }
 0x471   : > { %6181 = vmatprep.subr.bf16.mxu1 %v9686_v3 }
 0x474   : > { %6183 = vmatpush3.bf16.msra.mxu1 %v6182_v21 }
 0x475   : > { %6184 = vmatprep.subr.bf16.mxu1 %v9686_v3 }
 0x477   : > { %5922 = vmatmul.mubr.f32.vlgmr.msra.gmra.mrb[98].mxu1 %v9106_v2 }
 0x478   : > { %6186 = vmatpush3.bf16.msra.mxu1 %v6185_v62  ;;  %5956 = vmatprep.mubr.msk.f32.mxu1 %vm6961_vm4, %v9692_v34  ;;  %v3970_v62 = vand.u32 2147483647, %v9142_v59 }
 0x479   : > { %6187 = vmatprep.subr.bf16.mxu1 %v9686_v3 }
 0x47a   : > { %v3977_v35 = vand.u32 8388607, %v3970_v62  ;;  %vm3971_vm6 = vcmp.le.f32.partialorder %v3970_v62, 0.7853982 }
 0x47c   : > { %6189 = vmatpush3.bf16.msra.mxu1 %v6188_v55  ;;  %v6967_v55 = vmov 2102212464  }
 0x47d   : > { %6190 = vmatprep.subr.bf16.mxu1 %v9686_v3 }
 0x480   : > { %6192 = vmatpush3.bf16.msra.mxu1 %v6191_v37 }
 0x481   : > { %6193 = vmatprep.subr.bf16.mxu1 %v9686_v3 }
 0x484   : > { %6195 = vmatpush3.bf16.msra.mxu1 %v6194_v10  ;;  %v6968_v10 = vmov 2475754826  }
 0x485   : > { %6196 = vmatprep.subr.bf16.mxu1 %v9686_v3 }
 0x488   : > { %6198 = vmatpush3.bf16.msra.mxu1 %v9694_v15 }
 0x489   : > { %6199 = vmatprep.subr.bf16.mxu1 %v9686_v3 }
 0x48c   : > { %6201 = vmatpush3.bf16.msra.mxu1 %v6200_v40 }
 0x48d   : > { %6202 = vmatprep.subr.bf16.mxu1 %v9686_v3 }
 0x490   : > { %6204 = vmatpush3.bf16.msra.mxu1 %v6203_v7  ;;  %v3978_v7 = vor.u32 8388608, %v3977_v35 }
 0x491   : > { %6205 = vmatprep.subr.bf16.mxu1 %v9686_v3 }
 0x492   : > { %v4018_v39 = vshll.u32 %v3978_v7, 8 }
 0x494   : > { %6207 = vmatpush3.bf16.msra.mxu1 %v6206_v9 }
 0x495   : > { %6208 = vmatprep.subr.bf16.mxu1 %v9686_v3  ;;  %s6743_s9 = spop %6742 }
 0x497   : > { %5957 = vmatmul.mubr.f32.vlgmr.msra.gmra.mrb[98].mxu1 %v9112_v30 }
 0x498   : > { %6210 = vmatpush3.bf16.msra.mxu1 %v9012_v18  ;;  %5991 = vmatprep.mubr.msk.f32.mxu1 %vm6961_vm4, %v9692_v34 }
 0x499   : > { %6211 = vmatprep.subr.bf16.mxu1 %v9686_v3 }
 0x49c   : > { %6213 = vmatpush3.bf16.msra.mxu1 %v9046_v42 }
 0x49d   : > { %6214 = vmatprep.subr.bf16.mxu1 %v9686_v3 }
 0x4a0   : > { %6216 = vmatpush3.bf16.msra.mxu1 %v9014_v54 }
 0x4a1   : > { %6217 = vmatprep.subr.bf16.mxu1 %v9686_v3 }
 0x4a4   : > { %6219 = vmatpush3.bf16.msra.mxu1 %v9048_v56 }
 0x4a5   : > { %6220 = vmatprep.subr.bf16.mxu1 %v9686_v3 }
 0x4a8   : > { %6222 = vmatpush3.bf16.msra.mxu1 %v9129_v6 }
 0x4a9   : > { %6223 = vmatprep.subr.bf16.mxu1 %v9686_v3 }
 0x4ac   : > { %6225 = vmatpush3.bf16.msra.mxu1 %v9160_v47 }
 0x4ad   : > { %6226 = vmatprep.subr.bf16.mxu1 %v9686_v3 }
 0x4b0   : > { %6228 = vmatpush3.bf16.msra.mxu1 %v9131_v50 }
 0x4b1   : > { %6229 = vmatprep.subr.bf16.mxu1 %v9686_v3 }
 0x4b4   : > { %6231 = vmatpush3.bf16.msra.mxu1 %v9162_v61 }
 0x4b5   : > { %6232 = vmatprep.subr.bf16.mxu1 %v9686_v3 }
 0x4b7   : > { %5992 = vmatmul.mubr.f32.vlgmr.msra.gmra.mrb[98].mxu1 %v3412_v17 }
 0x4b8   : > { %6234 = vmatpush3.bf16.msra.mxu1 %v9075_v22  ;;  %6026 = vmatprep.mubr.msk.f32.mxu1 %vm6961_vm4, %v9692_v34 }
 0x4b9   : > { %6235 = vmatprep.subr.bf16.mxu1 %v9686_v3 }
 0x4bc   : > { %6237 = vmatpush3.bf16.msra.mxu1 %v9077_v46  ;;  %v6969_v46 = vmov 2131351028  }
 0x4bd   : > { %6238 = vmatprep.subr.bf16.mxu1 %v9686_v3 }
 0x4c0   : > { %6240 = vmatpush3.bf16.msra.mxu1 %v9087_v1 }
 0x4c1   : > { %6241 = vmatprep.subr.bf16.mxu1 %v9686_v3 }
 0x4c4   : > { %6243 = vmatpush3.bf16.msra.mxu1 %v9089_v33 }
 0x4c5   : > { %6244 = vmatprep.subr.bf16.mxu1 %v9686_v3 }
 0x4c8   : > { %6246 = vmatpush3.bf16.msra.mxu1 %v9174_v0 }
 0x4c9   : > { %6247 = vmatprep.subr.bf16.mxu1 %v9686_v3 }
 0x4cc   : > { %6249 = vmatpush3.bf16.msra.mxu1 %v9180_v5 }
 0x4cd   : > { %6250 = vmatprep.subr.bf16.mxu1 %v9686_v3 }
 0x4d0   : > { %6252 = vmatpush3.bf16.msra.mxu1 %v9176_v43 }
 0x4d1   : > { %6253 = vmatprep.subr.bf16.mxu1 %v9686_v3 }
 0x4d4   : > { %6255 = vmatpush3.bf16.msra.mxu1 %v9182_v4 }
 0x4d5   : > { %6256 = vmatprep.subr.bf16.mxu1 %v9686_v3 }
 0x4d7   : > { %6027 = vmatmul.mubr.f32.vlgmr.msra.gmra.mrb[98].mxu1 %v9106_v2 }
 0x4d8   : > { %6258 = vmatpush3.bf16.msra.mxu1 %v9012_v18  ;;  %6061 = vmatprep.mubr.msk.f32.mxu1 %vm6961_vm4, %v9692_v34  ;;  %v3980_v18 = vadd.s32 1, %v4401_v36 }
 0x4d9   : > { %6259 = vmatprep.subr.bf16.mxu1 %v9686_v3 }
 0x4da   : > { %vm3981_vm14 = vcmp.gt.s32.totalorder %v3980_v18, 0 }
 0x4dc   : > { %6261 = vmatpush3.bf16.msra.mxu1 %v9046_v42  ;;  %v6966_v42 = vmov 1326507024  }
 0x4dd   : > { %6262 = vmatprep.subr.bf16.mxu1 %v9686_v3 }
 0x4e0   : > { %6264 = vmatpush3.bf16.msra.mxu1 %v9014_v54  ;;  %v3982_v54 = vsel %vm3981_vm14, %v3980_v18, 0  ;;  %vm4272_vm14 = vcmask 1040384  }
 0x4e1   : > { %6265 = vmatprep.subr.bf16.mxu1 %v9686_v3  ;;  %v3984_v16 = vand.u32 31, %v3982_v54 }
 0x4e3   : > { %v3985_v23 = vsub.s32 32, %v3984_v16  ;;  %v3996_v37 = vshll.u32 %v6967_v55, %v3984_v16  ;;  %v3999_v57 = vshll.u32 %v6965_v28, %v3984_v16  ;;  %v3990_v19 = vshll.u32 %v6968_v10, %v3984_v16 }
 0x4e4   : > { %6267 = vmatpush3.bf16.msra.mxu1 %v9048_v56  ;;  %v3993_v29 = vshll.u32 %v6969_v46, %v3984_v16 }
 0x4e5   : > { %6268 = vmatprep.subr.bf16.mxu1 %v9686_v3  ;;  %v3997_v49 = vshrl.u32 %v6965_v28, %v3985_v23  ;;  %v4000_v56 = vshrl.u32 %v6966_v42, %v3985_v23  ;;  %v3988_v22 = vshrl.u32 %v6968_v10, %v3985_v23  ;;  %v3991_v1 = vshrl.u32 %v6969_v46, %v3985_v23 }
 0x4e6   : > { %v3994_v33 = vshrl.u32 %v6967_v55, %v3985_v23 }
 0x4e7   : > { %v3998_v20 = vor.u32 %v3997_v49, %v3996_v37  ;;  %v4001_v17 = vor.u32 %v4000_v56, %v3999_v57 }
 0x4e8   : > { %6270 = vmatpush3.bf16.msra.mxu1 %v9129_v6  ;;  %v3992_v6 = vor.u32 %v3991_v1, %v3990_v19 }
 0x4e9   : > { %6271 = vmatprep.subr.bf16.mxu1 %v9686_v3 }
 0x4ec   : > { %6273 = vmatpush3.bf16.msra.mxu1 %v9160_v47 }
 0x4ed   : > { %6274 = vmatprep.subr.bf16.mxu1 %v9686_v3 }
 0x4f0   : > { %6276 = vmatpush3.bf16.msra.mxu1 %v9131_v50  ;;  %v3995_v50 = vor.u32 %v3994_v33, %v3993_v29 }
 0x4f1   : > { %6277 = vmatprep.subr.bf16.mxu1 %v9686_v3  ;;  %v3983_v3 = vshrl.u32 %v3982_v54, 5 }
 0x4f3   : > { %vm4005_vm15 = vcmp.lt.s32.totalorder %v3983_v3, 4  ;;  %vm4002_vm0 = vcmp.lt.s32.totalorder %v3983_v3, 1  ;;  %vm4004_vm1 = vcmp.lt.s32.totalorder %v3983_v3, 3  ;;  %vm4003_vm2 = vcmp.lt.s32.totalorder %v3983_v3, 2 }
 0x4f4   : > { %6279 = vmatpush3.bf16.msra.mxu1 %v9162_v61  ;;  %v4011_v41 = vsel %vm4005_vm15, %v3998_v20, 920167782  ;;  %v4015_v60 = vsel %vm4005_vm15, %v4001_v17, 1326507024  ;;  %v4014_v47 = vsel %vm4002_vm0, %v3992_v6, %v3995_v50  ;;  %v4007_v0 = vsel %vm4005_vm15, %v3995_v50, 2102212464 }
 0x4f5   : > { %v4012_v32 = vsel %vm4004_vm1, %v3995_v50, %v4011_v41  ;;  %v4016_v61 = vsel %vm4004_vm1, %v3998_v20, %v4015_v60  ;;  %v4008_v8 = vsel %vm4004_vm1, %v3992_v6, %v4007_v0  ;;  %v4217_v41 = vrot.slane %v9142_v59, 3 }
 0x4f6   : > { %v4017_v63 = vsel %vm4003_vm2, %v4014_v47, %v4016_v61  ;;  %v4214_v47 = vrot.slane %v9142_v59, 5  ;;  %vm4274_vm15 = vcmask 1041408  }
 0x4f7   : > { %6062 = vmatmul.mubr.f32.vlgmr.msra.gmra.mrb[98].mxu1 %v9106_v2  ;;  %v6970_v2 = vmov 683565275   ;;  %v9306_v40 = vmul.u32.u64.low %v4018_v39, %v4017_v63  ;;  %v9307_v9 = vmul.u32.u64.high %v4018_v39, %v4017_v63, %v9306_v40  ;;  %v4219_v61 = vmul.f32 %v9142_v59, %v4217_v41 }
 0x4f8   : > { %v3987_v30 = vshll.u32 %v6970_v2, %v3984_v16  ;;  %v3986_v43 = vshrl.u32 %v6970_v2, %v3985_v23  ;;  %v4239_v63 = vrot.slane %v9142_v59, 6 }
 0x4f9   : > { %v4221_v0 = vrot.slane %v4219_v61, 1 }
 0x4fa   : > { %v3989_v53 = vor.u32 %v3988_v22, %v3987_v30 }
 0x4fc   : > { %v4010_v58 = vsel %vm4002_vm0, %v3989_v53, %v3992_v6  ;;  %v4006_v51 = vsel %vm4002_vm0, %v3986_v43, %v3989_v53  ;;  %vm4276_vm0 = vcmask 1042432  }
 0x4fd   : > { %v4013_v24 = vsel %vm4003_vm2, %v4010_v58, %v4012_v32  ;;  %v4009_v4 = vsel %vm4003_vm2, %v4006_v51, %v4008_v8  ;;  %v4232_v8 = vrot.slane %v9142_v59, 7 }
 0x4fe   : > { %v9303_v44 = vmul.u32.u64.low %v4018_v39, %v4013_v24  ;;  %v9304_v38 = vmul.u32.u64.high %v4018_v39, %v4013_v24, %v9303_v44  ;;  %v4025_v27 = vmul.u32 %v4018_v39, %v4009_v4  ;;  %v4225_v24 = vrot.slane %v9142_v59, 4 }
 0x500   : > { %v4028_v5 = vadd.s32 1, %v9304_v38  ;;  %vm4027_vm3 = vc.u32 %v9307_v9, %v9303_v44  ;;  %v4026_v18 = vadd.s32 %v9303_v44, %v9307_v9  ;;  %v4216_v9 = vmul.f32 %v9142_v59, %v4214_v47 }
 0x501   : > { %v4227_v43 = vmul.f32 %v9142_v59, %v4225_v24 }
 0x502   : > { %v4029_v48 = vsel %vm4027_vm3, %v4028_v5, %v9304_v38  ;;  %v4241_v5 = vmul.f32 %v9142_v59, %v4239_v63 }
 0x503   : > { %v4030_v13 = vadd.s32 %v4029_v48, %v4025_v27 }
 0x505   : > { %v4031_v12 = vadd.s32 536870912, %v4030_v13 }
 0x507   : > { %v4032_v14 = vshrl.u32 %v4031_v12, 30  ;;  %v4223_v12 = vadd.f32 %v4221_v0, %v4216_v9 }
 0x509   : > { %v4033_v45 = vshll.u32 %v4032_v14, 30  ;;  %v4056_v22 = vsub.s32 4, %v4032_v14 }
 0x50b   : > { %v4034_v21 = vsub.s32 %v4030_v13, %v4033_v45  ;;  %v4057_v46 = vsel %vm3972_vm5, %v4056_v22, %v4032_v14  ;;  %v4229_v14 = vrot.slane %v4227_v43, 1  ;;  %v4236_v45 = vrot.slane %v4216_v9, 1 }
 0x50c   : > { %v4059_v33 = vsel %vm3971_vm6, 0, %v4057_v46 }
 0x50d   : > { %v4036_v26 = vsub.s32 0, %v4034_v21  ;;  %v4063_v20 = vand.u32 3, %v4059_v33  ;;  %v4166_v2 = vadd.s32 3, %v4059_v33 }
 0x50f   : > { %v4402_v34 = vmin.u32 %v4036_v26, %v4034_v21  ;;  %vm4065_vm7 = vcmp.eq.s32.totalorder %v4063_v20, 0  ;;  %vm4068_vm8 = vcmp.eq.s32.totalorder %v4063_v20, 2  ;;  %v4167_v29 = vand.u32 3, %v4166_v2 }
 0x510   : > { %vm4064_vm9 = vcmp.lt.s32.totalorder %v4063_v20, 2 }
 0x511   : > { %v4038_v11 = vclz %v4402_v34  ;;  %vm4169_vm10 = vcmp.eq.s32.totalorder %v4167_v29, 0  ;;  %vm4172_vm11 = vcmp.eq.s32.totalorder %v4167_v29, 2  ;;  %vm4168_vm13 = vcmp.lt.s32.totalorder %v4167_v29, 2 }
 0x512   : > { %v4234_v34 = vmul.f32 %v9142_v59, %v4232_v8 }
 0x513   : > { %v4403_v25 = vadd.s32 4294967294, %v4038_v11  ;;  %v4243_v11 = vrot.slane %v4241_v5, 1 }
 0x515   : > { %vm4404_vm4 = vcmp.lt.s32.totalorder %v4403_v25, 0 }
 0x516   : > { %v4041_v15 = vsel %vm4404_vm4, 0, %v4403_v25 }
 0x517   : > { %v4046_v52 = vsub.s32 4294967266, %v4041_v15  ;;  %v4042_v36 = vsub.s32 32, %v4041_v15  ;;  %v4043_v23 = vshll.u32 %v4034_v21, %v4041_v15 }
 0x519   : > { %v4047_v31 = vadd.s32 127, %v4046_v52  ;;  %v4044_v16 = vshrl.u32 %v4026_v18, %v4042_v36  ;;  %v4224_v36 = vsub.f32 0.0, %v4223_v12  ;;  %v4231_v18 = vsub.f32 %v4227_v43, %v4229_v14 }
 0x51b   : > { %v4048_v54 = vshll.u32 %v4047_v31, 23  ;;  %v4045_v49 = vor.u32 %v4044_v16, %v4043_v23  ;;  %v4245_v23 = vadd.f32 %v4243_v11, %v4241_v5 }
 0x51d   : > { %v4049_v28 = vor.u32 4788187, %v4048_v54  ;;  %v4052_v56 = vcvt.s32.f32 %v4045_v49  ;;  %v4238_v54 = vsub.f32 %v4234_v34, %v4236_v45 }
 0x51f   : > { %v4050_v42 = vand.u32 2147483647, %v4049_v28 }
 0x521   : > { %v4053_v3 = vmul.f32 %v4052_v56, %v4050_v42 }
 0x523   : > { %v4054_v55 = vxor.u32 2147483648, %v4053_v3 }
 0x525   : > { %v4055_v37 = vsel %vm3972_vm5, %v4054_v55, %v4053_v3  ;;  %v4248_v55 = vrot.slane %v4224_v36, 2 }
 0x526   : > { %v4058_v10 = vsel %vm3971_vm6, %v9142_v59, %v4055_v37  ;;  %v4256_v37 = vrot.slane %v4231_v18, 1 }
 0x527   : > { %6839 = vcosq.f32 %v4058_v10 }
 0x528   : > { %6841 = vsinq.f32 %v4058_v10  ;;  %v4261_v10 = vrot.slane %v4238_v54, 6 }
 0x531   : > { %v6840_v1 = vpop.eup %6839 }
 0x532   : > { %v6842_v57 = vpop.eup %6841  ;;  %v4069_v19 = vxor.u32 2147483648, %v6840_v1 }
 0x533   : > { %v4066_v30 = vxor.u32 2147483648, %v6842_v57 }
 0x534   : > { %v4070_v35 = vsel %vm4068_vm8, %v4069_v19, %v6842_v57  ;;  %v4174_v6 = vsel %vm4172_vm11, %v4069_v19, %v6842_v57  ;;  %v4269_v57 = vrot.slane %v4245_v23, 5 }
 0x535   : > { %v4067_v17 = vsel %vm4065_vm7, %v6840_v1, %v4066_v30  ;;  %v4171_v53 = vsel %vm4169_vm10, %v6840_v1, %v4066_v30 }
 0x536   : > { %v4071_v62 = vsel %vm4064_vm9, %v4067_v17, %v4070_v35  ;;  %v4175_v60 = vsel %vm4168_vm13, %v4171_v53, %v4174_v6  ;;  %v4278_v17 = vstv %s6743_s9 }
 0x537   : > { %v4072_v50 = vsel %vm4062_vm12, nan, %v4071_v62  ;;  %v4176_v32 = vsel %vm4062_vm12, nan, %v4175_v60 }
 0x538   : > { %v4192_v7 = vrot.slane %v4072_v50, 3  ;;  %v4206_v58 = vrot.slane %v4072_v50, 2  ;;  %v4182_v39 = vrot.slane %v4176_v32, 3  ;;  %v4199_v38 = vrot.slane %v4176_v32, 2 }
 0x539   : > { %v4189_v51 = vrot.slane %v4176_v32, 4  ;;  %v4178_v21 = vrot.slane %v4072_v50, 4 }
 0x53a   : > { %v4194_v44 = vmul.f32 %v9142_v59, %v4192_v7  ;;  %v4208_v40 = vmul.f32 %v9142_v59, %v4206_v58  ;;  %v4184_v4 = vmul.f32 %v9142_v59, %v4182_v39  ;;  %v4201_v27 = vmul.f32 %v9142_v59, %v4199_v38 }
 0x53b   : > { %v4191_v26 = vmul.f32 %v9142_v59, %v4189_v51  ;;  %v4180_v16 = vmul.f32 %v9142_v59, %v4178_v21 }
 0x53c   : > { %v4196_v48 = vrot.slane %v4194_v44, 1  ;;  %v4210_v13 = vrot.slane %v4208_v40, 1  ;;  %v4186_v25 = vrot.slane %v4184_v4, 1  ;;  %v4203_v52 = vrot.slane %v4201_v27, 1 }
 0x53e   : > { %v4198_v15 = vadd.f32 %v4196_v48, %v4191_v26  ;;  %v4212_v31 = vadd.f32 %v4210_v13, %v4184_v4  ;;  %v4188_v28 = vsub.f32 %v4180_v16, %v4186_v25  ;;  %v4205_v49 = vsub.f32 %v4194_v44, %v4203_v52 }
 0x540   : > { %v4252_v42 = vrot.slane %v4198_v15, 7  ;;  %v4265_v56 = vrot.slane %v4212_v31, 7 }
 0x5ca   : > { %v3966_v3 = vpop.f32.mrb[98].mxu1 }
 0x5cb   : > { %v4246_v22 = vadd.f32 %v4188_v28, %v3966_v3  ;;  %v4254_v46 = vadd.f32 %v4252_v42, %v3966_v3  ;;  %v4259_v1 = vadd.f32 %v4205_v49, %v3966_v3  ;;  %v4267_v33 = vadd.f32 %v4265_v56, %v3966_v3  ;;  %v6063_v59 = vpop.f32.mrb[99].mxu1 }
 0x5cd   : > { %v4250_v20 = vadd.f32 %v4248_v55, %v4246_v22  ;;  %v4258_v2 = vadd.f32 %v4256_v37, %v4254_v46  ;;  %v4263_v30 = vadd.f32 %v4261_v10, %v4259_v1  ;;  %v4271_v19 = vadd.f32 %v4269_v57, %v4267_v33 }
 0x5cf   : > { %v4273_v29 = vsel %vm4272_vm14, %v4250_v20, %v4258_v2 }
 0x5d0   : > { %v4275_v35 = vsel %vm4274_vm15, %v4273_v29, %v4263_v30 }
 0x5d1   : > { %v4277_v62 = vsel %vm4276_vm0, %v4275_v35, %v4271_v19 }
 0x5d2   : > { %v4279_v53 = vmul.f32 %v4278_v17, %v4277_v62 }
 0x5d4   : > { %4280 = vst [vmem:[%s247_s13] sm:$0xf] %v4279_v53 }
 0x5d5   : > { %6868 = shalt.err (!%p6865_p0)
}
 0x5d6   : > { %s6869_s22 = scalar_lea.hbm %s9348_s25, 64  ;;  %s6873_s12 = scalar_lea.hbm %s9408_s5, 256 }
 0x5d7   : > { %p6870_p1 = scmp.ne.s32.totalorder %s9348_s25, %s6869_s22  ;;  %p6874_p4 = scmp.lt.u32.totalorder %s9348_s25, %s9408_s5 }
 0x5d8   : > { %p6875_p5 = scmp.lt.u32.totalorder %s6873_s12, %s6869_s22  ;;  %p6877_p7 = scmp.lt.u32.totalorder %s6869_s22, %s9348_s25 }
 0x5d9   : > { %p6871_p2 = pnand %p6870_p1, %p7056_p8 }
 0x5da   : > { %p6876_p6 = por %p6875_p5, %p6874_p4 }
 0x5db   : > { %p6872_p3 = pneg %p6871_p2 }
 0x5dc   : > { %p6878_p9 = por %p6877_p7, %p6876_p6 }
 0x5de   : > { %p6879_p10 = pnand %p6878_p9, %p6872_p3 }
 0x5e0   : > { %6882 = shalt.err (!%p6879_p10)
}
 0x5e1   : > { %6748 = dma.vmem_to_hbm [thread:$0]  (%p7056_p8), %s9350_s14, 64, %s9348_s25, %s4282_s16  }
 0x5e2 PF: > { %p6754_p11 = scmp.ge.s32.totalorder %s6951_s29, 2  ;;  %s4309_s17 = sand.u32 1, %s6923_s23  }
 0x5e3   : > { %s4310_s18 = scalar_lea.sflag [#allocation5], %s4309_s17 }
 0x5e4   : > { %p6751_p12 = pnand %p6754_p11, %p7065_p13 }
 0x5e6   : > { %6918 = dma.done.wait (!%p6751_p12), %s4310_s18, 64  }
 0x5e7   : > { %6920 = vsyncadd (!%p6751_p12), %s4310_s18, 4294967232  ;;  %s24_s29 = sadd.s32 1, %s6951_s29   ;;  %s9695_s23 = smov %s6927_s24 }
 0x5e8   : > { %p21_p0 = scmp.ge.s32.totalorder %s24_s29, 6   ;;  %s9696_s24 = smov %s6931_s0 }
 0x5e9   : > { %s9697_s0 = smov %s7074_s15  ;;  %s9698_s25 = smov %s6943_s27 }
 0x5ea   : > { %s9699_s26 = smov %s6947_s28  ;;  %s9700_s27 = smov %s9703_s7 }
 0x5eb   : > { %s9701_s28 = smov %s9707_s8  ;;  %23 = sbr.rel (!%p21_p0) target bundleno = 20 (0x14), region = 74 }
 0x5f2   :  { %4315 = vsyncpa [#allocation5], 1 }
 0x5f3   :  { %4317 = vsyncpa [#allocation5 + $0x1], 1 }

</bundles_post_ra>
